<compile_context>
chip_gen: v7x
topology: tpu7x:2x2x1
jax: 0.10.0
libtpu: 0.0.40
codegen_flags: <defaults>
</compile_context>

<pallas_src>
import functools

import numpy as np

import jax
import jax.numpy as jnp
from jax.experimental import pallas as pl
from jax.experimental.pallas import tpu as pltpu


def meta_opt_kernel(x_ref, w1_ref, b1_ref, wih_ref, w2_ref, b2_ref, out_ref,
                    *, hidden):
    H = hidden
    x = x_ref[...]                                             # (1, TN)
    tn = x.shape[1]

    # linear1 (1 -> H) + tanh. K=1 "matmul" done as a VPU broadcast outer prod.
    x1 = jnp.tanh(w1_ref[...] * x + b1_ref[...])               # (H, TN)

    # Append an aligned 8-row block whose first row is ones: the summed LSTM
    # bias (b_ih + b_hh + W_hh @ h0) rides the MXU contraction dim as an extra
    # column of W_ih instead of a (3H, TN) VPU broadcast-add.  Rows 1..7 are
    # zero and multiply zero weight columns (exact).
    row_id = jax.lax.broadcasted_iota(jnp.int32, (8, tn), 0)
    bias_rows = jnp.where(row_id == 0, 1.0, 0.0).astype(jnp.float32)
    x1a = jnp.concatenate([x1, bias_rows], axis=0)             # (H + 8, TN)

    # Gates for [input, cell, output] only; the forget gate is elided because
    # c0 == 0 (reset_lstm) makes its contribution exactly zero.
    gates = jnp.dot(wih_ref[...], x1a,
                    preferred_element_type=jnp.float32)        # (3H, TN)

    i_g = jax.nn.sigmoid(gates[0:H, :])
    g_g = jnp.tanh(gates[H:2 * H, :])
    o_g = jax.nn.sigmoid(gates[2 * H:3 * H, :])

    c_new = i_g * g_g                                          # f_g * c0 == 0
    h_new = o_g * jnp.tanh(c_new)                              # (H, TN)

    # linear2 (H -> 1): VPU multiply + sublane reduce (MXU not the binding
    # slot; keep off it unless a bundle dump says otherwise).
    out = jnp.sum(w2_ref[...] * h_new, axis=0, keepdims=True)  # (1, TN)
    out_ref[...] = out + b2_ref[0, 0]


def init_params(key, hidden):
    """Deterministic synthetic parameters matching the PyTorch module shapes."""
    ks = jax.random.split(key, 8)
    H = hidden
    s1 = 1.0                              # 1/sqrt(fan_in=1) for linear1
    sH = 1.0 / jnp.sqrt(H)                # 1/sqrt(H) for LSTM / linear2
    p = {
        # nn.Linear(1, H): weight (H, 1), bias (H,)
        "w1": jax.random.uniform(ks[0], (H, 1), jnp.float32, -s1, s1),
        "b1": jax.random.uniform(ks[1], (H,), jnp.float32, -s1, s1),
        # nn.LSTMCell(H, H): weight_ih (4H, H), weight_hh (4H, H), biases (4H,)
        "w_ih": jax.random.uniform(ks[2], (4 * H, H), jnp.float32, -sH, sH),
        "w_hh": jax.random.uniform(ks[3], (4 * H, H), jnp.float32, -sH, sH),
        "b_ih": jax.random.uniform(ks[4], (4 * H,), jnp.float32, -sH, sH),
        "b_hh": jax.random.uniform(ks[5], (4 * H,), jnp.float32, -sH, sH),
        # nn.Linear(H, 1): weight (1, H) scaled by 0.1, bias (1,) zeroed
        "w2": jax.random.uniform(ks[6], (1, H), jnp.float32, -sH, sH) * 0.1,
        "b2": jnp.zeros((1,), jnp.float32),
        # reset_lstm(): hx = cx = zeros(1, H)
        "h0": jnp.zeros((1, H), jnp.float32),
        "c0": jnp.zeros((1, H), jnp.float32),
    }
    return p


def _choose_tile(n, tn_max=8192, lanes=128):
    """Pick the lane tile TN.

    Small inputs -> one grid step with a single tile (the grid is a serial
    loop on 1-TC v5e/v6e, so splitting only adds per-step overhead).
    Large inputs -> TN up to tn_max with an even step count, so a 2-TC chip
    (v7x) can shard the 'parallel' grid axis cleanly.
    """
    n_up = -(-max(n, 1) // lanes) * lanes
    if n_up <= tn_max:
        return n_up
    steps = -(-n_up // tn_max)
    if steps % 2:
        steps += 1                        # even step count for v7x 2-TC split
    per_step = -(-n_up // steps)
    return min(tn_max, -(-per_step // lanes) * lanes)


def meta_optimizer_forward(inputs, params, *, hidden, tn_max=8192):
    H = hidden
    initial_shape = inputs.shape
    x_flat = inputs.reshape(-1).astype(jnp.float32)
    n = x_flat.shape[0]

    tn = _choose_tile(n, tn_max)
    n_pad = -(-n // tn) * tn
    x2d = jnp.pad(x_flat, (0, n_pad - n)).reshape(1, n_pad)

    # ---- host-side parameter prep (all exact algebra, no approximation) ----
    # Guard: the forget-gate elision below is only valid when c0 == 0
    # (reset_lstm).  Fail loudly if that ever changes.
    c0_np = np.asarray(params["c0"])
    if c0_np.any():
        raise NotImplementedError(
            "meta_optimizer_forward fast path assumes c0 == 0 (reset_lstm)")

    w1 = params["w1"]                                      # (H, 1)
    b1 = params["b1"].reshape(H, 1)                        # (H, 1)

    # Summed LSTM bias with the constant W_hh @ h0 column folded in (exact:
    # h0 is a single row broadcast to every element of the flattened input).
    bsum = (params["b_ih"] + params["b_hh"]).reshape(4 * H, 1) \
        + params["w_hh"] @ params["h0"].reshape(H, 1)      # (4H, 1)

    # Keep only the [input, cell, output] gate rows (PyTorch order i,f,g,o);
    # the forget rows multiply c0 == 0 and are dead.
    def keep_rows(a):
        return jnp.concatenate(
            [a[0:H], a[2 * H:3 * H], a[3 * H:4 * H]], axis=0)

    wih_keep = keep_rows(params["w_ih"])                   # (3H, H)
    bsum_keep = keep_rows(bsum)                            # (3H, 1)

    # Augment W_ih with the bias as column H (columns H+1..H+7 are zero and
    # pair with the zero padding rows the kernel appends to x1).
    wih_aug = jnp.zeros((3 * H, H + 8), jnp.float32)
    wih_aug = wih_aug.at[:, :H].set(wih_keep)
    wih_aug = wih_aug.at[:, H].set(bsum_keep[:, 0])        # (3H, H+8)

    w2 = params["w2"].reshape(H, 1)                        # (H, 1) VPU reduce
    b2 = params["b2"].reshape(1, 1)                        # (1, 1) -> SMEM

    full = lambda i: (0, 0)
    grid = (n_pad // tn,)

    out = pl.pallas_call(
        functools.partial(meta_opt_kernel, hidden=H),
        out_shape=jax.ShapeDtypeStruct((1, n_pad), jnp.float32),
        grid=grid,
        in_specs=[
            pl.BlockSpec((1, tn), lambda i: (0, i)),       # input chunk
            pl.BlockSpec(w1.shape, full),
            pl.BlockSpec(b1.shape, full),
            pl.BlockSpec(wih_aug.shape, full),
            pl.BlockSpec(w2.shape, full),
            pl.BlockSpec(memory_space=pltpu.MemorySpace.SMEM),   # b2 scalar
        ],
        out_specs=pl.BlockSpec((1, tn), lambda i: (0, i)),
        compiler_params=pltpu.CompilerParams(
            # 'parallel' lets the runtime shard the N axis across TCs on v7x;
            # on 1-TC chips it is a plain serial loop (no cost).
            dimension_semantics=("parallel",),
            vmem_limit_bytes=32 << 20),
    )(x2d, w1, b1, wih_aug, w2, b2)

    return out.reshape(-1)[:n].reshape(initial_shape)


def meta_optimizer_reference(inputs, params, *, hidden):
    """Pure-JAX reference mirroring the PyTorch forward exactly (incl. forget gate)."""
    H = hidden
    initial_shape = inputs.shape
    x = inputs.reshape(-1, 1).astype(jnp.float32)                     # (N, 1)
    x = jnp.tanh(x @ params["w1"].T + params["b1"][None, :])          # (N, H)
    h0 = jnp.broadcast_to(params["h0"], (x.shape[0], H))
    c0 = jnp.broadcast_to(params["c0"], (x.shape[0], H))
    gates = (x @ params["w_ih"].T + params["b_ih"][None, :]
             + h0 @ params["w_hh"].T + params["b_hh"][None, :])       # (N, 4H)
    i_g = jax.nn.sigmoid(gates[:, 0:H])
    f_g = jax.nn.sigmoid(gates[:, H:2 * H])
    g_g = jnp.tanh(gates[:, 2 * H:3 * H])
    o_g = jax.nn.sigmoid(gates[:, 3 * H:4 * H])
    c = f_g * c0 + i_g * g_g
    h = o_g * jnp.tanh(c)
    out = h @ params["w2"].T + params["b2"][None, :]                  # (N, 1)
    return out.reshape(initial_shape)


if __name__ == "__main__":
    hidden = 32
    key = jax.random.PRNGKey(0)
    k_param, k_x = jax.random.split(key)

    params = init_params(k_param, hidden)

    # Arbitrary "flat gradients"-like input; forward flattens it anyway.
    x = jax.random.normal(k_x, (2, 4, 16, 16), jnp.float32)

    out = meta_optimizer_forward(x, params, hidden=hidden)
    out = jax.block_until_ready(out)

    ref = meta_optimizer_reference(x, params, hidden=hidden)
    assert out.shape == x.shape
    assert jnp.allclose(out, ref, atol=1e-5, rtol=1e-5), (
        float(jnp.max(jnp.abs(out - ref))))

    print("KERNEL_OK")
</pallas_src>

<mosaic_0001>
module attributes {stable_mosaic.version = 11 : i64} {
  func.func @meta_opt_kernel(%arg0: i32, %arg1: memref<1x2048xf32, #tpu.memory_space<vmem>>, %arg2: memref<32x1xf32, #tpu.memory_space<vmem>>, %arg3: memref<32x1xf32, #tpu.memory_space<vmem>>, %arg4: memref<96x40xf32, #tpu.memory_space<vmem>>, %arg5: memref<32x1xf32, #tpu.memory_space<vmem>>, %arg6: memref<1x1xf32, #tpu.memory_space<smem>>, %arg7: memref<1x2048xf32, #tpu.memory_space<vmem>>) attributes {dimension_semantics = [#tpu.dimension_semantics<parallel>], iteration_bounds = array<i64: 1>, scalar_prefetch = 0 : i64, scratch_operands = 0 : i64, tpu.core_type = #tpu.core_type<tc>, window_params = [{transform_indices = @transform_0, window_bounds = array<i64: 1, 2048>}, {pipeline_mode = #tpu.pipeline_mode<synchronous>, transform_indices = @transform_1, window_bounds = array<i64: 32, 1>}, {pipeline_mode = #tpu.pipeline_mode<synchronous>, transform_indices = @transform_2, window_bounds = array<i64: 32, 1>}, {pipeline_mode = #tpu.pipeline_mode<synchronous>, transform_indices = @transform_3, window_bounds = array<i64: 96, 40>}, {pipeline_mode = #tpu.pipeline_mode<synchronous>, transform_indices = @transform_4, window_bounds = array<i64: 32, 1>}, {transform_indices = @transform_5, window_bounds = array<i64: 1, 1>}, {transform_indices = @transform_6, window_bounds = array<i64: 1, 2048>}]} {
    %c0 = arith.constant 0 : index
    %c0_0 = arith.constant 0 : index
    %0 = vector.load %arg1[%c0, %c0_0] : memref<1x2048xf32, #tpu.memory_space<vmem>>, vector<1x2048xf32>
    %c0_1 = arith.constant 0 : index
    %c0_2 = arith.constant 0 : index
    %1 = vector.load %arg2[%c0_1, %c0_2] : memref<32x1xf32, #tpu.memory_space<vmem>>, vector<32x1xf32>
    %2 = vector.broadcast %1 : vector<32x1xf32> to vector<32x2048xf32>
    %3 = vector.broadcast %0 : vector<1x2048xf32> to vector<32x2048xf32>
    %4 = arith.mulf %2, %3 : vector<32x2048xf32>
    %c0_3 = arith.constant 0 : index
    %c0_4 = arith.constant 0 : index
    %5 = vector.load %arg3[%c0_3, %c0_4] : memref<32x1xf32, #tpu.memory_space<vmem>>, vector<32x1xf32>
    %6 = vector.broadcast %5 : vector<32x1xf32> to vector<32x2048xf32>
    %7 = arith.addf %4, %6 : vector<32x2048xf32>
    %8 = math.tanh %7 : vector<32x2048xf32>
    %9 = tpu.iota {dimensions = array<i32: 0>} : vector<8x2048xi32>
    %c0_i32 = arith.constant 0 : i32
    %10 = vector.broadcast %c0_i32 : i32 to vector<8x2048xi32>
    %11 = arith.cmpi eq, %9, %10 : vector<8x2048xi32>
    %cst = arith.constant 1.000000e+00 : f32
    %cst_5 = arith.constant 0.000000e+00 : f32
    %12 = vector.broadcast %cst : f32 to vector<8x2048xf32>
    %13 = vector.broadcast %cst_5 : f32 to vector<8x2048xf32>
    %14 = arith.select %11, %12, %13 : vector<8x2048xi1>, vector<8x2048xf32>
    %15 = tpu.concatenate %8, %14 in 0 : vector<32x2048xf32>, vector<8x2048xf32> -> vector<40x2048xf32>
    %c0_6 = arith.constant 0 : index
    %c0_7 = arith.constant 0 : index
    %16 = vector.load %arg4[%c0_6, %c0_7] : memref<96x40xf32, #tpu.memory_space<vmem>>, vector<96x40xf32>
    %cst_8 = arith.constant dense<0.000000e+00> : vector<96x2048xf32>
    %17 = tpu.matmul %16, %15, %cst_8 {dimension_numbers = #tpu.dot_dimension_numbers<[1], [0], [0], [1], [0, 0, 1, 1], [], []>} : vector<96x40xf32>, vector<40x2048xf32>, vector<96x2048xf32> -> vector<96x2048xf32>
    %18 = vector.extract_strided_slice %17 {offsets = [0, 0], sizes = [32, 2048], strides = [1, 1]} : vector<96x2048xf32> to vector<32x2048xf32>
    %19 = arith.negf %18 : vector<32x2048xf32>
    %20 = math.exp %19 : vector<32x2048xf32>
    %cst_9 = arith.constant 1.000000e+00 : f32
    %21 = vector.broadcast %cst_9 : f32 to vector<32x2048xf32>
    %22 = arith.addf %21, %20 : vector<32x2048xf32>
    %23 = arith.divf %21, %22 : vector<32x2048xf32>
    %24 = vector.extract_strided_slice %17 {offsets = [32, 0], sizes = [32, 2048], strides = [1, 1]} : vector<96x2048xf32> to vector<32x2048xf32>
    %25 = math.tanh %24 : vector<32x2048xf32>
    %26 = vector.extract_strided_slice %17 {offsets = [64, 0], sizes = [32, 2048], strides = [1, 1]} : vector<96x2048xf32> to vector<32x2048xf32>
    %27 = arith.negf %26 : vector<32x2048xf32>
    %28 = math.exp %27 : vector<32x2048xf32>
    %cst_10 = arith.constant 1.000000e+00 : f32
    %29 = vector.broadcast %cst_10 : f32 to vector<32x2048xf32>
    %30 = arith.addf %29, %28 : vector<32x2048xf32>
    %31 = arith.divf %29, %30 : vector<32x2048xf32>
    %32 = arith.mulf %23, %25 : vector<32x2048xf32>
    %33 = math.tanh %32 : vector<32x2048xf32>
    %34 = arith.mulf %31, %33 : vector<32x2048xf32>
    %c0_11 = arith.constant 0 : index
    %c0_12 = arith.constant 0 : index
    %35 = vector.load %arg5[%c0_11, %c0_12] : memref<32x1xf32, #tpu.memory_space<vmem>>, vector<32x1xf32>
    %36 = vector.broadcast %35 : vector<32x1xf32> to vector<32x2048xf32>
    %37 = arith.mulf %36, %34 : vector<32x2048xf32>
    %cst_13 = arith.constant dense<0.000000e+00> : vector<2048xf32>
    %38 = vector.multi_reduction <add>, %37, %cst_13 [0] : vector<32x2048xf32> to vector<2048xf32>
    %39 = vector.shape_cast %38 : vector<2048xf32> to vector<1x2048xf32>
    %c0_14 = arith.constant 0 : index
    %c0_15 = arith.constant 0 : index
    %40 = memref.load %arg6[%c0_14, %c0_15] : memref<1x1xf32, #tpu.memory_space<smem>>
    %41 = vector.broadcast %40 : f32 to vector<1x2048xf32>
    %42 = arith.addf %39, %41 : vector<1x2048xf32>
    %c0_16 = arith.constant 0 : index
    %c0_17 = arith.constant 0 : index
    %43 = vector.load %arg7[%c0_16, %c0_17] : memref<1x2048xf32, #tpu.memory_space<vmem>>, vector<1x2048xf32>
    tpu.vector_store %arg7[%c0_16, %c0_17], %42 {strides = array<i32>} : memref<1x2048xf32, #tpu.memory_space<vmem>>, vector<1x2048xf32>,
    return
  }
  func.func @transform_0(%arg0: i32) -> (i32, i32) {
    %c0_i32 = arith.constant 0 : i32
    %c0_i32_0 = arith.constant 0 : i32
    return %c0_i32, %arg0 : i32, i32
  }
  func.func @transform_1(%arg0: i32) -> (i32, i32) {
    %c0_i32 = arith.constant 0 : i32
    %c0_i32_0 = arith.constant 0 : i32
    %c0_i32_1 = arith.constant 0 : i32
    return %c0_i32, %c0_i32_0 : i32, i32
  }
  func.func @transform_2(%arg0: i32) -> (i32, i32) {
    %c0_i32 = arith.constant 0 : i32
    %c0_i32_0 = arith.constant 0 : i32
    %c0_i32_1 = arith.constant 0 : i32
    return %c0_i32, %c0_i32_0 : i32, i32
  }
  func.func @transform_3(%arg0: i32) -> (i32, i32) {
    %c0_i32 = arith.constant 0 : i32
    %c0_i32_0 = arith.constant 0 : i32
    %c0_i32_1 = arith.constant 0 : i32
    return %c0_i32, %c0_i32_0 : i32, i32
  }
  func.func @transform_4(%arg0: i32) -> (i32, i32) {
    %c0_i32 = arith.constant 0 : i32
    %c0_i32_0 = arith.constant 0 : i32
    %c0_i32_1 = arith.constant 0 : i32
    return %c0_i32, %c0_i32_0 : i32, i32
  }
  func.func @transform_5(%arg0: i32) -> (i32, i32) {
    %c0_i32 = arith.constant 0 : i32
    %c0_i32_0 = arith.constant 0 : i32
    %c0_i32_1 = arith.constant 0 : i32
    return %c0_i32, %c0_i32_0 : i32, i32
  }
  func.func @transform_6(%arg0: i32) -> (i32, i32) {
    %c0_i32 = arith.constant 0 : i32
    %c0_i32_0 = arith.constant 0 : i32
    return %c0_i32, %arg0 : i32, i32
  }
}

</mosaic_0001>

<bundles_post_ra>
// kernel: tpu_custom_call.1
= control target key start
LH: loop header
LB: loop body
LE: loop exit
PB: predicated region body
PF: predicated region fallthrough
CT: control target
= control target key end

     0   :  { %v4135_v2 = vmov 0   ;;  %s6044_s0 = inlined_call_operand.vmem [shape: f32[1,2048], index: 0, kind: input, shape index: {}]   ;;  %s6045_s1 = inlined_call_operand.vmem [shape: f32[32,1], index: 1, kind: input, shape index: {}]   ;;  %s6046_s2 = inlined_call_operand.vmem [shape: f32[32,1], index: 2, kind: input, shape index: {}]   ;;  %s6047_s3 = inlined_call_operand.vmem [shape: f32[96,40], index: 3, kind: input, shape index: {}]   ;;  %s6048_s4 = inlined_call_operand.vmem [shape: f32[32,1], index: 4, kind: input, shape index: {}]   ;;  %s6049_s5 = inlined_call_operand.<no memory space> [shape: f32[1,1], index: 5, kind: input, shape index: {}]   ;;  %s6050_s6 = inlined_call_operand.hbm [shape: f32[1,2048], index: 6, kind: output, shape index: {}]  }
   0x1   :  { %v197_v0 = vld [vmem:[%s6046_s2] sm:$0xff]  ;;  %3214 = vset.pattern.permute.xlu1 %v4135_v2  ;;  %3213 = vset.pattern.permute.xlu0 %v4135_v2  ;;  %v198_v3 = vld [vmem:[%s6046_s2 + $0x8] sm:$0xff] }
   0x2   :  { %v27_v1 = vld [vmem:[%s6045_s1] sm:$0xff]  ;;  %203 = vperm.xlu1 %3214, %v197_v0   ;;  %v28_v4 = vld [vmem:[%s6045_s1 + $0x8] sm:$0xff] }
   0x3   :  { %33 = vperm.xlu0 %3213, %v27_v1  }
   0x4   :  { %12 = vsyncpa [#allocation4], 0  ;;  %v30_v5 = vld [vmem:[%s6045_s1 + $0x18] sm:$0xff]  ;;  %v29_v6 = vld [vmem:[%s6045_s1 + $0x10] sm:$0xff]  ;;  %v4136_v13 = vmov 0.0   ;;  %v53_v14 = vlaneseq  ;;  %vm365_vm1 = vcmask 326656  }
   0x5   :  { %v200_v7 = vld [vmem:[%s6046_s2 + $0x18] sm:$0xff]  ;;  %v199_v8 = vld [vmem:[%s6046_s2 + $0x10] sm:$0xff]  ;;  %v2523_v9 = vld [vmem:[%s6048_s4 + $0x8] sm:$0xff]  ;;  %466 = vmatprep.mubr.f32.mxu0 %v4136_v13  ;;  %603 = vmatprep.mubr.f32.mxu1 %v4136_v13 }
   0x6   :  { %208 = vperm.xlu1 %3214, %v198_v3   ;;  %v2522_v10 = vld [vmem:[%s6048_s4] sm:$0xff]  ;;  %v2525_v11 = vld [vmem:[%s6048_s4 + $0x18] sm:$0xff]  ;;  %v2524_v12 = vld [vmem:[%s6048_s4 + $0x10] sm:$0xff]  ;;  %v4213_v15 = vshrl.u32 %v53_v14, 7 }
   0x7   :  { %38 = vperm.xlu0 %3213, %v28_v4   ;;  %v26_v17 = vld [vmem:[%s6044_s0 + $0x8] sm:$0xff]  ;;  %v25_v25 = vld [vmem:[%s6044_s0] sm:$0xff] }
   0x8   :  { %v71_v16 = vsub.s32 4, %v4213_v15  ;;  %v79_v18 = vsub.s32 6, %v4213_v15  ;;  %v59_v21 = vsub.s32 1, %v4213_v15  ;;  %v67_v22 = vsub.s32 3, %v4213_v15 }
   0x9   :  { %v55_v23 = vsub.s32 0, %v4213_v15  ;;  %v63_v24 = vsub.s32 2, %v4213_v15  ;;  %v75_v26 = vsub.s32 5, %v4213_v15  ;;  %v83_v31 = vsub.s32 7, %v4213_v15 }
   0xa   :  { %48 = vperm.xlu1 %3214, %v30_v5   ;;  %v4220_v19 = vrot.slane %v26_v17, %v71_v16  ;;  %v4222_v20 = vrot.slane %v26_v17, %v79_v18  ;;  %v60_v27 = vrot.slane %v25_v25, %v59_v21  ;;  %v68_v28 = vrot.slane %v25_v25, %v67_v22 }
   0xb   :  { %43 = vperm.xlu0 %3213, %v29_v6   ;;  %v4232_v29 = vrot.slane %v25_v25, %v55_v23  ;;  %v4234_v30 = vrot.slane %v25_v25, %v63_v24  ;;  %v4241_v34 = vrot.slane %v25_v25, %v75_v26  ;;  %v4249_v39 = vrot.slane %v26_v17, %v55_v23 }
   0xc   :  { %v4251_v40 = vrot.slane %v26_v17, %v63_v24  ;;  %v4253_v41 = vrot.slane %v25_v25, %v83_v31  ;;  %v4255_v42 = vrot.slane %v25_v25, %v71_v16  ;;  %v4260_v46 = vrot.slane %v25_v25, %v79_v18 }
   0xd   :  { %v4269_v51 = vrot.slane %v26_v17, %v59_v21  ;;  %v4271_v52 = vrot.slane %v26_v17, %v67_v22  ;;  %v4296_v3 = vrot.slane %v26_v17, %v75_v26  ;;  %v4298_v4 = vrot.slane %v26_v17, %v83_v31 }
   0xe   :  { %218 = vperm.xlu1 %3214, %v200_v7   ;;  %vm351_vm0 = vcmp.eq.s32.totalorder %v4213_v15, 0 }
   0xf   :  { %213 = vperm.xlu0 %3213, %v199_v8  }
  0x12   :  { %2533 = vperm.xlu1 %3214, %v2523_v9  }
  0x13   :  { %2528 = vperm.xlu0 %3213, %v2522_v10  }
  0x16   :  { %2543 = vperm.xlu1 %3214, %v2525_v11  }
  0x17   :  { %2538 = vperm.xlu0 %3213, %v2524_v12  }
  0x81   :  { %v4237_v32 = vpop.permute.xlu1 %203 }
  0x82   :  { %v4239_v33 = vpop.permute.xlu0 %33 }
  0x83   :  { %v134_v35 = vmul.f32 %v60_v27, %v4239_v33  ;;  %v136_v36 = vmul.f32 %v68_v28, %v4239_v33  ;;  %v133_v37 = vmul.f32 %v4232_v29, %v4239_v33  ;;  %v135_v38 = vmul.f32 %v4234_v30, %v4239_v33 }
  0x84   :  { %v138_v50 = vmul.f32 %v4241_v34, %v4239_v33  ;;  %v140_v57 = vmul.f32 %v4253_v41, %v4239_v33  ;;  %v137_v58 = vmul.f32 %v4255_v42, %v4239_v33  ;;  %v139_v1 = vmul.f32 %v4260_v46, %v4239_v33 }
  0x85   :  { %v222_v43 = vadd.f32 %v4237_v32, %v134_v35  ;;  %v224_v44 = vadd.f32 %v4237_v32, %v136_v36  ;;  %v221_v45 = vadd.f32 %v4237_v32, %v133_v37  ;;  %v4262_v47 = vpop.permute.xlu1 %208  ;;  %v223_v49 = vadd.f32 %v4237_v32, %v135_v38 }
  0x86   :  { %v4264_v48 = vpop.permute.xlu0 %38  ;;  %v4294_v2 = vadd.f32 %v4237_v32, %v138_v50  ;;  %v4303_v6 = vadd.f32 %v4237_v32, %v140_v57  ;;  %v4306_v7 = vadd.f32 %v4237_v32, %v137_v58  ;;  %v4319_v17 = vadd.f32 %v4237_v32, %v139_v1 }
  0x87   :  { %v150_v53 = vmul.f32 %v60_v27, %v4264_v48  ;;  %3215 = vtanh.f32 %v222_v43  ;;  %v152_v54 = vmul.f32 %v68_v28, %v4264_v48  ;;  %v149_v55 = vmul.f32 %v4232_v29, %v4264_v48 }
  0x88   :  { %3217 = vtanh.f32 %v224_v44  ;;  %v151_v56 = vmul.f32 %v4234_v30, %v4264_v48  ;;  %v154_v5 = vmul.f32 %v4241_v34, %v4264_v48  ;;  %v156_v16 = vmul.f32 %v4253_v41, %v4264_v48 }
  0x89   :  { %v238_v59 = vadd.f32 %v4262_v47, %v150_v53  ;;  %v240_v60 = vadd.f32 %v4262_v47, %v152_v54  ;;  %v237_v61 = vadd.f32 %v4262_v47, %v149_v55  ;;  %3219 = vtanh.f32 %v221_v45  ;;  %v4286_v62 = vpop.permute.xlu1 %48 }
  0x8a   :  { %v4288_v63 = vpop.permute.xlu0 %43  ;;  %v239_v0 = vadd.f32 %v4262_v47, %v151_v56  ;;  %3221 = vtanh.f32 %v223_v49  ;;  %v182_v9 = vmul.f32 %v60_v27, %v4286_v62  ;;  %v184_v14 = vmul.f32 %v68_v28, %v4286_v62 }
  0x8b   :  { %3223 = vtanh.f32 %v238_v59  ;;  %v166_v8 = vmul.f32 %v60_v27, %v4288_v63  ;;  %v168_v10 = vmul.f32 %v68_v28, %v4288_v63  ;;  %v165_v23 = vmul.f32 %v4232_v29, %v4288_v63 }
  0x8c   :  { %3225 = vtanh.f32 %v240_v60  ;;  %v181_v25 = vmul.f32 %v4232_v29, %v4286_v62  ;;  %v153_v26 = vmul.f32 %v4255_v42, %v4264_v48  ;;  %v155_v27 = vmul.f32 %v4260_v46, %v4264_v48 }
  0x8d   :  { %3227 = vtanh.f32 %v237_v61  ;;  %v4311_v11 = vpop.permute.xlu1 %218  ;;  %v167_v35 = vmul.f32 %v4234_v30, %v4288_v63  ;;  %v242_v36 = vadd.f32 %v4262_v47, %v154_v5  ;;  %v183_v29 = vmul.f32 %v4234_v30, %v4286_v62 }
  0x8e   :  { %v4313_v12 = vpop.permute.xlu0 %213  ;;  %3229 = vtanh.f32 %v239_v0  ;;  %v270_v21 = vadd.f32 %v4311_v11, %v182_v9  ;;  %v272_v24 = vadd.f32 %v4311_v11, %v184_v14  ;;  %v269_v38 = vadd.f32 %v4311_v11, %v181_v25 }
  0x8f   :  { %v254_v18 = vadd.f32 %v4313_v12, %v166_v8  ;;  %v256_v22 = vadd.f32 %v4313_v12, %v168_v10  ;;  %v253_v31 = vadd.f32 %v4313_v12, %v165_v23  ;;  %v244_v43 = vadd.f32 %v4262_v47, %v156_v16 }
  0x90   :  { %v255_v45 = vadd.f32 %v4313_v12, %v167_v35  ;;  %v170_v49 = vmul.f32 %v4241_v34, %v4288_v63  ;;  %v186_v50 = vmul.f32 %v4241_v34, %v4286_v62  ;;  %v271_v54 = vadd.f32 %v4311_v11, %v183_v29 }
  0x91   :  { %v3216_v28 = vpop.eup %3215  ;;  %3231 = vtanh.f32 %v254_v18  ;;  %v241_v55 = vadd.f32 %v4262_v47, %v153_v26  ;;  %v243_v30 = vadd.f32 %v4262_v47, %v155_v27  ;;  %v172_v59 = vmul.f32 %v4253_v41, %v4288_v63 }
  0x92   :  { %v3218_v37 = vpop.eup %3217  ;;  %3233 = vtanh.f32 %v270_v21  ;;  %v4350_v57 = vadd.f32 %v4313_v12, %v170_v49  ;;  %v4353_v58 = vadd.f32 %v4311_v11, %v186_v50  ;;  %v188_v61 = vmul.f32 %v4253_v41, %v4286_v62 }
  0x93   :  { %v3220_v44 = vpop.eup %3219  ;;  %3235 = vtanh.f32 %v256_v22  ;;  %v169_v0 = vmul.f32 %v4255_v42, %v4288_v63  ;;  %v185_v8 = vmul.f32 %v4255_v42, %v4286_v62  ;;  %v171_v9 = vmul.f32 %v4260_v46, %v4288_v63 }
  0x94   :  { %v3222_v53 = vpop.eup %3221  ;;  %3237 = vtanh.f32 %v272_v24  ;;  %v260_v16 = vadd.f32 %v4313_v12, %v172_v59  ;;  %v4367_v41 = vadd.f32 %v4311_v11, %v188_v61  ;;  %v187_v21 = vmul.f32 %v4260_v46, %v4286_v62 }
  0x95   :  { %v3224_v56 = vpop.eup %3223  ;;  %3239 = vtanh.f32 %v253_v31  ;;  %v4372_v42 = vadd.f32 %v4313_v12, %v169_v0  ;;  %v142_v22 = vmul.f32 %v4269_v51, %v4239_v33  ;;  %v141_v23 = vmul.f32 %v4249_v39, %v4239_v33 }
  0x96   :  { %v3226_v34 = vpop.eup %3225  ;;  %v3144_v60 = vpack.c.bf16 %v3224_v56, %v3216_v28  ;;  %3241 = vtanh.f32 %v269_v38  ;;  %v157_v24 = vmul.f32 %v4249_v39, %v4264_v48  ;;  %v143_v46 = vmul.f32 %v4251_v40, %v4239_v33 }
  0x97   :  { %v3228_v1 = vpop.eup %3227  ;;  %v3152_v5 = vpack.c.bf16 %v3226_v34, %v3218_v37  ;;  %3243 = vtanh.f32 %v255_v45  ;;  %v159_v26 = vmul.f32 %v4251_v40, %v4264_v48  ;;  %v144_v28 = vmul.f32 %v4271_v52, %v4239_v33 }
  0x98   :  { %v3230_v10 = vpop.eup %3229  ;;  %3145 = vmatprep.subr.bf16.mxu0 %v3144_v60  ;;  %v3146_v14 = vpack.c.bf16 %v3228_v1, %v3220_v44  ;;  %3245 = vtanh.f32 %v271_v54  ;;  %v4392_v31 = vadd.f32 %v4237_v32, %v141_v23  ;;  %v4395_v35 = vadd.f32 %v4262_v47, %v157_v24 }
  0x99   :  { %3153 = vmatprep.subr.bf16.mxu1 %v3152_v5  ;;  %v3154_v18 = vpack.c.bf16 %v3230_v10, %v3222_v53  ;;  %3247 = vtanh.f32 %v4294_v2  ;;  %v158_v2 = vmul.f32 %v4269_v51, %v4264_v48  ;;  %v4399_v37 = vadd.f32 %v4237_v32, %v143_v46 }
  0x9a   :  { %3147 = vmatpush1.bf16.msra.mxu0 %v3146_v14  ;;  %3249 = vtanh.f32 %v242_v36  ;;  %v4402_v38 = vadd.f32 %v4262_v47, %v159_v26  ;;  %v259_v44 = vadd.f32 %v4313_v12, %v171_v9  ;;  %v160_v45 = vmul.f32 %v4271_v52, %v4264_v48 }
  0x9b   :  { %v3232_v25 = vpop.eup %3231  ;;  %3155 = vmatpush1.bf16.msra.mxu1 %v3154_v18  ;;  %3251 = vtanh.f32 %v4303_v6  ;;  %v4412_v53 = vmul.f32 %v4249_v39, %v4288_v63  ;;  %v4417_v56 = vmul.f32 %v4249_v39, %v4286_v62  ;;  %v175_v59 = vmul.f32 %v4251_v40, %v4288_v63 }
  0x9c   :  { %v3234_v27 = vpop.eup %3233  ;;  %3253 = vtanh.f32 %v244_v43  ;;  %v273_v43 = vadd.f32 %v4311_v11, %v185_v8  ;;  %v246_v60 = vadd.f32 %v4262_v47, %v158_v2  ;;  %v4424_v61 = vadd.f32 %v4237_v32, %v144_v28 }
  0x9d   :  { %v3236_v6 = vpop.eup %3235  ;;  %v3148_v36 = vpack.c.bf16 %v3234_v27, %v3232_v25  ;;  %3255 = vtanh.f32 %v4306_v7  ;;  %v275_v7 = vadd.f32 %v4311_v11, %v187_v21  ;;  %v4428_v0 = vadd.f32 %v4262_v47, %v160_v45  ;;  %v4453_v21 = vld [vmem:[%s6047_s3] sm:$0xff]  ;;  %v4496_v45 = vld [vmem:[%s6047_s3 + $0x8] sm:$0xff] }
  0x9e   :  { %v3238_v29 = vpop.eup %3237  ;;  %3257 = vtanh.f32 %v241_v55  ;;  %v230_v55 = vadd.f32 %v4237_v32, %v142_v22  ;;  %v191_v39 = vmul.f32 %v4251_v40, %v4286_v62  ;;  %v4433_v1 = vadd.f32 %v4313_v12, %v175_v59 }
  0x9f   :  { %v3240_v49 = vpop.eup %3239  ;;  %3149 = vmatprep.subr.bf16.mxu0 %v3148_v36  ;;  %v3156_v50 = vpack.c.bf16 %v3238_v29, %v3236_v6  ;;  %3259 = vtanh.f32 %v4319_v17  ;;  %v146_v8 = vmul.f32 %v4296_v3, %v4239_v33  ;;  %v162_v9 = vmul.f32 %v4296_v3, %v4264_v48 }
  0xa0   :  { %v3242_v54 = vpop.eup %3241  ;;  %3261 = vtanh.f32 %v243_v30  ;;  %v4137_v10 = vmov 1.0   ;;  %v4444_v40 = vadd.f32 %v4311_v11, %v191_v39  ;;  %v148_v14 = vmul.f32 %v4298_v4, %v4239_v33 }
  0xa1   :  { %v3244_v34 = vpop.eup %3243  ;;  %3157 = vmatprep.subr.bf16.mxu1 %v3156_v50  ;;  %v3150_v17 = vpack.c.bf16 %v3242_v54, %v3240_v49  ;;  %3263 = vtanh.f32 %v4350_v57  ;;  %v4460_v23 = vadd.f32 %v4262_v47, %v162_v9  ;;  %v161_v27 = vmul.f32 %v4220_v19, %v4264_v48 }
  0xa2   :  { %v3246_v30 = vpop.eup %3245  ;;  %3265 = vtanh.f32 %v4353_v58  ;;  %v4466_v25 = vadd.f32 %v4237_v32, %v148_v14  ;;  %v147_v28 = vmul.f32 %v4222_v20, %v4239_v33  ;;  %v163_v29 = vmul.f32 %v4222_v20, %v4264_v48 }
  0xa3   :  { %v3248_v5 = vpop.eup %3247  ;;  %3151 = vmatpush1.bf16.msra.mxu0 %v3150_v17  ;;  %v3158_v57 = vpack.c.bf16 %v3246_v30, %v3244_v34  ;;  %3267 = vtanh.f32 %v260_v16  ;;  %v164_v16 = vmul.f32 %v4298_v4, %v4264_v48  ;;  %v4499_v49 = vadd.f32 %v4262_v47, %v161_v27 }
  0xa4   :  { %v3250_v58 = vpop.eup %3249  ;;  %2904 = vmatprep.subr.msk.mxu0 %vm351_vm0, %v4137_v10  ;;  %3269 = vtanh.f32 %v4367_v41  ;;  %v4457_v41 = vadd.f32 %v4237_v32, %v146_v8  ;;  %v4502_v48 = vadd.f32 %v4237_v32, %v147_v28  ;;  %v194_v54 = vmul.f32 %v4296_v3, %v4286_v62 }
  0xa5   :  { %v3252_v18 = vpop.eup %3251  ;;  %3159 = vmatpush1.bf16.msra.mxu1 %v3158_v57  ;;  %v3160_v22 = vpack.c.bf16 %v3250_v58, %v3248_v5  ;;  %3271 = vtanh.f32 %v4372_v42  ;;  %v4469_v2 = vadd.f32 %v4262_v47, %v164_v16  ;;  %v145_v42 = vmul.f32 %v4220_v19, %v4239_v33 }
  0xa6   :  { %v3254_v24 = vpop.eup %3253  ;;  %2918 = vmatprep.subr.msk.mxu1 %vm351_vm0, %v4137_v10  ;;  %3273 = vtanh.f32 %v273_v43  ;;  %v178_v43 = vmul.f32 %v4296_v3, %v4288_v63  ;;  %v4524_v3 = vadd.f32 %v4311_v11, %v194_v54  ;;  %v195_v14 = vmul.f32 %v4222_v20, %v4286_v62 }
  0xa7   :  { %v3256_v46 = vpop.eup %3255  ;;  %2905 = vmatpush1.msk.msra.mxu0 %vm351_vm0, %v4137_v10  ;;  %v3168_v26 = vpack.c.bf16 %v3254_v24, %v3252_v18  ;;  %3275 = vtanh.f32 %v259_v44  ;;  %v4483_v36 = vadd.f32 %v4237_v32, %v145_v42  ;;  %v180_v32 = vmul.f32 %v4298_v4, %v4288_v63 }
  0xa8   :  { %v3258_v6 = vpop.eup %3257  ;;  %2906 = vmatmul.mubr.msk.f32.vlgmr.msra.gmra.mrb[0].mxu0 %vm365_vm1, %v4453_v21  ;;  %3161 = vmatprep.subr.bf16.mxu0 %v3160_v22  ;;  %3277 = vtanh.f32 %v275_v7  ;;  %v4507_v7 = vadd.f32 %v4262_v47, %v163_v29  ;;  %v196_v47 = vmul.f32 %v4298_v4, %v4286_v62  ;;  %v4534_v4 = vld [vmem:[%s6047_s3 + $0x10] sm:$0xff]  ;;  %v4573_v24 = vadd.f32 %v4311_v11, %v195_v14 }
  0xa9   :  { %v3260_v44 = vpop.eup %3259  ;;  %2919 = vmatpush1.msk.msra.mxu1 %vm351_vm0, %v4137_v10  ;;  %v3162_v33 = vpack.c.bf16 %v3258_v6, %v3256_v46  ;;  %472 = vmatprep.mubr.f32.mxu0 %v4136_v13  ;;  %3279 = vtanh.f32 %v230_v55  ;;  %v4512_v55 = vadd.f32 %v4313_v12, %v178_v43  ;;  %v277_v42 = vadd.f32 %v4311_v11, %v4417_v56  ;;  %v4589_v56 = vld [vmem:[%s6047_s3 + $0x20] sm:$0xff]  ;;  %v4748_v14 = vld [vmem:[%s6047_s3 + $0x50] sm:$0xff] }
  0xaa   :  { %v3262_v50 = vpop.eup %3261  ;;  %2920 = vmatmul.mubr.msk.f32.vlgmr.msra.gmra.mrb[0].mxu1 %vm365_vm1, %v4453_v21  ;;  %3169 = vmatprep.subr.bf16.mxu1 %v3168_v26  ;;  %3281 = vtanh.f32 %v246_v60  ;;  %v177_v60 = vmul.f32 %v4220_v19, %v4288_v63  ;;  %v4541_v5 = vadd.f32 %v4311_v11, %v196_v47  ;;  %v4688_v47 = vld [vmem:[%s6047_s3 + $0x40] sm:$0xff] }
  0xab   :  { %v3264_v59 = vpop.eup %3263  ;;  %3163 = vmatpush1.bf16.msra.mxu0 %v3162_v33  ;;  %v3170_v34 = vpack.c.bf16 %v3262_v50, %v3260_v44  ;;  %609 = vmatprep.mubr.f32.mxu1 %v4136_v13  ;;  %3283 = vtanh.f32 %v4424_v61  ;;  %v193_v61 = vmul.f32 %v4220_v19, %v4286_v62 }
  0xac   :  { %v3266_v17 = vpop.eup %3265  ;;  %2907 = vmatmul.mubr.msk.f32.gmra.mrb[2].mxu0 %vm365_vm1, %v4496_v45  ;;  %3285 = vtanh.f32 %v4428_v0  ;;  %v4538_v0 = vadd.f32 %v4313_v12, %v180_v32  ;;  %v4547_v19 = vadd.f32 %v4313_v12, %v177_v60 }
  0xad   :  { %v3268_v30 = vpop.eup %3267  ;;  %3171 = vmatpush1.bf16.msra.mxu1 %v3170_v34  ;;  %v3164_v39 = vpack.c.bf16 %v3266_v17, %v3264_v59  ;;  %478 = vmatprep.mubr.f32.mxu0 %v4136_v13  ;;  %3287 = vtanh.f32 %v4392_v31  ;;  %v4550_v8 = vadd.f32 %v4311_v11, %v193_v61  ;;  %v179_v31 = vmul.f32 %v4222_v20, %v4288_v63 }
  0xae   :  { %v3270_v57 = vpop.eup %3269  ;;  %2921 = vmatmul.mubr.msk.f32.gmra.mrb[2].mxu1 %vm365_vm1, %v4496_v45  ;;  %3289 = vtanh.f32 %v4395_v35  ;;  %v261_v20 = vadd.f32 %v4313_v12, %v4412_v53  ;;  %v190_v17 = vmul.f32 %v4269_v51, %v4286_v62 }
  0xaf   :  { %v3272_v9 = vpop.eup %3271  ;;  %3165 = vmatprep.subr.bf16.mxu0 %v3164_v39  ;;  %v3172_v58 = vpack.c.bf16 %v3270_v57, %v3268_v30  ;;  %615 = vmatprep.mubr.f32.mxu1 %v4136_v13  ;;  %3291 = vtanh.f32 %v4399_v37  ;;  %v4562_v16 = vadd.f32 %v4313_v12, %v179_v31  ;;  %v4568_v37 = vld [vmem:[%s6047_s3 + $0x18] sm:$0xff]  ;;  %v176_v30 = vmul.f32 %v4271_v52, %v4288_v63 }
  0xb0   :  { %v3274_v35 = vpop.eup %3273  ;;  %2908 = vmatmul.mubr.msk.f32.gmra.mrb[4].mxu0 %vm365_vm1, %v4534_v4  ;;  %3293 = vtanh.f32 %v4402_v38 }
  0xb1   :  { %v3276_v18 = vpop.eup %3275  ;;  %3173 = vmatprep.subr.bf16.mxu1 %v3172_v58  ;;  %v3166_v22 = vpack.c.bf16 %v3274_v35, %v3272_v9  ;;  %484 = vmatprep.mubr.f32.mxu0 %v4136_v13  ;;  %3295 = vtanh.f32 %v261_v20 }
  0xb2   :  { %v3278_v38 = vpop.eup %3277  ;;  %2922 = vmatmul.mubr.msk.f32.gmra.mrb[4].mxu1 %vm365_vm1, %v4534_v4  ;;  %3297 = vtanh.f32 %v277_v42 }
  0xb3   :  { %v3280_v46 = vpop.eup %3279  ;;  %3167 = vmatpush1.bf16.msra.mxu0 %v3166_v22  ;;  %v3174_v26 = vpack.c.bf16 %v3278_v38, %v3276_v18  ;;  %621 = vmatprep.mubr.f32.mxu1 %v4136_v13  ;;  %3299 = vtanh.f32 %v4433_v1  ;;  %v4617_v1 = vld [vmem:[%s6047_s3 + $0x28] sm:$0xff]  ;;  %v4771_v38 = vld [vmem:[%s6047_s3 + $0x58] sm:$0xff] }
  0xb4   :  { %v3282_v27 = vpop.eup %3281  ;;  %2932 = vmatprep.subr.msk.mxu0 %vm351_vm0, %v4137_v10  ;;  %2909 = vmatmul.mubr.msk.f32.gmra.mrb[6].mxu0 %vm365_vm1, %v4568_v37  ;;  %3301 = vtanh.f32 %v4444_v40 }
  0xb5   :  { %v3284_v53 = vpop.eup %3283  ;;  %3175 = vmatpush1.bf16.msra.mxu1 %v3174_v26  ;;  %490 = vmatprep.mubr.f32.mxu0 %v4136_v13  ;;  %v3176_v6 = vpack.c.bf16 %v3282_v27, %v3280_v46  ;;  %3303 = vtanh.f32 %v4457_v41  ;;  %v4638_v41 = vld [vmem:[%s6047_s3 + $0x30] sm:$0xff] }
  0xb6   :  { %v3286_v28 = vpop.eup %3285  ;;  %2946 = vmatprep.subr.msk.mxu1 %vm351_vm0, %v4137_v10  ;;  %2923 = vmatmul.mubr.msk.f32.gmra.mrb[6].mxu1 %vm365_vm1, %v4568_v37  ;;  %3305 = vtanh.f32 %v4460_v23 }
  0xb7   :  { %v4596_v29 = vpop.eup %3287  ;;  %2933 = vmatpush1.msk.msra.mxu0 %vm351_vm0, %v4137_v10  ;;  %627 = vmatprep.mubr.f32.mxu1 %v4136_v13  ;;  %v3184_v44 = vpack.c.bf16 %v3286_v28, %v3284_v53  ;;  %3307 = vtanh.f32 %v4466_v25 }
  0xb8   :  { %v4603_v43 = vpop.eup %3289  ;;  %3177 = vmatprep.subr.bf16.mxu0 %v3176_v6  ;;  %2910 = vmatmul.mubr.msk.f32.gmra.mrb[8].mxu0 %vm365_vm1, %v4589_v56  ;;  %3309 = vtanh.f32 %v4469_v2 }
  0xb9   :  { %v4608_v33 = vpop.eup %3291  ;;  %2947 = vmatpush1.msk.msra.mxu1 %vm351_vm0, %v4137_v10  ;;  %496 = vmatprep.mubr.f32.mxu0 %v4136_v13  ;;  %v3178_v50 = vpack.c.bf16 %v4603_v43, %v4596_v29  ;;  %3311 = vtanh.f32 %v4483_v36  ;;  %v4659_v36 = vld [vmem:[%s6047_s3 + $0x38] sm:$0xff] }
  0xba   :  { %v4622_v54 = vpop.eup %3293  ;;  %3185 = vmatprep.subr.bf16.mxu1 %v3184_v44  ;;  %2924 = vmatmul.mubr.msk.f32.gmra.mrb[8].mxu1 %vm365_vm1, %v4589_v56  ;;  %3313 = vtanh.f32 %v4499_v49 }
  0xbb   :  { %633 = vmatprep.mubr.f32.mxu1 %v4136_v13  ;;  %v3186_v40 = vpack.c.bf16 %v4622_v54, %v4608_v33  ;;  %v4644_v23 = vpop.eup %3295  ;;  %3315 = vtanh.f32 %v4502_v48 }
  0xbc   :  { %2911 = vmatmul.mubr.msk.f32.gmra.mrb[10].mxu0 %vm365_vm1, %v4617_v1  ;;  %v4648_v25 = vpop.eup %3297  ;;  %3317 = vtanh.f32 %v4507_v7 }
  0xbd   :  { %502 = vmatprep.mubr.f32.mxu0 %v4136_v13  ;;  %v4653_v2 = vpop.eup %3299  ;;  %v3182_v49 = vpack.c.bf16 %v4648_v25, %v4644_v23  ;;  %3319 = vtanh.f32 %v4512_v55  ;;  %v174_v55 = vmul.f32 %v4269_v51, %v4288_v63  ;;  %v278_v51 = vadd.f32 %v4311_v11, %v190_v17 }
  0xbe   :  { %2925 = vmatmul.mubr.msk.f32.gmra.mrb[10].mxu1 %vm365_vm1, %v4617_v1  ;;  %v4664_v48 = vpop.eup %3301  ;;  %3321 = vtanh.f32 %v4524_v3  ;;  %v264_v63 = vadd.f32 %v4313_v12, %v176_v30 }
  0xbf   :  { %639 = vmatprep.mubr.f32.mxu1 %v4136_v13  ;;  %v4669_v7 = vpop.eup %3303  ;;  %v3190_v59 = vpack.c.bf16 %v4664_v48, %v4653_v2  ;;  %3323 = vtanh.f32 %v4538_v0  ;;  %v262_v61 = vadd.f32 %v4313_v12, %v174_v55  ;;  %v192_v0 = vmul.f32 %v4271_v52, %v4286_v62  ;;  %v4724_v52 = vld [vmem:[%s6047_s3 + $0x48] sm:$0xff] }
  0xc0   :  { %2912 = vmatmul.mubr.msk.f32.gmra.mrb[12].mxu0 %vm365_vm1, %v4638_v41  ;;  %v4675_v34 = vpop.eup %3305  ;;  %3325 = vtanh.f32 %v4541_v5 }
  0xc1   :  { %508 = vmatprep.mubr.f32.mxu0 %v4136_v13  ;;  %v4682_v32 = vpop.eup %3307  ;;  %v3192_v3 = vpack.c.bf16 %v4675_v34, %v4669_v7  ;;  %3327 = vtanh.f32 %v4547_v19  ;;  %v280_v62 = vadd.f32 %v4311_v11, %v192_v0 }
  0xc2   :  { %2926 = vmatmul.mubr.msk.f32.gmra.mrb[12].mxu1 %vm365_vm1, %v4638_v41  ;;  %v4695_v60 = vpop.eup %3309  ;;  %3329 = vtanh.f32 %v4550_v8 }
  0xc3   :  { %645 = vmatprep.mubr.f32.mxu1 %v4136_v13  ;;  %v4703_v39 = vpop.eup %3311  ;;  %v3200_v5 = vpack.c.bf16 %v4695_v60, %v4682_v32  ;;  %3331 = vtanh.f32 %v4562_v16 }
  0xc4   :  { %2913 = vmatmul.mubr.msk.f32.gmra.mrb[14].mxu0 %vm365_vm1, %v4659_v36  ;;  %v4712_v57 = vpop.eup %3313  ;;  %3333 = vtanh.f32 %v4573_v24 }
  0xc5   :  { %514 = vmatprep.mubr.f32.mxu0 %v4136_v13  ;;  %v4718_v19 = vpop.eup %3315  ;;  %v3194_v8 = vpack.c.bf16 %v4712_v57, %v4703_v39  ;;  %3335 = vtanh.f32 %v262_v61 }
  0xc6   :  { %2927 = vmatmul.mubr.msk.f32.gmra.mrb[14].mxu1 %vm365_vm1, %v4659_v36  ;;  %v4729_v31 = vpop.eup %3317  ;;  %3337 = vtanh.f32 %v278_v51 }
  0xc7   :  { %651 = vmatprep.mubr.f32.mxu1 %v4136_v13  ;;  %v4733_v12 = vpop.eup %3319  ;;  %v3202_v9 = vpack.c.bf16 %v4729_v31, %v4718_v19  ;;  %3339 = vtanh.f32 %v264_v63 }
  0xc8   :  { %2914 = vmatmul.mubr.msk.f32.gmra.mrb[16].mxu0 %vm365_vm1, %v4688_v47  ;;  %v4738_v58 = vpop.eup %3321  ;;  %3341 = vtanh.f32 %v280_v62 }
  0xc9   :  { %520 = vmatprep.mubr.f32.mxu0 %v4136_v13  ;;  %v4742_v11 = vpop.eup %3323  ;;  %v3196_v35 = vpack.c.bf16 %v4738_v58, %v4733_v12 }
  0xca   :  { %2928 = vmatmul.mubr.msk.f32.gmra.mrb[16].mxu1 %vm365_vm1, %v4688_v47  ;;  %v4752_v16 = vpop.eup %3325 }
  0xcb   :  { %657 = vmatprep.mubr.f32.mxu1 %v4136_v13  ;;  %v4756_v18 = vpop.eup %3327  ;;  %v3204_v22 = vpack.c.bf16 %v4752_v16, %v4742_v11 }
  0xcc   :  { %2915 = vmatmul.mubr.msk.f32.gmra.mrb[18].mxu0 %vm365_vm1, %v4724_v52  ;;  %v4761_v20 = vpop.eup %3329 }
  0xcd   :  { %526 = vmatprep.mubr.f32.mxu0 %v4136_v13  ;;  %v4765_v24 = vpop.eup %3331  ;;  %v3198_v42 = vpack.c.bf16 %v4761_v20, %v4756_v18 }
  0xce   :  { %2929 = vmatmul.mubr.msk.f32.gmra.mrb[18].mxu1 %vm365_vm1, %v4724_v52  ;;  %v4775_v46 = vpop.eup %3333 }
  0xcf   :  { %663 = vmatprep.mubr.f32.mxu1 %v4136_v13  ;;  %v3206_v26 = vpack.c.bf16 %v4775_v46, %v4765_v24  ;;  %v3336_v27 = vpop.eup %3335 }
  0xd0   :  { %2916 = vmatmul.mubr.msk.f32.gmra.mrb[20].mxu0 %vm365_vm1, %v4748_v14  ;;  %v3338_v53 = vpop.eup %3337 }
  0xd1   :  { %532 = vmatprep.mubr.f32.mxu0 %v4136_v13  ;;  %v3340_v28 = vpop.eup %3339  ;;  %v3180_v44 = vpack.c.bf16 %v3338_v53, %v3336_v27 }
  0xd2   :  { %2930 = vmatmul.mubr.msk.f32.gmra.mrb[20].mxu1 %vm365_vm1, %v4748_v14  ;;  %v3342_v6 = vpop.eup %3341 }
  0xd3   :  { %669 = vmatprep.mubr.f32.mxu1 %v4136_v13  ;;  %v3188_v55 = vpack.c.bf16 %v3342_v6, %v3340_v28 }
  0xd4   :  { %2917 = vmatmul.mubr.msk.f32.gmra.mrb[22].mxu0 %vm365_vm1, %v4771_v38 }
  0xd5   :  { %740 = vmatprep.mubr.f32.mxu0 %v4136_v13 }
  0xd6   :  { %2931 = vmatmul.mubr.msk.f32.gmra.mrb[22].mxu1 %vm365_vm1, %v4771_v38 }
  0xd7   :  { %877 = vmatprep.mubr.f32.mxu1 %v4136_v13 }
  0xd8   :  { %2934 = vmatmul.mubr.msk.f32.vlgmr.msra.gmra.mrb[24].mxu0 %vm365_vm1, %v4453_v21 }
  0xd9   :  { %3179 = vmatpush1.bf16.msra.mxu0 %v3178_v50  ;;  %746 = vmatprep.mubr.f32.mxu0 %v4136_v13 }
  0xda   :  { %2948 = vmatmul.mubr.msk.f32.vlgmr.msra.gmra.mrb[24].mxu1 %vm365_vm1, %v4453_v21  ;;  %3181 = vmatprep.subr.bf16.mxu0 %v3180_v44 }
  0xdb   :  { %3187 = vmatpush1.bf16.msra.mxu1 %v3186_v40  ;;  %883 = vmatprep.mubr.f32.mxu1 %v4136_v13 }
  0xdc   :  { %3189 = vmatprep.subr.bf16.mxu1 %v3188_v55  ;;  %2935 = vmatmul.mubr.msk.f32.gmra.mrb[26].mxu0 %vm365_vm1, %v4496_v45 }
  0xdd   :  { %3183 = vmatpush1.bf16.msra.mxu0 %v3182_v49  ;;  %752 = vmatprep.mubr.f32.mxu0 %v4136_v13 }
  0xde   :  { %2949 = vmatmul.mubr.msk.f32.gmra.mrb[26].mxu1 %vm365_vm1, %v4496_v45  ;;  %2960 = vmatprep.subr.msk.mxu0 %vm351_vm0, %v4137_v10 }
  0xdf   :  { %3191 = vmatpush1.bf16.msra.mxu1 %v3190_v59  ;;  %889 = vmatprep.mubr.f32.mxu1 %v4136_v13 }
  0xe0   :  { %2974 = vmatprep.subr.msk.mxu1 %vm351_vm0, %v4137_v10  ;;  %2936 = vmatmul.mubr.msk.f32.gmra.mrb[28].mxu0 %vm365_vm1, %v4534_v4 }
  0xe1   :  { %2961 = vmatpush1.msk.msra.mxu0 %vm351_vm0, %v4137_v10  ;;  %758 = vmatprep.mubr.f32.mxu0 %v4136_v13 }
  0xe2   :  { %2950 = vmatmul.mubr.msk.f32.gmra.mrb[28].mxu1 %vm365_vm1, %v4534_v4  ;;  %3193 = vmatprep.subr.bf16.mxu0 %v3192_v3 }
  0xe3   :  { %2975 = vmatpush1.msk.msra.mxu1 %vm351_vm0, %v4137_v10  ;;  %895 = vmatprep.mubr.f32.mxu1 %v4136_v13 }
  0xe4   :  { %3201 = vmatprep.subr.bf16.mxu1 %v3200_v5  ;;  %2937 = vmatmul.mubr.msk.f32.gmra.mrb[30].mxu0 %vm365_vm1, %v4568_v37 }
  0xe5   :  { %764 = vmatprep.mubr.f32.mxu0 %v4136_v13 }
  0xe6   :  { %2951 = vmatmul.mubr.msk.f32.gmra.mrb[30].mxu1 %vm365_vm1, %v4568_v37 }
  0xe7   :  { %901 = vmatprep.mubr.f32.mxu1 %v4136_v13 }
  0xe8   :  { %2938 = vmatmul.mubr.msk.f32.gmra.mrb[32].mxu0 %vm365_vm1, %v4589_v56 }
  0xe9   :  { %770 = vmatprep.mubr.f32.mxu0 %v4136_v13 }
  0xea   :  { %2952 = vmatmul.mubr.msk.f32.gmra.mrb[32].mxu1 %vm365_vm1, %v4589_v56 }
  0xeb   :  { %907 = vmatprep.mubr.f32.mxu1 %v4136_v13 }
  0xec   :  { %2939 = vmatmul.mubr.msk.f32.gmra.mrb[34].mxu0 %vm365_vm1, %v4617_v1 }
  0xed   :  { %776 = vmatprep.mubr.f32.mxu0 %v4136_v13 }
  0xee   :  { %2953 = vmatmul.mubr.msk.f32.gmra.mrb[34].mxu1 %vm365_vm1, %v4617_v1 }
  0xef   :  { %913 = vmatprep.mubr.f32.mxu1 %v4136_v13 }
  0xf0   :  { %2940 = vmatmul.mubr.msk.f32.gmra.mrb[36].mxu0 %vm365_vm1, %v4638_v41 }
  0xf1   :  { %782 = vmatprep.mubr.f32.mxu0 %v4136_v13 }
  0xf2   :  { %2954 = vmatmul.mubr.msk.f32.gmra.mrb[36].mxu1 %vm365_vm1, %v4638_v41 }
  0xf3   :  { %919 = vmatprep.mubr.f32.mxu1 %v4136_v13 }
  0xf4   :  { %2941 = vmatmul.mubr.msk.f32.gmra.mrb[38].mxu0 %vm365_vm1, %v4659_v36 }
  0xf5   :  { %788 = vmatprep.mubr.f32.mxu0 %v4136_v13 }
  0xf6   :  { %2955 = vmatmul.mubr.msk.f32.gmra.mrb[38].mxu1 %vm365_vm1, %v4659_v36 }
  0xf7   :  { %925 = vmatprep.mubr.f32.mxu1 %v4136_v13 }
  0xf8   :  { %2942 = vmatmul.mubr.msk.f32.gmra.mrb[40].mxu0 %vm365_vm1, %v4688_v47 }
  0xf9   :  { %794 = vmatprep.mubr.f32.mxu0 %v4136_v13 }
  0xfa   :  { %2956 = vmatmul.mubr.msk.f32.gmra.mrb[40].mxu1 %vm365_vm1, %v4688_v47 }
  0xfb   :  { %931 = vmatprep.mubr.f32.mxu1 %v4136_v13 }
  0xfc   :  { %2943 = vmatmul.mubr.msk.f32.gmra.mrb[42].mxu0 %vm365_vm1, %v4724_v52 }
  0xfd   :  { %800 = vmatprep.mubr.f32.mxu0 %v4136_v13 }
  0xfe   :  { %2957 = vmatmul.mubr.msk.f32.gmra.mrb[42].mxu1 %vm365_vm1, %v4724_v52 }
  0xff   :  { %937 = vmatprep.mubr.f32.mxu1 %v4136_v13 }
 0x100   :  { %2944 = vmatmul.mubr.msk.f32.gmra.mrb[44].mxu0 %vm365_vm1, %v4748_v14 }
 0x101   :  { %806 = vmatprep.mubr.f32.mxu0 %v4136_v13 }
 0x102   :  { %2958 = vmatmul.mubr.msk.f32.gmra.mrb[44].mxu1 %vm365_vm1, %v4748_v14 }
 0x103   :  { %943 = vmatprep.mubr.f32.mxu1 %v4136_v13 }
 0x104   :  { %2945 = vmatmul.mubr.msk.f32.gmra.mrb[46].mxu0 %vm365_vm1, %v4771_v38 }
 0x105   :  { %1014 = vmatprep.mubr.f32.mxu0 %v4136_v13 }
 0x106   :  { %2959 = vmatmul.mubr.msk.f32.gmra.mrb[46].mxu1 %vm365_vm1, %v4771_v38 }
 0x107   :  { %1151 = vmatprep.mubr.f32.mxu1 %v4136_v13 }
 0x108   :  { %2962 = vmatmul.mubr.msk.f32.vlgmr.msra.gmra.mrb[48].mxu0 %vm365_vm1, %v4453_v21 }
 0x109   :  { %3195 = vmatpush1.bf16.msra.mxu0 %v3194_v8  ;;  %1020 = vmatprep.mubr.f32.mxu0 %v4136_v13 }
 0x10a   :  { %2976 = vmatmul.mubr.msk.f32.vlgmr.msra.gmra.mrb[48].mxu1 %vm365_vm1, %v4453_v21  ;;  %3197 = vmatprep.subr.bf16.mxu0 %v3196_v35 }
 0x10b   :  { %3203 = vmatpush1.bf16.msra.mxu1 %v3202_v9  ;;  %1157 = vmatprep.mubr.f32.mxu1 %v4136_v13 }
 0x10c   :  { %3205 = vmatprep.subr.bf16.mxu1 %v3204_v22  ;;  %2963 = vmatmul.mubr.msk.f32.gmra.mrb[50].mxu0 %vm365_vm1, %v4496_v45 }
 0x10d   :  { %3199 = vmatpush1.bf16.msra.mxu0 %v3198_v42  ;;  %1026 = vmatprep.mubr.f32.mxu0 %v4136_v13 }
 0x10e   :  { %2977 = vmatmul.mubr.msk.f32.gmra.mrb[50].mxu1 %vm365_vm1, %v4496_v45  ;;  %2988 = vmatprep.subr.msk.mxu0 %vm351_vm0, %v4137_v10 }
 0x10f   :  { %3207 = vmatpush1.bf16.msra.mxu1 %v3206_v26  ;;  %1163 = vmatprep.mubr.f32.mxu1 %v4136_v13 }
 0x110   :  { %2964 = vmatmul.mubr.msk.f32.gmra.mrb[52].mxu0 %vm365_vm1, %v4534_v4  ;;  %3002 = vmatprep.subr.msk.mxu1 %vm351_vm0, %v4137_v10 }
 0x111   :  { %1032 = vmatprep.mubr.f32.mxu0 %v4136_v13  ;;  %2989 = vmatpush1.msk.msra.mxu0 %vm351_vm0, %v4137_v10 }
 0x112   :  { %2978 = vmatmul.mubr.msk.f32.gmra.mrb[52].mxu1 %vm365_vm1, %v4534_v4 }
 0x113   :  { %1169 = vmatprep.mubr.f32.mxu1 %v4136_v13  ;;  %3003 = vmatpush1.msk.msra.mxu1 %vm351_vm0, %v4137_v10 }
 0x114   :  { %2965 = vmatmul.mubr.msk.f32.gmra.mrb[54].mxu0 %vm365_vm1, %v4568_v37 }
 0x115   :  { %1038 = vmatprep.mubr.f32.mxu0 %v4136_v13 }
 0x116   :  { %2979 = vmatmul.mubr.msk.f32.gmra.mrb[54].mxu1 %vm365_vm1, %v4568_v37 }
 0x117   :  { %1175 = vmatprep.mubr.f32.mxu1 %v4136_v13 }
 0x118   :  { %2966 = vmatmul.mubr.msk.f32.gmra.mrb[56].mxu0 %vm365_vm1, %v4589_v56 }
 0x119   :  { %1044 = vmatprep.mubr.f32.mxu0 %v4136_v13 }
 0x11a   :  { %2980 = vmatmul.mubr.msk.f32.gmra.mrb[56].mxu1 %vm365_vm1, %v4589_v56 }
 0x11b   :  { %1181 = vmatprep.mubr.f32.mxu1 %v4136_v13 }
 0x11c   :  { %2967 = vmatmul.mubr.msk.f32.gmra.mrb[58].mxu0 %vm365_vm1, %v4617_v1 }
 0x11d   :  { %1050 = vmatprep.mubr.f32.mxu0 %v4136_v13 }
 0x11e   :  { %2981 = vmatmul.mubr.msk.f32.gmra.mrb[58].mxu1 %vm365_vm1, %v4617_v1 }
 0x11f   :  { %1187 = vmatprep.mubr.f32.mxu1 %v4136_v13 }
 0x120   :  { %2968 = vmatmul.mubr.msk.f32.gmra.mrb[60].mxu0 %vm365_vm1, %v4638_v41 }
 0x121   :  { %1056 = vmatprep.mubr.f32.mxu0 %v4136_v13 }
 0x122   :  { %2982 = vmatmul.mubr.msk.f32.gmra.mrb[60].mxu1 %vm365_vm1, %v4638_v41 }
 0x123   :  { %1193 = vmatprep.mubr.f32.mxu1 %v4136_v13 }
 0x124   :  { %2969 = vmatmul.mubr.msk.f32.gmra.mrb[62].mxu0 %vm365_vm1, %v4659_v36 }
 0x125   :  { %1062 = vmatprep.mubr.f32.mxu0 %v4136_v13 }
 0x126   :  { %2983 = vmatmul.mubr.msk.f32.gmra.mrb[62].mxu1 %vm365_vm1, %v4659_v36 }
 0x127   :  { %1199 = vmatprep.mubr.f32.mxu1 %v4136_v13 }
 0x128   :  { %2970 = vmatmul.mubr.msk.f32.gmra.mrb[64].mxu0 %vm365_vm1, %v4688_v47 }
 0x129   :  { %1068 = vmatprep.mubr.f32.mxu0 %v4136_v13 }
 0x12a   :  { %2984 = vmatmul.mubr.msk.f32.gmra.mrb[64].mxu1 %vm365_vm1, %v4688_v47 }
 0x12b   :  { %1205 = vmatprep.mubr.f32.mxu1 %v4136_v13 }
 0x12c   :  { %2971 = vmatmul.mubr.msk.f32.gmra.mrb[66].mxu0 %vm365_vm1, %v4724_v52 }
 0x12d   :  { %1074 = vmatprep.mubr.f32.mxu0 %v4136_v13 }
 0x12e   :  { %2985 = vmatmul.mubr.msk.f32.gmra.mrb[66].mxu1 %vm365_vm1, %v4724_v52 }
 0x12f   :  { %1211 = vmatprep.mubr.f32.mxu1 %v4136_v13 }
 0x130   :  { %2972 = vmatmul.mubr.msk.f32.gmra.mrb[68].mxu0 %vm365_vm1, %v4748_v14 }
 0x131   :  { %1080 = vmatprep.mubr.f32.mxu0 %v4136_v13 }
 0x132   :  { %2986 = vmatmul.mubr.msk.f32.gmra.mrb[68].mxu1 %vm365_vm1, %v4748_v14 }
 0x133   :  { %1217 = vmatprep.mubr.f32.mxu1 %v4136_v13 }
 0x134   :  { %2973 = vmatmul.mubr.msk.f32.gmra.mrb[70].mxu0 %vm365_vm1, %v4771_v38 }
 0x135   :  { %1288 = vmatprep.mubr.f32.mxu0 %v4136_v13 }
 0x136   :  { %2987 = vmatmul.mubr.msk.f32.gmra.mrb[70].mxu1 %vm365_vm1, %v4771_v38 }
 0x137   :  { %1425 = vmatprep.mubr.f32.mxu1 %v4136_v13 }
 0x138   :  { %2990 = vmatmul.mubr.msk.f32.vlgmr.msra.gmra.mrb[72].mxu0 %vm365_vm1, %v4453_v21 }
 0x139   :  { %1294 = vmatprep.mubr.f32.mxu0 %v4136_v13 }
 0x13a   :  { %3004 = vmatmul.mubr.msk.f32.vlgmr.msra.gmra.mrb[72].mxu1 %vm365_vm1, %v4453_v21 }
 0x13b   :  { %1431 = vmatprep.mubr.f32.mxu1 %v4136_v13 }
 0x13c   :  { %2991 = vmatmul.mubr.msk.f32.gmra.mrb[74].mxu0 %vm365_vm1, %v4496_v45 }
 0x13d   :  { %1300 = vmatprep.mubr.f32.mxu0 %v4136_v13 }
 0x13e   :  { %3005 = vmatmul.mubr.msk.f32.gmra.mrb[74].mxu1 %vm365_vm1, %v4496_v45 }
 0x13f   :  { %1437 = vmatprep.mubr.f32.mxu1 %v4136_v13 }
 0x140   :  { %2992 = vmatmul.mubr.msk.f32.gmra.mrb[76].mxu0 %vm365_vm1, %v4534_v4 }
 0x141   :  { %1306 = vmatprep.mubr.f32.mxu0 %v4136_v13 }
 0x142   :  { %3006 = vmatmul.mubr.msk.f32.gmra.mrb[76].mxu1 %vm365_vm1, %v4534_v4 }
 0x143   :  { %1443 = vmatprep.mubr.f32.mxu1 %v4136_v13 }
 0x144   :  { %2993 = vmatmul.mubr.msk.f32.gmra.mrb[78].mxu0 %vm365_vm1, %v4568_v37 }
 0x145   :  { %1312 = vmatprep.mubr.f32.mxu0 %v4136_v13 }
 0x146   :  { %3007 = vmatmul.mubr.msk.f32.gmra.mrb[78].mxu1 %vm365_vm1, %v4568_v37 }
 0x147   :  { %1449 = vmatprep.mubr.f32.mxu1 %v4136_v13 }
 0x148   :  { %2994 = vmatmul.mubr.msk.f32.gmra.mrb[80].mxu0 %vm365_vm1, %v4589_v56 }
 0x149   :  { %1318 = vmatprep.mubr.f32.mxu0 %v4136_v13 }
 0x14a   :  { %3008 = vmatmul.mubr.msk.f32.gmra.mrb[80].mxu1 %vm365_vm1, %v4589_v56 }
 0x14b   :  { %1455 = vmatprep.mubr.f32.mxu1 %v4136_v13 }
 0x14c   :  { %2995 = vmatmul.mubr.msk.f32.gmra.mrb[82].mxu0 %vm365_vm1, %v4617_v1 }
 0x14d   :  { %1324 = vmatprep.mubr.f32.mxu0 %v4136_v13 }
 0x14e   :  { %3009 = vmatmul.mubr.msk.f32.gmra.mrb[82].mxu1 %vm365_vm1, %v4617_v1 }
 0x14f   :  { %1461 = vmatprep.mubr.f32.mxu1 %v4136_v13 }
 0x150   :  { %2996 = vmatmul.mubr.msk.f32.gmra.mrb[84].mxu0 %vm365_vm1, %v4638_v41 }
 0x151   :  { %1330 = vmatprep.mubr.f32.mxu0 %v4136_v13 }
 0x152   :  { %3010 = vmatmul.mubr.msk.f32.gmra.mrb[84].mxu1 %vm365_vm1, %v4638_v41 }
 0x153   :  { %1467 = vmatprep.mubr.f32.mxu1 %v4136_v13 }
 0x154   :  { %2997 = vmatmul.mubr.msk.f32.gmra.mrb[86].mxu0 %vm365_vm1, %v4659_v36 }
 0x155   :  { %1336 = vmatprep.mubr.f32.mxu0 %v4136_v13 }
 0x156   :  { %3011 = vmatmul.mubr.msk.f32.gmra.mrb[86].mxu1 %vm365_vm1, %v4659_v36 }
 0x157   :  { %1473 = vmatprep.mubr.f32.mxu1 %v4136_v13 }
 0x158   :  { %2998 = vmatmul.mubr.msk.f32.gmra.mrb[88].mxu0 %vm365_vm1, %v4688_v47 }
 0x159   :  { %1342 = vmatprep.mubr.f32.mxu0 %v4136_v13 }
 0x15a   :  { %3012 = vmatmul.mubr.msk.f32.gmra.mrb[88].mxu1 %vm365_vm1, %v4688_v47 }
 0x15b   :  { %1479 = vmatprep.mubr.f32.mxu1 %v4136_v13 }
 0x15c   :  { %2999 = vmatmul.mubr.msk.f32.gmra.mrb[90].mxu0 %vm365_vm1, %v4724_v52 }
 0x15d   :  { %1348 = vmatprep.mubr.f32.mxu0 %v4136_v13 }
 0x15e   :  { %3013 = vmatmul.mubr.msk.f32.gmra.mrb[90].mxu1 %vm365_vm1, %v4724_v52 }
 0x15f   :  { %1485 = vmatprep.mubr.f32.mxu1 %v4136_v13 }
 0x160   :  { %3000 = vmatmul.mubr.msk.f32.gmra.mrb[92].mxu0 %vm365_vm1, %v4748_v14 }
 0x161   :  { %1354 = vmatprep.mubr.f32.mxu0 %v4136_v13 }
 0x162   :  { %3014 = vmatmul.mubr.msk.f32.gmra.mrb[92].mxu1 %vm365_vm1, %v4748_v14 }
 0x163   :  { %1491 = vmatprep.mubr.f32.mxu1 %v4136_v13 }
 0x164   :  { %3001 = vmatmul.mubr.msk.f32.gmra.mrb[94].mxu0 %vm365_vm1, %v4771_v38 }
 0x166   :  { %3015 = vmatmul.mubr.msk.f32.gmra.mrb[94].mxu1 %vm365_vm1, %v4771_v38 }
 0x17b   :  { %v468_v10 = vpop.f32.mrb[0].mxu0 }
 0x17c   :  { %v3016_v21 = vmul.f32 -1.442695, %v468_v10  ;;  %v470_v45 = vpop.f32.mrb[1].mxu0 }
 0x17d   :  { %v605_v4 = vpop.f32.mrb[0].mxu1  ;;  %v3017_v37 = vmul.f32 -1.442695, %v470_v45 }
 0x17e   :  { %3343 = vpow2.f32 %v3016_v21  ;;  %v3018_v56 = vmul.f32 -1.442695, %v605_v4  ;;  %v607_v29 = vpop.f32.mrb[1].mxu1 }
 0x17f   :  { %3345 = vpow2.f32 %v3017_v37  ;;  %v3019_v43 = vmul.f32 -1.442695, %v607_v29  ;;  %v474_v33 = vpop.f32.mrb[2].mxu0 }
 0x180   :  { %3347 = vpow2.f32 %v3018_v56  ;;  %v3032_v1 = vmul.f32 -1.442695, %v474_v33  ;;  %v476_v13 = vpop.f32.mrb[3].mxu0 }
 0x181   :  { %3349 = vpow2.f32 %v3019_v43  ;;  %v611_v50 = vpop.f32.mrb[2].mxu1  ;;  %v3033_v54 = vmul.f32 -1.442695, %v476_v13 }
 0x182   :  { %3351 = vpow2.f32 %v3032_v1  ;;  %v3034_v40 = vmul.f32 -1.442695, %v611_v50  ;;  %v613_v41 = vpop.f32.mrb[3].mxu1 }
 0x183   :  { %3353 = vpow2.f32 %v3033_v54  ;;  %v3035_v23 = vmul.f32 -1.442695, %v613_v41  ;;  %v480_v25 = vpop.f32.mrb[4].mxu0 }
 0x184   :  { %3355 = vpow2.f32 %v3034_v40  ;;  %v3048_v2 = vmul.f32 -1.442695, %v480_v25  ;;  %v482_v36 = vpop.f32.mrb[5].mxu0 }
 0x185   :  { %3357 = vpow2.f32 %v3035_v23  ;;  %v617_v49 = vpop.f32.mrb[4].mxu1  ;;  %v3049_v48 = vmul.f32 -1.442695, %v482_v36 }
 0x186   :  { %3359 = vpow2.f32 %v3048_v2  ;;  %v3050_v7 = vmul.f32 -1.442695, %v617_v49  ;;  %v619_v59 = vpop.f32.mrb[5].mxu1 }
 0x187   :  { %3361 = vpow2.f32 %v3049_v48  ;;  %v3051_v34 = vmul.f32 -1.442695, %v619_v59  ;;  %v486_v32 = vpop.f32.mrb[6].mxu0 }
 0x188   :  { %v3344_v47 = vpop.eup %3343  ;;  %3363 = vpow2.f32 %v3050_v7  ;;  %v3064_v17 = vmul.f32 -1.442695, %v486_v32  ;;  %v488_v3 = vpop.f32.mrb[7].mxu0 }
 0x189   :  { %v3346_v60 = vpop.eup %3345  ;;  %v1690_v61 = vadd.f32 1.0, %v3344_v47  ;;  %3365 = vpow2.f32 %v3051_v34  ;;  %v623_v30 = vpop.f32.mrb[6].mxu1  ;;  %v3065_v37 = vmul.f32 -1.442695, %v488_v3 }
 0x18a   :  { %v3348_v39 = vpop.eup %3347  ;;  %v1691_v51 = vadd.f32 1.0, %v3346_v60  ;;  %3367 = vpow2.f32 %v3064_v17  ;;  %v625_v0 = vpop.f32.mrb[7].mxu1  ;;  %v3066_v10 = vmul.f32 -1.442695, %v623_v30 }
 0x18b   :  { %v3350_v5 = vpop.eup %3349  ;;  %3369 = vrcp.f32 %v1690_v61  ;;  %v1692_v57 = vadd.f32 1.0, %v3348_v39  ;;  %v492_v63 = vpop.f32.mrb[8].mxu0  ;;  %v3067_v43 = vmul.f32 -1.442695, %v625_v0 }
 0x18c   :  { %v3352_v19 = vpop.eup %3351  ;;  %3371 = vrcp.f32 %v1691_v51  ;;  %v1693_v52 = vadd.f32 1.0, %v3350_v5  ;;  %v494_v62 = vpop.f32.mrb[9].mxu0 }
 0x18d   :  { %v3354_v8 = vpop.eup %3353  ;;  %3373 = vrcp.f32 %v1692_v57  ;;  %v1706_v31 = vadd.f32 1.0, %v3352_v19  ;;  %v629_v12 = vpop.f32.mrb[8].mxu1 }
 0x18e   :  { %v3356_v9 = vpop.eup %3355  ;;  %3375 = vrcp.f32 %v1693_v52  ;;  %v1707_v58 = vadd.f32 1.0, %v3354_v8  ;;  %v631_v11 = vpop.f32.mrb[9].mxu1 }
 0x18f   :  { %v3358_v14 = vpop.eup %3357  ;;  %3377 = vrcp.f32 %v1706_v31  ;;  %v1708_v35 = vadd.f32 1.0, %v3356_v9  ;;  %v498_v16 = vpop.f32.mrb[10].mxu0 }
 0x190   :  { %v3360_v18 = vpop.eup %3359  ;;  %3379 = vrcp.f32 %v1707_v58  ;;  %v1709_v22 = vadd.f32 1.0, %v3358_v14  ;;  %v500_v20 = vpop.f32.mrb[11].mxu0 }
 0x191   :  { %v3362_v24 = vpop.eup %3361  ;;  %3381 = vrcp.f32 %v1708_v35  ;;  %v1722_v38 = vadd.f32 1.0, %v3360_v18  ;;  %v635_v42 = vpop.f32.mrb[10].mxu1 }
 0x192   :  { %v3364_v46 = vpop.eup %3363  ;;  %3383 = vrcp.f32 %v1709_v22  ;;  %v1723_v26 = vadd.f32 1.0, %v3362_v24  ;;  %v637_v27 = vpop.f32.mrb[11].mxu1 }
 0x193   :  { %v3366_v53 = vpop.eup %3365  ;;  %3385 = vrcp.f32 %v1722_v38  ;;  %v1724_v28 = vadd.f32 1.0, %v3364_v46  ;;  %v504_v6 = vpop.f32.mrb[12].mxu0 }
 0x194   :  { %v3368_v44 = vpop.eup %3367  ;;  %3387 = vrcp.f32 %v1723_v26  ;;  %v1725_v55 = vadd.f32 1.0, %v3366_v53  ;;  %v5062_v21 = vpop.f32.mrb[13].mxu0 }
 0x195   :  { %v3370_v45 = vpop.eup %3369  ;;  %3389 = vrcp.f32 %v1724_v28  ;;  %v1738_v4 = vadd.f32 1.0, %v3368_v44  ;;  %v641_v56 = vpop.f32.mrb[12].mxu1 }
 0x196   :  { %v3372_v29 = vpop.eup %3371  ;;  %3391 = vrcp.f32 %v1725_v55  ;;  %v5064_v33 = vpop.f32.mrb[13].mxu1 }
 0x197   :  { %v3374_v1 = vpop.eup %3373  ;;  %3393 = vrcp.f32 %v1738_v4  ;;  %v5066_v13 = vpop.f32.mrb[14].mxu0 }
 0x198   :  { %v3376_v50 = vpop.eup %3375  ;;  %3395 = vpow2.f32 %v3066_v10  ;;  %v5068_v54 = vpop.f32.mrb[15].mxu0 }
 0x199   :  { %v3378_v40 = vpop.eup %3377  ;;  %3397 = vpow2.f32 %v3065_v37  ;;  %v5070_v41 = vpop.f32.mrb[14].mxu1 }
 0x19a   :  { %v5072_v23 = vpop.eup %3379  ;;  %3399 = vpow2.f32 %v3067_v43  ;;  %v5074_v25 = vpop.f32.mrb[15].mxu1 }
 0x19b   :  { %v3382_v2 = vpop.eup %3381  ;;  %3401 = vtanh.f32 %v492_v63  ;;  %v5076_v36 = vpop.f32.mrb[16].mxu0 }
 0x19c   :  { %v5078_v49 = vpop.eup %3383  ;;  %3403 = vtanh.f32 %v629_v12  ;;  %v5080_v48 = vpop.f32.mrb[17].mxu0 }
 0x19d   :  { %v5082_v7 = vpop.eup %3385  ;;  %3405 = vtanh.f32 %v494_v62  ;;  %v5084_v59 = vpop.f32.mrb[16].mxu1 }
 0x19e   :  { %v5086_v34 = vpop.eup %3387  ;;  %3407 = vtanh.f32 %v631_v11  ;;  %v5088_v32 = vpop.f32.mrb[17].mxu1 }
 0x19f   :  { %v3390_v47 = vpop.eup %3389  ;;  %3409 = vtanh.f32 %v498_v16  ;;  %v5090_v17 = vpop.f32.mrb[18].mxu0 }
 0x1a0   :  { %v5092_v3 = vpop.eup %3391  ;;  %3411 = vtanh.f32 %v635_v42  ;;  %v5094_v60 = vpop.f32.mrb[19].mxu0 }
 0x1a1   :  { %v5096_v61 = vpop.eup %3393  ;;  %3413 = vtanh.f32 %v500_v20  ;;  %v5098_v30 = vpop.f32.mrb[18].mxu1 }
 0x1a2   :  { %v3396_v39 = vpop.eup %3395  ;;  %3415 = vtanh.f32 %v637_v27  ;;  %v5100_v51 = vpop.f32.mrb[19].mxu1 }
 0x1a3   :  { %v3398_v0 = vpop.eup %3397  ;;  %v1740_v5 = vadd.f32 1.0, %v3396_v39  ;;  %3417 = vtanh.f32 %v504_v6  ;;  %v5102_v57 = vpop.f32.mrb[20].mxu0 }
 0x1a4   :  { %v3400_v63 = vpop.eup %3399  ;;  %v1739_v19 = vadd.f32 1.0, %v3398_v0  ;;  %3419 = vtanh.f32 %v641_v56  ;;  %v5104_v52 = vpop.f32.mrb[21].mxu0 }
 0x1a5   :  { %v3402_v62 = vpop.eup %3401  ;;  %3421 = vrcp.f32 %v1740_v5  ;;  %v1741_v8 = vadd.f32 1.0, %v3400_v63  ;;  %v5106_v31 = vpop.f32.mrb[20].mxu1  ;;  %v3080_v63 = vmul.f32 -1.442695, %v5076_v36  ;;  %v3083_v36 = vmul.f32 -1.442695, %v5088_v32 }
 0x1a6   :  { %v3404_v12 = vpop.eup %3403  ;;  %3423 = vrcp.f32 %v1739_v19  ;;  %v2330_v9 = vmul.f32 %v3402_v62, %v3370_v45  ;;  %v5108_v58 = vpop.f32.mrb[21].mxu1 }
 0x1a7   :  { %v3406_v11 = vpop.eup %3405  ;;  %3425 = vrcp.f32 %v1741_v8  ;;  %v2332_v14 = vmul.f32 %v3404_v12, %v3374_v1  ;;  %v5110_v35 = vpop.f32.mrb[22].mxu0 }
 0x1a8   :  { %v3408_v16 = vpop.eup %3407  ;;  %3427 = vtanh.f32 %v2330_v9  ;;  %v2331_v18 = vmul.f32 %v3406_v11, %v3372_v29  ;;  %v5112_v22 = vpop.f32.mrb[23].mxu0 }
 0x1a9   :  { %v3410_v20 = vpop.eup %3409  ;;  %3429 = vtanh.f32 %v2332_v14  ;;  %v2333_v24 = vmul.f32 %v3408_v16, %v3376_v50  ;;  %v5114_v38 = vpop.f32.mrb[22].mxu1 }
 0x1aa   :  { %v3412_v42 = vpop.eup %3411  ;;  %3431 = vtanh.f32 %v2331_v18  ;;  %v2346_v46 = vmul.f32 %v3410_v20, %v3378_v40  ;;  %v5116_v26 = vpop.f32.mrb[23].mxu1 }
 0x1ab   :  { %v3414_v27 = vpop.eup %3413  ;;  %3433 = vtanh.f32 %v2333_v24  ;;  %v2348_v53 = vmul.f32 %v3412_v42, %v3382_v2  ;;  %v5118_v28 = vpop.f32.mrb[24].mxu0 }
 0x1ac   :  { %v3416_v6 = vpop.eup %3415  ;;  %3435 = vtanh.f32 %v2346_v46  ;;  %v2347_v44 = vmul.f32 %v3414_v27, %v5072_v23  ;;  %v5121_v55 = vpop.f32.mrb[25].mxu0 }
 0x1ad   :  { %v3418_v10 = vpop.eup %3417  ;;  %3437 = vtanh.f32 %v2348_v53  ;;  %v2349_v45 = vmul.f32 %v3416_v6, %v5078_v49  ;;  %v5124_v4 = vpop.f32.mrb[24].mxu1 }
 0x1ae   :  { %v3420_v37 = vpop.eup %3419  ;;  %3439 = vtanh.f32 %v2347_v44  ;;  %v2362_v56 = vmul.f32 %v3418_v10, %v5082_v7  ;;  %v5127_v29 = vpop.f32.mrb[25].mxu1 }
 0x1af   :  { %v5129_v43 = vpop.eup %3421  ;;  %3441 = vtanh.f32 %v2349_v45  ;;  %v2364_v1 = vmul.f32 %v3420_v37, %v3390_v47  ;;  %v5131_v50 = vpop.f32.mrb[26].mxu0 }
 0x1b0   :  { %v5133_v40 = vpop.eup %3423  ;;  %3443 = vtanh.f32 %v2362_v56  ;;  %v5135_v23 = vpop.f32.mrb[27].mxu0 }
 0x1b1   :  { %v5137_v2 = vpop.eup %3425  ;;  %3445 = vtanh.f32 %v2364_v1  ;;  %v5139_v49 = vpop.f32.mrb[26].mxu1 }
 0x1b2   :  { %v5141_v39 = vpop.eup %3427  ;;  %3447 = vtanh.f32 %v5062_v21  ;;  %v5144_v7 = vpop.f32.mrb[27].mxu1  ;;  %v3082_v21 = vmul.f32 -1.442695, %v5084_v59  ;;  %v3096_v59 = vmul.f32 -1.442695, %v5090_v17 }
 0x1b3   :  { %v5146_v0 = vpop.eup %3429  ;;  %3449 = vtanh.f32 %v5064_v33  ;;  %v5149_v47 = vpop.f32.mrb[28].mxu0  ;;  %v3081_v33 = vmul.f32 -1.442695, %v5080_v48  ;;  %v3098_v48 = vmul.f32 -1.442695, %v5098_v30 }
 0x1b4   :  { %v5151_v5 = vpop.eup %3431  ;;  %3451 = vtanh.f32 %v5066_v13  ;;  %v5155_v19 = vpop.f32.mrb[29].mxu0 }
 0x1b5   :  { %v5157_v62 = vpop.eup %3433  ;;  %3453 = vtanh.f32 %v5070_v41  ;;  %v5161_v8 = vpop.f32.mrb[28].mxu1 }
 0x1b6   :  { %v5163_v12 = vpop.eup %3435  ;;  %3455 = vtanh.f32 %v5068_v54  ;;  %v5167_v9 = vpop.f32.mrb[29].mxu1 }
 0x1b7   :  { %v5169_v13 = vpop.eup %3437  ;;  %3457 = vtanh.f32 %v5074_v25  ;;  %v5173_v11 = vpop.f32.mrb[30].mxu0  ;;  %v3097_v25 = vmul.f32 -1.442695, %v5094_v60 }
 0x1b8   :  { %v5175_v41 = vpop.eup %3439  ;;  %3459 = vpow2.f32 %v3080_v63  ;;  %v5178_v14 = vpop.f32.mrb[31].mxu0 }
 0x1b9   :  { %v5180_v54 = vpop.eup %3441  ;;  %3461 = vpow2.f32 %v3082_v21  ;;  %v5183_v16 = vpop.f32.mrb[30].mxu1 }
 0x1ba   :  { %v5185_v18 = vpop.eup %3443  ;;  %3463 = vpow2.f32 %v3081_v33  ;;  %v5188_v32 = vpop.f32.mrb[31].mxu1 }
 0x1bb   :  { %v5190_v20 = vpop.eup %3445  ;;  %3465 = vpow2.f32 %v3083_v36  ;;  %v5192_v17 = vpop.f32.mrb[32].mxu0 }
 0x1bc   :  { %v3448_v24 = vpop.eup %3447  ;;  %3467 = vpow2.f32 %v3096_v59  ;;  %v5194_v42 = vpop.f32.mrb[33].mxu0 }
 0x1bd   :  { %v3450_v46 = vpop.eup %3449  ;;  %v2363_v30 = vmul.f32 %v3448_v24, %v5086_v34  ;;  %3469 = vpow2.f32 %v3098_v48  ;;  %v5197_v27 = vpop.f32.mrb[32].mxu1 }
 0x1be   :  { %v3452_v53 = vpop.eup %3451  ;;  %v2365_v60 = vmul.f32 %v3450_v46, %v5092_v3  ;;  %3471 = vpow2.f32 %v3097_v25  ;;  %v5200_v6 = vpop.f32.mrb[33].mxu1 }
 0x1bf   :  { %v3454_v44 = vpop.eup %3453  ;;  %3473 = vtanh.f32 %v2363_v30  ;;  %v2378_v10 = vmul.f32 %v3452_v53, %v5096_v61  ;;  %v5203_v45 = vpop.f32.mrb[34].mxu0 }
 0x1c0   :  { %v3456_v37 = vpop.eup %3455  ;;  %3475 = vtanh.f32 %v2365_v60  ;;  %v2380_v56 = vmul.f32 %v3454_v44, %v5129_v43  ;;  %v5206_v34 = vpop.f32.mrb[35].mxu0 }
 0x1c1   :  { %v3458_v1 = vpop.eup %3457  ;;  %3477 = vtanh.f32 %v2378_v10  ;;  %v2379_v63 = vmul.f32 %v3456_v37, %v5133_v40  ;;  %v5209_v3 = vpop.f32.mrb[34].mxu1 }
 0x1c2   :  { %v3460_v21 = vpop.eup %3459  ;;  %3479 = vtanh.f32 %v2380_v56  ;;  %v2381_v33 = vmul.f32 %v3458_v1, %v5137_v2  ;;  %v5212_v36 = vpop.f32.mrb[35].mxu1 }
 0x1c3   :  { %v3462_v61 = vpop.eup %3461  ;;  %3481 = vtanh.f32 %v2379_v63  ;;  %v2138_v59 = vadd.f32 1.0, %v3460_v21  ;;  %v5214_v48 = vpop.f32.mrb[36].mxu0  ;;  %v3099_v63 = vmul.f32 -1.442695, %v5100_v51  ;;  %v3113_v51 = vmul.f32 -1.442695, %v5104_v52 }
 0x1c4   :  { %v3464_v43 = vpop.eup %3463  ;;  %3483 = vtanh.f32 %v2381_v33  ;;  %v2140_v25 = vadd.f32 1.0, %v3462_v61  ;;  %v5216_v24 = vpop.f32.mrb[37].mxu0  ;;  %v3130_v52 = vmul.f32 -1.442695, %v5114_v38  ;;  %v3020_v38 = vmul.f32 -1.442695, %v5118_v28 }
 0x1c5   :  { %v3466_v46 = vpop.eup %3465  ;;  %3485 = vrcp.f32 %v2138_v59  ;;  %v2139_v40 = vadd.f32 1.0, %v3464_v43  ;;  %v5218_v30 = vpop.f32.mrb[36].mxu1  ;;  %v3112_v59 = vmul.f32 -1.442695, %v5102_v57  ;;  %v3115_v57 = vmul.f32 -1.442695, %v5108_v58 }
 0x1c6   :  { %v3468_v53 = vpop.eup %3467  ;;  %3487 = vrcp.f32 %v2140_v25  ;;  %v2141_v2 = vadd.f32 1.0, %v3466_v46  ;;  %v5220_v60 = vpop.f32.mrb[37].mxu1  ;;  %v3114_v46 = vmul.f32 -1.442695, %v5106_v31  ;;  %v3128_v31 = vmul.f32 -1.442695, %v5110_v35 }
 0x1c7   :  { %v3470_v44 = vpop.eup %3469  ;;  %3489 = vrcp.f32 %v2139_v40  ;;  %v2154_v10 = vadd.f32 1.0, %v3468_v53  ;;  %v5222_v37 = vpop.f32.mrb[38].mxu0  ;;  %v3129_v58 = vmul.f32 -1.442695, %v5112_v22  ;;  %v3131_v35 = vmul.f32 -1.442695, %v5116_v26 }
 0x1c8   :  { %v3472_v56 = vpop.eup %3471  ;;  %3491 = vrcp.f32 %v2141_v2  ;;  %v2156_v1 = vadd.f32 1.0, %v3470_v44  ;;  %v5225_v21 = vpop.f32.mrb[39].mxu0 }
 0x1c9   :  { %6051 = vst [vmem:[#allocation6_spill] sm:$0xff] %v5225_v21  ;;  %v5227_v33 = vpop.eup %3473  ;;  %3493 = vrcp.f32 %v2154_v10  ;;  %v2155_v61 = vadd.f32 1.0, %v3472_v56  ;;  %v5230_v43 = vpop.f32.mrb[38].mxu1 }
 0x1ca   :  { %v5232_v25 = vpop.eup %3475  ;;  %3495 = vrcp.f32 %v2156_v1  ;;  %v5235_v40 = vpop.f32.mrb[39].mxu1 }
 0x1cb   :  { %6052 = vst [vmem:[#allocation7_spill] sm:$0xff] %v5235_v40  ;;  %v5237_v53 = vpop.eup %3477  ;;  %3497 = vrcp.f32 %v2155_v61  ;;  %v5240_v2 = vpop.f32.mrb[40].mxu0 }
 0x1cc   :  { %6053 = vst [vmem:[#allocation8_spill] sm:$0xff] %v5240_v2  ;;  %v5242_v44 = vpop.eup %3479  ;;  %3499 = vpow2.f32 %v3099_v63  ;;  %v5245_v10 = vpop.f32.mrb[41].mxu0 }
 0x1cd   :  { %6054 = vst [vmem:[#allocation9_spill] sm:$0xff] %v5245_v10  ;;  %v5247_v56 = vpop.eup %3481  ;;  %3501 = vpow2.f32 %v3112_v59  ;;  %v5250_v1 = vpop.f32.mrb[40].mxu1 }
 0x1ce   :  { %6055 = vst [vmem:[#allocation10_spill] sm:$0xff] %v5250_v1  ;;  %v5252_v40 = vpop.eup %3483  ;;  %3503 = vpow2.f32 %v3114_v46  ;;  %v5255_v61 = vpop.f32.mrb[41].mxu1 }
 0x1cf   :  { %6056 = vst [vmem:[#allocation11_spill] sm:$0xff] %v5255_v61  ;;  %v3486_v21 = vpop.eup %3485  ;;  %3505 = vpow2.f32 %v3113_v51  ;;  %v5258_v63 = vpop.f32.mrb[42].mxu0 }
 0x1d0   :  { %6057 = vst [vmem:[#allocation12_spill] sm:$0xff] %v5258_v63  ;;  %v3488_v10 = vpop.eup %3487  ;;  %v2458_v59 = vmul.f32 %v3486_v21, %v5141_v39  ;;  %3507 = vpow2.f32 %v3115_v57  ;;  %v5262_v1 = vpop.f32.mrb[43].mxu0  ;;  %v3022_v63 = vmul.f32 -1.442695, %v5124_v4 }
 0x1d1   :  { %v3490_v2 = vpop.eup %3489  ;;  %v2460_v46 = vmul.f32 %v3488_v10, %v5146_v0  ;;  %3509 = vpow2.f32 %v3128_v31  ;;  %v5266_v61 = vpop.f32.mrb[42].mxu1  ;;  %v3021_v0 = vmul.f32 -1.442695, %v5121_v55 }
 0x1d2   :  { %v3492_v51 = vpop.eup %3491  ;;  %v2459_v22 = vmul.f32 %v3490_v2, %v5151_v5  ;;  %3511 = vpow2.f32 %v3130_v52  ;;  %v5270_v39 = vpop.f32.mrb[43].mxu1  ;;  %v3023_v5 = vmul.f32 -1.442695, %v5127_v29 }
 0x1d3   :  { %6058 = vst [vmem:[#allocation13_spill] sm:$0xff] %v5270_v39  ;;  %v3494_v21 = vpop.eup %3493  ;;  %v5273_v26 = vmul.f32 %v3492_v51, %v5157_v62  ;;  %3513 = vpow2.f32 %v3129_v58  ;;  %v5276_v57 = vpop.f32.mrb[44].mxu0 }
 0x1d4   :  { %6059 = vst [vmem:[#allocation14_spill] sm:$0xff] %v5276_v57  ;;  %v3496_v28 = vpop.eup %3495  ;;  %v5278_v10 = vpop.permute.xlu0 %2528  ;;  %v2474_v31 = vmul.f32 %v3494_v21, %v5163_v12  ;;  %3515 = vpow2.f32 %v3131_v35 }
 0x1d5   :  { %v5282_v4 = vpop.f32.mrb[45].mxu0  ;;  %v3498_v2 = vpop.eup %3497  ;;  %v2546_v62 = vmul.f32 %v5278_v10, %v2458_v59  ;;  %v2476_v58 = vmul.f32 %v3496_v28, %v5169_v13  ;;  %3517 = vpow2.f32 %v3020_v38  ;;  %v2548_v57 = vmul.f32 %v5278_v10, %v2460_v46 }
 0x1d6   :  { %6060 = vst [vmem:[#allocation15_spill] sm:$0xff] %v5282_v4  ;;  %v5284_v52 = vpop.permute.xlu1 %2533  ;;  %v5288_v55 = vpop.f32.mrb[44].mxu1  ;;  %v2475_v35 = vmul.f32 %v3498_v2, %v5175_v41  ;;  %3519 = vpow2.f32 %v3022_v63  ;;  %v2547_v4 = vmul.f32 %v5278_v10, %v2459_v22 }
 0x1d7   :  { %v3500_v51 = vpop.eup %3499  ;;  %v2562_v12 = vmul.f32 %v5284_v52, %v2474_v31  ;;  %v5293_v29 = vpop.f32.mrb[45].mxu1  ;;  %v2564_v59 = vmul.f32 %v5284_v52, %v2476_v58  ;;  %3521 = vpow2.f32 %v3021_v0 }
 0x1d8   :  { %6061 = vst [vmem:[#allocation16_spill] sm:$0xff] %v5293_v29  ;;  %v3502_v21 = vpop.eup %3501  ;;  %v2157_v39 = vadd.f32 1.0, %v3500_v51  ;;  %v5297_v13 = vpop.f32.mrb[46].mxu0  ;;  %v2563_v46 = vmul.f32 %v5284_v52, %v2475_v35  ;;  %3523 = vpow2.f32 %v3023_v5 }
 0x1d9   :  { %v3504_v38 = vpop.eup %3503  ;;  %v5299_v28 = vadd.f32 %v2562_v12, %v2546_v62  ;;  %v2170_v31 = vadd.f32 1.0, %v3502_v21  ;;  %v5302_v41 = vpop.f32.mrb[47].mxu0  ;;  %v5304_v2 = vadd.f32 %v2564_v59, %v2548_v57 }
 0x1da   :  { %6062 = vst [vmem:[#allocation17_spill] sm:$0xff] %v5302_v41  ;;  %v3506_v63 = vpop.eup %3505  ;;  %3525 = vrcp.f32 %v2157_v39  ;;  %v2172_v22 = vadd.f32 1.0, %v3504_v38  ;;  %v5306_v29 = vpop.f32.mrb[46].mxu1  ;;  %v5308_v0 = vadd.f32 %v2563_v46, %v2547_v4 }
 0x1db   :  { %v3508_v58 = vpop.eup %3507  ;;  %3527 = vrcp.f32 %v2170_v31  ;;  %v2171_v51 = vadd.f32 1.0, %v3506_v63  ;;  %v5310_v62 = vpop.f32.mrb[47].mxu1 }
 0x1dc   :  { %v3510_v12 = vpop.eup %3509  ;;  %3529 = vrcp.f32 %v2172_v22  ;;  %v2173_v35 = vadd.f32 1.0, %v3508_v58  ;;  %v5312_v5 = vpop.f32.mrb[48].mxu0 }
 0x1dd   :  { %6063 = vst [vmem:[#allocation18_spill] sm:$0xff] %v5312_v5  ;;  %v3512_v21 = vpop.eup %3511  ;;  %3531 = vrcp.f32 %v2171_v51  ;;  %v2186_v57 = vadd.f32 1.0, %v3510_v12  ;;  %v5314_v59 = vpop.f32.mrb[49].mxu0 }
 0x1de   :  { %6064 = vst [vmem:[#allocation19_spill] sm:$0xff] %v5314_v59  ;;  %v3514_v39 = vpop.eup %3513  ;;  %3533 = vrcp.f32 %v2173_v35  ;;  %v2188_v38 = vadd.f32 1.0, %v3512_v21  ;;  %v5316_v41 = vpop.f32.mrb[48].mxu1  ;;  %v3036_v21 = vmul.f32 -1.442695, %v5131_v50 }
 0x1df   :  { %v3516_v4 = vpop.eup %3515  ;;  %3535 = vrcp.f32 %v2186_v57  ;;  %v2187_v46 = vadd.f32 1.0, %v3514_v39  ;;  %v5318_v31 = vpop.f32.mrb[49].mxu1  ;;  %v3037_v57 = vmul.f32 -1.442695, %v5135_v23  ;;  %v3053_v50 = vmul.f32 -1.442695, %v5155_v19 }
 0x1e0   :  { %6065 = vst [vmem:[#allocation20_spill] sm:$0xff] %v5318_v31  ;;  %v3518_v63 = vpop.eup %3517  ;;  %3537 = vrcp.f32 %v2188_v38  ;;  %v2189_v22 = vadd.f32 1.0, %v3516_v4  ;;  %v5320_v58 = vpop.f32.mrb[50].mxu0  ;;  %v3038_v4 = vmul.f32 -1.442695, %v5139_v49 }
 0x1e1   :  { %6066 = vst [vmem:[#allocation21_spill] sm:$0xff] %v5320_v58  ;;  %v3520_v5 = vpop.eup %3519  ;;  %3539 = vrcp.f32 %v2187_v46  ;;  %v1694_v51 = vadd.f32 1.0, %v3518_v63  ;;  %v5322_v12 = vpop.f32.mrb[51].mxu0  ;;  %v3039_v58 = vmul.f32 -1.442695, %v5144_v7 }
 0x1e2   :  { %6067 = vst [vmem:[#allocation22_spill] sm:$0xff] %v5322_v12  ;;  %v3522_v59 = vpop.eup %3521  ;;  %3541 = vrcp.f32 %v2189_v22  ;;  %v1696_v35 = vadd.f32 1.0, %v3520_v5  ;;  %v5326_v39 = vpop.f32.mrb[50].mxu1  ;;  %v3052_v5 = vmul.f32 -1.442695, %v5149_v47 }
 0x1e3   :  { %6068 = vst [vmem:[#allocation23_spill] sm:$0xff] %v5326_v39  ;;  %v3524_v31 = vpop.eup %3523  ;;  %3543 = vrcp.f32 %v1694_v51  ;;  %v1695_v38 = vadd.f32 1.0, %v3522_v59  ;;  %v5330_v46 = vpop.f32.mrb[51].mxu1  ;;  %v3054_v59 = vmul.f32 -1.442695, %v5161_v8  ;;  %v2549_v8 = vmul.f32 %v5278_v10, %v5273_v26 }
 0x1e4   :  { %v3526_v63 = vpop.eup %3525  ;;  %3545 = vrcp.f32 %v1696_v35  ;;  %v1697_v12 = vadd.f32 1.0, %v3524_v31  ;;  %v5334_v22 = vpop.f32.mrb[52].mxu0  ;;  %v3055_v49 = vmul.f32 -1.442695, %v5167_v9  ;;  %v3068_v47 = vmul.f32 -1.442695, %v5173_v11 }
 0x1e5   :  { %6069 = vst [vmem:[#allocation24_spill] sm:$0xff] %v5334_v22  ;;  %v3528_v23 = vpop.eup %3527  ;;  %v2477_v39 = vmul.f32 %v3526_v63, %v5180_v54  ;;  %3547 = vrcp.f32 %v1695_v38  ;;  %v5339_v7 = vpop.f32.mrb[53].mxu0  ;;  %v5344_v19 = vmul.f32 -1.442695, %v5178_v14  ;;  %v3070_v63 = vmul.f32 -1.442695, %v5183_v16 }
 0x1e6   :  { %6070 = vst [vmem:[#allocation25_spill] sm:$0xff] %v5339_v7  ;;  %v3530_v51 = vpop.eup %3529  ;;  %v2490_v35 = vmul.f32 %v3528_v23, %v5185_v18  ;;  %3549 = vrcp.f32 %v1697_v12  ;;  %v5346_v31 = vpop.f32.mrb[52].mxu1 }
 0x1e7   :  { %6071 = vst [vmem:[#allocation26_spill] sm:$0xff] %v5346_v31  ;;  %v3532_v22 = vpop.eup %3531  ;;  %v5348_v54 = vpop.permute.xlu0 %2538  ;;  %v2565_v9 = vmul.f32 %v5284_v52, %v2477_v39  ;;  %v2492_v38 = vmul.f32 %v3530_v51, %v5190_v20  ;;  %3551 = vpow2.f32 %v3036_v21 }
 0x1e8   :  { %v5354_v18 = vpop.f32.mrb[53].mxu1  ;;  %v3534_v12 = vpop.eup %3533  ;;  %v2578_v11 = vmul.f32 %v5348_v54, %v2490_v35  ;;  %v2491_v14 = vmul.f32 %v3532_v22, %v5227_v33  ;;  %3553 = vpow2.f32 %v3038_v4 }
 0x1e9   :  { %v5359_v23 = vpop.f32.mrb[54].mxu0  ;;  %v3536_v7 = vpop.eup %3535  ;;  %v2637_v31 = vadd.f32 %v2565_v9, %v2549_v8  ;;  %v2580_v26 = vmul.f32 %v5348_v54, %v2492_v38  ;;  %v2493_v39 = vmul.f32 %v3534_v12, %v5232_v25  ;;  %3555 = vpow2.f32 %v3037_v57 }
 0x1ea   :  { %v5363_v20 = vpop.f32.mrb[55].mxu0  ;;  %v3538_v21 = vpop.eup %3537  ;;  %v2611_v51 = vadd.f32 %v5299_v28, %v2578_v11  ;;  %v2579_v35 = vmul.f32 %v5348_v54, %v2491_v14  ;;  %v2506_v33 = vmul.f32 %v3536_v7, %v5237_v53  ;;  %3557 = vpow2.f32 %v3039_v58 }
 0x1eb   :  { %v5368_v16 = vpop.f32.mrb[54].mxu1  ;;  %v3540_v4 = vpop.eup %3539  ;;  %v2629_v8 = vadd.f32 %v5304_v2, %v2580_v26  ;;  %v2581_v25 = vmul.f32 %v5348_v54, %v2493_v39  ;;  %v2508_v57 = vmul.f32 %v3538_v21, %v5242_v44  ;;  %3559 = vpow2.f32 %v3052_v5 }
 0x1ec   :  { %v5370_v22 = vpop.permute.xlu1 %2543  ;;  %v5375_v9 = vpop.f32.mrb[55].mxu1  ;;  %v2620_v38 = vadd.f32 %v5308_v0, %v2579_v35  ;;  %v2507_v58 = vmul.f32 %v3540_v4, %v5247_v56  ;;  %3561 = vpow2.f32 %v3054_v59  ;;  %v3071_v56 = vmul.f32 -1.442695, %v5188_v32 }
 0x1ed   :  { %v3542_v28 = vpop.eup %3541  ;;  %v2594_v53 = vmul.f32 %v5370_v22, %v2506_v33  ;;  %v5380_v7 = vpop.f32.mrb[56].mxu0  ;;  %v2638_v2 = vadd.f32 %v2637_v31, %v2581_v25  ;;  %v2596_v11 = vmul.f32 %v5370_v22, %v2508_v57  ;;  %3563 = vpow2.f32 %v3053_v50 }
 0x1ee   :  { %v5382_v12 = vpop.eup %3543  ;;  %v2509_v44 = vmul.f32 %v3542_v28, %v5252_v40  ;;  %v5386_v5 = vpop.f32.mrb[57].mxu0  ;;  %v2595_v26 = vmul.f32 %v5370_v22, %v2507_v58  ;;  %3565 = vpow2.f32 %v3055_v49 }
 0x1ef   :  { %v5388_v14 = vpop.eup %3545  ;;  %v5390_v0 = vadd.f32 %v2611_v51, %v2594_v53  ;;  %v5394_v59 = vpop.f32.mrb[56].mxu1  ;;  %v5398_v31 = vadd.f32 %v2629_v8, %v2596_v11  ;;  %3567 = vpow2.f32 %v3068_v47 }
 0x1f0   :  { %v5396_v39 = vpop.eup %3547  ;;  %v2597_v40 = vmul.f32 %v5370_v22, %v2509_v44  ;;  %v5401_v50 = vpop.f32.mrb[57].mxu1  ;;  %v5405_v51 = vadd.f32 %v2620_v38, %v2595_v26  ;;  %3569 = vpow2.f32 %v3070_v63 }
 0x1f1   :  { %v5403_v21 = vpop.eup %3549  ;;  %v5407_v35 = vpop.f32.mrb[58].mxu0  ;;  %3571 = vpow2.f32 %v5344_v19 }
 0x1f2   :  { %v3552_v49 = vpop.eup %3551  ;;  %v5409_v32 = vadd.f32 %v2638_v2, %v2597_v40  ;;  %v5412_v33 = vpop.f32.mrb[59].mxu0  ;;  %3573 = vpow2.f32 %v3071_v56 }
 0x1f3   :  { %v3554_v4 = vpop.eup %3553  ;;  %v1710_v8 = vadd.f32 1.0, %v3552_v49  ;;  %v5414_v47 = vpop.f32.mrb[58].mxu1  ;;  %3575 = vtanh.f32 %v5192_v17 }
 0x1f4   :  { %v3556_v25 = vpop.eup %3555  ;;  %v1712_v57 = vadd.f32 1.0, %v3554_v4  ;;  %v5417_v28 = vpop.f32.mrb[59].mxu1 }
 0x1f5   :  { %v3558_v63 = vpop.eup %3557  ;;  %3577 = vrcp.f32 %v1710_v8  ;;  %v1711_v38 = vadd.f32 1.0, %v3556_v25  ;;  %v5419_v53 = vpop.f32.mrb[60].mxu0 }
 0x1f6   :  { %6072 = vst [vmem:[#allocation27_spill] sm:$0xff] %v5419_v53  ;;  %v3560_v58 = vpop.eup %3559  ;;  %3579 = vrcp.f32 %v1712_v57  ;;  %v1713_v19 = vadd.f32 1.0, %v3558_v63  ;;  %v5421_v2 = vpop.f32.mrb[61].mxu0 }
 0x1f7   :  { %6073 = vst [vmem:[#allocation28_spill] sm:$0xff] %v5421_v2  ;;  %v3562_v11 = vpop.eup %3561  ;;  %3581 = vrcp.f32 %v1711_v38  ;;  %v1726_v44 = vadd.f32 1.0, %v3560_v58  ;;  %v5423_v26 = vpop.f32.mrb[60].mxu1 }
 0x1f8   :  { %6074 = vst [vmem:[#allocation29_spill] sm:$0xff] %v5423_v26  ;;  %v3564_v56 = vpop.eup %3563  ;;  %3583 = vrcp.f32 %v1713_v19  ;;  %v1728_v17 = vadd.f32 1.0, %v3562_v11  ;;  %v5425_v40 = vpop.f32.mrb[61].mxu1 }
 0x1f9   :  { %6075 = vst [vmem:[#allocation30_spill] sm:$0xff] %v5425_v40  ;;  %v3566_v49 = vpop.eup %3565  ;;  %3585 = vrcp.f32 %v1726_v44  ;;  %v1727_v4 = vadd.f32 1.0, %v3564_v56  ;;  %v5427_v8 = vpop.f32.mrb[62].mxu0 }
 0x1fa   :  { %6076 = vst [vmem:[#allocation31_spill] sm:$0xff] %v5427_v8  ;;  %v3568_v25 = vpop.eup %3567  ;;  %3587 = vrcp.f32 %v1728_v17  ;;  %v1729_v57 = vadd.f32 1.0, %v3566_v49  ;;  %v5429_v63 = vpop.f32.mrb[63].mxu0 }
 0x1fb   :  { %6077 = vst [vmem:[#allocation32_spill] sm:$0xff] %v5429_v63  ;;  %v3570_v2 = vpop.eup %3569  ;;  %3589 = vrcp.f32 %v1727_v4  ;;  %v1742_v38 = vadd.f32 1.0, %v3568_v25  ;;  %v5431_v58 = vpop.f32.mrb[62].mxu1 }
 0x1fc   :  { %6078 = vst [vmem:[#allocation33_spill] sm:$0xff] %v5431_v58  ;;  %v3572_v26 = vpop.eup %3571  ;;  %3591 = vrcp.f32 %v1729_v57  ;;  %v1744_v19 = vadd.f32 1.0, %v3570_v2  ;;  %v5433_v11 = vpop.f32.mrb[63].mxu1  ;;  %v2613_v57 = vrot.slane %v5390_v0, 4 }
 0x1fd   :  { %6079 = vst [vmem:[#allocation34_spill] sm:$0xff] %v5433_v11  ;;  %v3574_v40 = vpop.eup %3573  ;;  %3593 = vrcp.f32 %v1742_v38  ;;  %v1743_v44 = vadd.f32 1.0, %v3572_v26  ;;  %v5435_v56 = vpop.f32.mrb[64].mxu0  ;;  %v2631_v26 = vrot.slane %v5398_v31, 4 }
 0x1fe   :  { %6080 = vst [vmem:[#allocation35_spill] sm:$0xff] %v5435_v56  ;;  %v3576_v8 = vpop.eup %3575  ;;  %3595 = vrcp.f32 %v1744_v19  ;;  %v1745_v17 = vadd.f32 1.0, %v3574_v40  ;;  %v5437_v49 = vpop.f32.mrb[65].mxu0  ;;  %v2622_v40 = vrot.slane %v5405_v51, 4  ;;  %v2640_v19 = vrot.slane %v5409_v32, 4 }
 0x1ff   :  { %6081 = vst [vmem:[#allocation36_spill] sm:$0xff] %v5437_v49  ;;  %v5439_v63 = vpop.eup %3577  ;;  %3597 = vrcp.f32 %v1743_v44  ;;  %v2334_v4 = vmul.f32 %v3576_v8, %v5382_v12  ;;  %v5442_v25 = vpop.f32.mrb[64].mxu1  ;;  %v2632_v11 = vadd.f32 %v2631_v26, %v5398_v31 }
 0x200   :  { %6082 = vst [vmem:[#allocation37_spill] sm:$0xff] %v5442_v25  ;;  %v5444_v2 = vpop.eup %3579  ;;  %3599 = vrcp.f32 %v1745_v17  ;;  %v5452_v49 = vpop.f32.mrb[65].mxu1  ;;  %v2614_v17 = vadd.f32 %v2613_v57, %v5390_v0 }
 0x201   :  { %v5448_v38 = vpop.eup %3581  ;;  %3601 = vtanh.f32 %v2334_v4  ;;  %6083 = vst [vmem:[#allocation38_spill] sm:$0xff] %v5452_v49  ;;  %v5468_v4 = vpop.f32.mrb[66].mxu0  ;;  %v2633_v26 = vrot.slane %v2632_v11, 2 }
 0x202   :  { %v5454_v44 = vpop.eup %3583  ;;  %3603 = vtanh.f32 %v5197_v27  ;;  %6084 = vst [vmem:[#allocation39_spill] sm:$0xff] %v5468_v4  ;;  %v5470_v49 = vpop.f32.mrb[66].mxu1  ;;  %v2623_v27 = vadd.f32 %v2622_v40, %v5405_v51 }
 0x203   :  { %v5457_v12 = vpop.eup %3585  ;;  %3605 = vtanh.f32 %v5194_v42  ;;  %6085 = vst [vmem:[#allocation40_spill] sm:$0xff] %v5470_v49  ;;  %v2641_v42 = vadd.f32 %v2640_v19, %v5409_v32  ;;  %v5479_v0 = vpop.f32.mrb[67].mxu1 }
 0x204   :  { %v5460_v8 = vpop.eup %3587  ;;  %3607 = vtanh.f32 %v5200_v6  ;;  %v5477_v6 = vpop.f32.mrb[67].mxu0  ;;  %6087 = vst [vmem:[#allocation42_spill] sm:$0xff] %v5479_v0  ;;  %v2624_v51 = vrot.slane %v2623_v27, 2 }
 0x205   :  { %v5465_v25 = vpop.eup %3589  ;;  %3609 = vtanh.f32 %v5203_v45  ;;  %6086 = vst [vmem:[#allocation41_spill] sm:$0xff] %v5477_v6  ;;  %v2615_v45 = vrot.slane %v2614_v17, 2  ;;  %v5492_v40 = vpop.f32.mrb[68].mxu1  ;;  %v2642_v0 = vrot.slane %v2641_v42, 2 }
 0x206   :  { %v5474_v58 = vpop.eup %3591  ;;  %3611 = vtanh.f32 %v5209_v3  ;;  %v5490_v3 = vpop.f32.mrb[68].mxu0  ;;  %6089 = vst [vmem:[#allocation44_spill] sm:$0xff] %v5492_v40 }
 0x207   :  { %v5481_v31 = vpop.eup %3593  ;;  %3613 = vtanh.f32 %v5206_v34  ;;  %6088 = vst [vmem:[#allocation43_spill] sm:$0xff] %v5490_v3  ;;  %v2616_v19 = vadd.f32 %v2615_v45, %v2614_v17  ;;  %v5497_v34 = vpop.f32.mrb[69].mxu0  ;;  %v2634_v17 = vadd.f32 %v2633_v26, %v2632_v11 }
 0x208   :  { %v5484_v57 = vpop.eup %3595  ;;  %3615 = vtanh.f32 %v5212_v36  ;;  %6090 = vst [vmem:[#allocation45_spill] sm:$0xff] %v5497_v34  ;;  %v5499_v49 = vpop.f32.mrb[69].mxu1  ;;  %v2625_v36 = vadd.f32 %v2624_v51, %v2623_v27  ;;  %v2643_v51 = vadd.f32 %v2642_v0, %v2641_v42 }
 0x209   :  { %v5487_v32 = vpop.eup %3597  ;;  %3617 = vtanh.f32 %v5214_v48  ;;  %6091 = vst [vmem:[#allocation46_spill] sm:$0xff] %v5499_v49  ;;  %v2617_v48 = vrot.slane %v2616_v19, 1  ;;  %v5509_v34 = vpop.f32.mrb[70].mxu1  ;;  %v2635_v0 = vrot.slane %v2634_v17, 1 }
 0x20a   :  { %v5494_v6 = vpop.eup %3599  ;;  %3619 = vtanh.f32 %v5218_v30  ;;  %v2626_v40 = vrot.slane %v2625_v36, 1  ;;  %v5507_v30 = vpop.f32.mrb[70].mxu0 }
 0x20b   :  { %v5501_v4 = vpop.eup %3601  ;;  %3621 = vtanh.f32 %v5216_v24  ;;  %v2618_v27 = vadd.f32 %v2617_v48, %v2616_v19  ;;  %v5513_v53 = vpop.f32.mrb[71].mxu0  ;;  %v2644_v19 = vrot.slane %v2643_v51, 1 }
 0x20c   :  { %v3604_v56 = vpop.eup %3603  ;;  %3623 = vtanh.f32 %v5220_v60  ;;  %v5515_v60 = vpop.f32.mrb[71].mxu1 }
 0x20d   :  { %v3606_v45 = vpop.eup %3605  ;;  %v2336_v3 = vmul.f32 %v3604_v56, %v5388_v14  ;;  %3625 = vtanh.f32 %v5222_v37  ;;  %6092 = vst [vmem:[#allocation47_spill] sm:$0xff] %v5515_v60  ;;  %v5520_v14 = vstv %s6049_s5  ;;  %s4139_s5 = smov [#allocation3]  }
 0x20e   :  { %v3608_v49 = vpop.eup %3607  ;;  %v2335_v24 = vmul.f32 %v3606_v45, %v5396_v39  ;;  %3627 = vtanh.f32 %v5230_v43  ;;  %v2627_v39 = vadd.f32 %v2626_v40, %v2625_v36  ;;  %v2756_v48 = vadd.f32 %v5520_v14, %v2618_v27  ;;  %s2896_s20 = sshll.u32 %s4139_s5, 4  ;;  %s2897_s20 = int_to_ptr.vmem [resolvable:$true] %s2896_s20 }
 0x20f   :  { %v3610_v37 = vpop.eup %3609  ;;  %3629 = vtanh.f32 %v2336_v3  ;;  %v2337_v11 = vmul.f32 %v3608_v49, %v5403_v21  ;;  %v2636_v3 = vadd.f32 %v2635_v0, %v2634_v17  ;;  %v2645_v40 = vadd.f32 %v2644_v19, %v2643_v51  ;;  %s4111_s4 = scalar_lea.vmem %s2897_s20, 256  ;;  %p4116_p1 = scmp.lt.s32.totalorder %s2897_s20, %s2897_s20 }
 0x210   :  { %v3612_v56 = vpop.eup %3611  ;;  %3631 = vtanh.f32 %v2335_v24  ;;  %v2350_v42 = vmul.f32 %v3610_v37, %v5439_v63  ;;  %v2757_v21 = vadd.f32 %v5520_v14, %v2627_v39  ;;  %v4138_v17 = vmov 1966171168   ;;  %p4112_p0 = scmp.ne.s32.totalorder %s2897_s20, %s4111_s4  ;;  %p4117_p2 = scmp.lt.s32.totalorder %s4111_s4, %s4111_s4 }
 0x211   :  { %v3614_v43 = vpop.eup %3613  ;;  %3633 = vtanh.f32 %v2337_v11  ;;  %v2352_v26 = vmul.f32 %v3612_v56, %v5444_v2  ;;  %v2758_v2 = vadd.f32 %v5520_v14, %v2636_v3  ;;  %v2793_v56 = vunpack.c.l.s4 %v4138_v17  ;;  %v6094_v3 = vld [vmem:[#allocation10_spill] sm:$0xff] }
 0x212   :  { %v3616_v45 = vpop.eup %3615  ;;  %3635 = vtanh.f32 %v2350_v42  ;;  %v2351_v60 = vmul.f32 %v3614_v43, %v5448_v38  ;;  %v2788_v37 = vcombine.low %v2756_v48, %v2757_v21  ;;  %v2759_v38 = vadd.f32 %v5520_v14, %v2645_v40  ;;  %p4118_p3 = por %p4117_p2, %p4116_p1 }
 0x213   :  { %v3618_v49 = vpop.eup %3617  ;;  %3637 = vtanh.f32 %v2352_v26  ;;  %v2353_v63 = vmul.f32 %v3616_v45, %v5454_v44  ;;  %v2794_v39 = vunpack.c.0.s8 %v2793_v56  ;;  %v3086_v21 = vmul.f32 -1.442695, %v6094_v3  ;;  %v5567_v56 = vpop.f32.mrb[72].mxu0  ;;  %v6104_v3 = vld [vmem:[#allocation14_spill] sm:$0xff] }
 0x214   :  { %v3620_v36 = vpop.eup %3619  ;;  %3639 = vtanh.f32 %v2351_v60  ;;  %v2366_v24 = vmul.f32 %v3618_v49, %v5457_v12  ;;  %v2789_v12 = vcombine.low %v2758_v2, %v2759_v38  ;;  %v6098_v2 = vld [vmem:[#allocation11_spill] sm:$0xff]  ;;  %v6099_v38 = vld [vmem:[#allocation12_spill] sm:$0xff]  ;;  %p4119_p4 = pnand %p4118_p3, %p4112_p0 }
 0x215   :  { %v3622_v27 = vpop.eup %3621  ;;  %3641 = vtanh.f32 %v2353_v63  ;;  %v2368_v11 = vmul.f32 %v3620_v36, %v5460_v8  ;;  %v5540_v19 = vsub.s32 %v2794_v39, %v4213_v15  ;;  %v6095_v15 = vld [vmem:[#allocation6_spill] sm:$0xff]  ;;  %v6096_v63 = vld [vmem:[#allocation9_spill] sm:$0xff]  ;;  %v3100_v17 = vmul.f32 -1.442695, %v6099_v38 }
 0x216   :  { %v3624_v42 = vpop.eup %3623  ;;  %3643 = vtanh.f32 %v2366_v24  ;;  %v2367_v44 = vmul.f32 %v3622_v27, %v5465_v25  ;;  %v6093_v25 = vld [vmem:[#allocation8_spill] sm:$0xff]  ;;  %v3085_v40 = vmul.f32 -1.442695, %v6096_v63  ;;  %v6097_v24 = vld [vmem:[#allocation7_spill] sm:$0xff]  ;;  %v3087_v27 = vmul.f32 -1.442695, %v6098_v2 }
 0x217   :  { %v3626_v51 = vpop.eup %3625  ;;  %3645 = vtanh.f32 %v2368_v11  ;;  %v2369_v60 = vmul.f32 %v3624_v42, %v5474_v58  ;;  %v3084_v45 = vmul.f32 -1.442695, %v6093_v25  ;;  %v5552_v49 = vrot.slane %v2789_v12, %v5540_v19  ;;  %v5569_v42 = vpop.f32.mrb[72].mxu1 }
 0x218   :  { %v3628_v0 = vpop.eup %3627  ;;  %3647 = vtanh.f32 %v2367_v44  ;;  %v2382_v43 = vmul.f32 %v3626_v51, %v5481_v31  ;;  %v5549_v31 = vrot.slane %v2788_v37, %v5540_v19  ;;  %6100 = vst [vmem:[#allocation8_spill] sm:$0xff] %v5569_v42  ;;  %v3102_v51 = vmul.f32 -1.442695, %v5266_v61  ;;  %v5576_v12 = vpop.f32.mrb[73].mxu1 }
 0x219   :  { %v5536_v26 = vpop.eup %3629  ;;  %3649 = vtanh.f32 %v2369_v60  ;;  %v2384_v8 = vmul.f32 %v3628_v0, %v5484_v57  ;;  %v5574_v60 = vpop.f32.mrb[73].mxu0  ;;  %6102 = vst [vmem:[#allocation6_spill] sm:$0xff] %v5576_v12  ;;  %v3101_v0 = vmul.f32 -1.442695, %v5262_v1 }
 0x21a   :  { %v5542_v48 = vpop.eup %3631  ;;  %3651 = vtanh.f32 %v2382_v43  ;;  %6101 = vst [vmem:[#allocation10_spill] sm:$0xff] %v5574_v60  ;;  %v5587_v61 = vpop.f32.mrb[74].mxu0 }
 0x21b   :  { %v5545_v58 = vpop.eup %3633  ;;  %3653 = vtanh.f32 %v2384_v8  ;;  %v6103_v8 = vld [vmem:[#allocation13_spill] sm:$0xff]  ;;  %6105 = vst [vmem:[#allocation9_spill] sm:$0xff] %v5587_v61  ;;  %v5594_v1 = vpop.f32.mrb[75].mxu0 }
 0x21c   :  { %v5554_v57 = vpop.eup %3635  ;;  %3655 = vtanh.f32 %v6095_v15  ;;  %v3103_v25 = vmul.f32 -1.442695, %v6103_v8  ;;  %v5589_v15 = vpop.f32.mrb[74].mxu1  ;;  %6107 = vst [vmem:[#allocation11_spill] sm:$0xff] %v5594_v1 }
 0x21d   :  { %v5558_v36 = vpop.eup %3637  ;;  %3657 = vtanh.f32 %v6097_v24  ;;  %6106 = vst [vmem:[#allocation7_spill] sm:$0xff] %v5589_v15  ;;  %v5596_v24 = vpop.f32.mrb[75].mxu1 }
 0x21e   :  { %v5564_v37 = vpop.eup %3639  ;;  %3659 = vpow2.f32 %v3084_v45  ;;  %6108 = vst [vmem:[#allocation12_spill] sm:$0xff] %v5596_v24  ;;  %v5605_v11 = vpop.f32.mrb[76].mxu1 }
 0x21f   :  { %v5571_v44 = vpop.eup %3641  ;;  %3661 = vpow2.f32 %v3086_v21  ;;  %v3116_v21 = vmul.f32 -1.442695, %v6104_v3  ;;  %v5603_v3 = vpop.f32.mrb[76].mxu0  ;;  %6111 = vst [vmem:[#allocation14_spill] sm:$0xff] %v5605_v11 }
 0x220   :  { %v5578_v39 = vpop.eup %3643  ;;  %3663 = vpow2.f32 %v3085_v40  ;;  %v3118_v40 = vmul.f32 -1.442695, %v5288_v55  ;;  %6110 = vst [vmem:[#allocation13_spill] sm:$0xff] %v5603_v3  ;;  %v5608_v1 = vpop.f32.mrb[77].mxu0 }
 0x221   :  { %v5581_v43 = vpop.eup %3645  ;;  %3665 = vpow2.f32 %v3087_v27  ;;  %v6109_v27 = vld [vmem:[#allocation15_spill] sm:$0xff]  ;;  %v5610_v24 = vpop.f32.mrb[77].mxu1 }
 0x222   :  { %v5584_v45 = vpop.eup %3647  ;;  %3667 = vpow2.f32 %v3100_v17  ;;  %v3117_v38 = vmul.f32 -1.442695, %v6109_v27  ;;  %6112 = vst [vmem:[#allocation15_spill] sm:$0xff] %v5608_v1  ;;  %6113 = vst [vmem:[#allocation48_spill] sm:$0xff] %v5610_v24  ;;  %v5613_v61 = vpop.f32.mrb[78].mxu0 }
 0x223   :  { %v5591_v63 = vpop.eup %3649  ;;  %3669 = vpow2.f32 %v3102_v51  ;;  %6114 = vst [vmem:[#allocation49_spill] sm:$0xff] %v5613_v61 }
 0x224   :  { %v5598_v2 = vpop.eup %3651  ;;  %3671 = vpow2.f32 %v3101_v0 }
 0x225   :  { %v5601_v17 = vpop.eup %3653  ;;  %3673 = vpow2.f32 %v3103_v25 }
 0x226   :  { %v3656_v8 = vpop.eup %3655  ;;  %3675 = vpow2.f32 %v3116_v21 }
 0x227   :  { %v3658_v51 = vpop.eup %3657  ;;  %v2383_v55 = vmul.f32 %v3656_v8, %v5487_v32  ;;  %3677 = vpow2.f32 %v3118_v40 }
 0x228   :  { %v3660_v0 = vpop.eup %3659  ;;  %v2385_v27 = vmul.f32 %v3658_v51, %v5494_v6  ;;  %3679 = vpow2.f32 %v3117_v38 }
 0x229   :  { %v3662_v15 = vpop.eup %3661  ;;  %3681 = vtanh.f32 %v2383_v55  ;;  %v2142_v25 = vadd.f32 1.0, %v3660_v0 }
 0x22a   :  { %v3664_v21 = vpop.eup %3663  ;;  %3683 = vtanh.f32 %v2385_v27  ;;  %v2144_v3 = vadd.f32 1.0, %v3662_v15 }
 0x22b   :  { %v3666_v11 = vpop.eup %3665  ;;  %3685 = vrcp.f32 %v2142_v25  ;;  %v2143_v32 = vadd.f32 1.0, %v3664_v21 }
 0x22c   :  { %v3668_v40 = vpop.eup %3667  ;;  %3687 = vrcp.f32 %v2144_v3  ;;  %v2145_v8 = vadd.f32 1.0, %v3666_v11  ;;  %v6115_v3 = vld [vmem:[#allocation16_spill] sm:$0xff] }
 0x22d   :  { %v3670_v1 = vpop.eup %3669  ;;  %3689 = vrcp.f32 %v2143_v32  ;;  %v2158_v24 = vadd.f32 1.0, %v3668_v40  ;;  %v3119_v11 = vmul.f32 -1.442695, %v6115_v3  ;;  %v5630_v3 = vpop.f32.mrb[79].mxu0 }
 0x22e   :  { %v3672_v12 = vpop.eup %3671  ;;  %3691 = vrcp.f32 %v2145_v8  ;;  %v2160_v6 = vadd.f32 1.0, %v3670_v1  ;;  %v3132_v1 = vmul.f32 -1.442695, %v5297_v13  ;;  %v6116_v8 = vld [vmem:[#allocation17_spill] sm:$0xff] }
 0x22f   :  { %v3674_v38 = vpop.eup %3673  ;;  %3693 = vrcp.f32 %v2158_v24  ;;  %v2159_v51 = vadd.f32 1.0, %v3672_v12  ;;  %v3134_v12 = vmul.f32 -1.442695, %v5306_v29  ;;  %6120 = vst [vmem:[#allocation17_spill] sm:$0xff] %v5630_v3 }
 0x230   :  { %v3676_v55 = vpop.eup %3675  ;;  %3695 = vrcp.f32 %v2160_v6  ;;  %v2161_v15 = vadd.f32 1.0, %v3674_v38  ;;  %v3133_v6 = vmul.f32 -1.442695, %v6116_v8  ;;  %v5623_v38 = vpop.f32.mrb[78].mxu1 }
 0x231   :  { %v3678_v0 = vpop.eup %3677  ;;  %3697 = vrcp.f32 %v2159_v51  ;;  %v2174_v27 = vadd.f32 1.0, %v3676_v55  ;;  %6117 = vst [vmem:[#allocation16_spill] sm:$0xff] %v5623_v38 }
 0x232   :  { %v3680_v25 = vpop.eup %3679  ;;  %3699 = vrcp.f32 %v2161_v15  ;;  %v2176_v21 = vadd.f32 1.0, %v3678_v0  ;;  %v3135_v15 = vmul.f32 -1.442695, %v5310_v62 }
 0x233   :  { %v5616_v61 = vpop.eup %3681  ;;  %3701 = vrcp.f32 %v2174_v27  ;;  %v2175_v32 = vadd.f32 1.0, %v3680_v25  ;;  %v6118_v27 = vld [vmem:[#allocation18_spill] sm:$0xff] }
 0x234   :  { %v5619_v40 = vpop.eup %3683  ;;  %3703 = vrcp.f32 %v2176_v21  ;;  %v3024_v25 = vmul.f32 -1.442695, %v6118_v27  ;;  %v6119_v21 = vld [vmem:[#allocation19_spill] sm:$0xff]  ;;  %v6124_v27 = vld [vmem:[#allocation22_spill] sm:$0xff] }
 0x235   :  { %v3686_v24 = vpop.eup %3685  ;;  %3705 = vrcp.f32 %v2175_v32  ;;  %v3025_v29 = vmul.f32 -1.442695, %v6119_v21  ;;  %v5632_v32 = vpop.f32.mrb[79].mxu1  ;;  %v3041_v21 = vmul.f32 -1.442695, %v6124_v27 }
 0x236   :  { %v3688_v51 = vpop.eup %3687  ;;  %v2462_v55 = vmul.f32 %v3686_v24, %v5501_v4  ;;  %3707 = vpow2.f32 %v3119_v11  ;;  %6121 = vst [vmem:[#allocation18_spill] sm:$0xff] %v5632_v32  ;;  %v3026_v4 = vmul.f32 -1.442695, %v5316_v41  ;;  %v6122_v11 = vld [vmem:[#allocation20_spill] sm:$0xff]  ;;  %v6125_v32 = vld [vmem:[#allocation23_spill] sm:$0xff] }
 0x237   :  { %v3690_v0 = vpop.eup %3689  ;;  %v2464_v13 = vmul.f32 %v3688_v51, %v5536_v26  ;;  %3709 = vpow2.f32 %v3132_v1  ;;  %v3027_v62 = vmul.f32 -1.442695, %v6122_v11  ;;  %v6123_v1 = vld [vmem:[#allocation21_spill] sm:$0xff]  ;;  %v3042_v42 = vmul.f32 -1.442695, %v6125_v32 }
 0x238   :  { %v3692_v8 = vpop.eup %3691  ;;  %v2463_v38 = vmul.f32 %v3690_v0, %v5542_v48  ;;  %3711 = vpow2.f32 %v3134_v12  ;;  %v3040_v51 = vmul.f32 -1.442695, %v6123_v1  ;;  %v3043_v48 = vmul.f32 -1.442695, %v5330_v46 }
 0x239   :  { %v3694_v24 = vpop.eup %3693  ;;  %v2465_v26 = vmul.f32 %v3692_v8, %v5545_v58  ;;  %3713 = vpow2.f32 %v3133_v6  ;;  %v2550_v41 = vmul.f32 %v5278_v10, %v2462_v55  ;;  %v2552_v0 = vmul.f32 %v5278_v10, %v2464_v13  ;;  %v5646_v6 = vpop.f32.mrb[80].mxu0 }
 0x23a   :  { %v3696_v60 = vpop.eup %3695  ;;  %v2478_v3 = vmul.f32 %v3694_v24, %v5554_v57  ;;  %3715 = vpow2.f32 %v3135_v15  ;;  %v5648_v8 = vpop.f32.mrb[80].mxu1  ;;  %v2551_v57 = vmul.f32 %v5278_v10, %v2463_v38 }
 0x23b   :  { %v3698_v12 = vpop.eup %3697  ;;  %v2480_v58 = vmul.f32 %v3696_v60, %v5558_v36  ;;  %3717 = vpow2.f32 %v3024_v25  ;;  %v2553_v55 = vmul.f32 %v5278_v10, %v2465_v26  ;;  %v5656_v60 = vpop.f32.mrb[81].mxu0 }
 0x23c   :  { %v3700_v11 = vpop.eup %3699  ;;  %v2566_v15 = vmul.f32 %v5284_v52, %v2478_v3  ;;  %v2479_v32 = vmul.f32 %v3698_v12, %v5564_v37  ;;  %3719 = vpow2.f32 %v3026_v4  ;;  %v5658_v25 = vpop.f32.mrb[81].mxu1 }
 0x23d   :  { %v3702_v46 = vpop.eup %3701  ;;  %v2568_v13 = vmul.f32 %v5284_v52, %v2480_v58  ;;  %v2481_v36 = vmul.f32 %v3700_v11, %v5571_v44  ;;  %3721 = vpow2.f32 %v3025_v29 }
 0x23e   :  { %v3704_v24 = vpop.eup %3703  ;;  %v2646_v1 = vadd.f32 %v2566_v15, %v2550_v41  ;;  %v2567_v38 = vmul.f32 %v5284_v52, %v2479_v32  ;;  %v2494_v3 = vmul.f32 %v3702_v46, %v5578_v39  ;;  %3723 = vpow2.f32 %v3027_v62  ;;  %v5671_v15 = vpop.f32.mrb[82].mxu1 }
 0x23f   :  { %v3706_v37 = vpop.eup %3705  ;;  %v2664_v4 = vadd.f32 %v2568_v13, %v2552_v0  ;;  %v2569_v26 = vmul.f32 %v5284_v52, %v2481_v36  ;;  %v2496_v27 = vmul.f32 %v3704_v24, %v5581_v43  ;;  %3725 = vpow2.f32 %v3040_v51  ;;  %v5669_v0 = vpop.f32.mrb[82].mxu0 }
 0x240   :  { %v3708_v44 = vpop.eup %3707  ;;  %v2655_v29 = vadd.f32 %v2567_v38, %v2551_v57  ;;  %v2582_v12 = vmul.f32 %v5348_v54, %v2494_v3  ;;  %v2495_v58 = vmul.f32 %v3706_v37, %v5584_v45  ;;  %3727 = vpow2.f32 %v3042_v42  ;;  %v5676_v45 = vpop.f32.mrb[83].mxu0 }
 0x241   :  { %v3710_v41 = vpop.eup %3709  ;;  %v5666_v11 = vadd.f32 %v2569_v26, %v2553_v55  ;;  %v2584_v39 = vmul.f32 %v5348_v54, %v2496_v27  ;;  %v2177_v62 = vadd.f32 1.0, %v3708_v44  ;;  %3729 = vpow2.f32 %v3041_v21  ;;  %v5678_v42 = vpop.f32.mrb[83].mxu1 }
 0x242   :  { %v3712_v43 = vpop.eup %3711  ;;  %v5673_v51 = vadd.f32 %v2646_v1, %v2582_v12  ;;  %v2583_v57 = vmul.f32 %v5348_v54, %v2495_v58  ;;  %v2190_v32 = vadd.f32 1.0, %v3710_v41  ;;  %3731 = vpow2.f32 %v3043_v48  ;;  %v5684_v3 = vpop.f32.mrb[84].mxu0 }
 0x243   :  { %v3714_v46 = vpop.eup %3713  ;;  %v5680_v55 = vadd.f32 %v2664_v4, %v2584_v39  ;;  %3733 = vrcp.f32 %v2177_v62  ;;  %v2192_v21 = vadd.f32 1.0, %v3712_v43  ;;  %v5686_v48 = vpop.f32.mrb[84].mxu1 }
 0x244   :  { %v3716_v13 = vpop.eup %3715  ;;  %v5682_v36 = vadd.f32 %v2655_v29, %v2583_v57  ;;  %3735 = vrcp.f32 %v2190_v32  ;;  %v2191_v24 = vadd.f32 1.0, %v3714_v46  ;;  %v6126_v46 = vld [vmem:[#allocation24_spill] sm:$0xff] }
 0x245   :  { %v3718_v1 = vpop.eup %3717  ;;  %3737 = vrcp.f32 %v2192_v21  ;;  %v2193_v38 = vadd.f32 1.0, %v3716_v13  ;;  %v3056_v21 = vmul.f32 -1.442695, %v6126_v46 }
 0x246   :  { %v3720_v37 = vpop.eup %3719  ;;  %3739 = vrcp.f32 %v2191_v24  ;;  %v1698_v26 = vadd.f32 1.0, %v3718_v1  ;;  %v6127_v1 = vld [vmem:[#allocation26_spill] sm:$0xff] }
 0x247   :  { %v3722_v27 = vpop.eup %3721  ;;  %3741 = vrcp.f32 %v2193_v38  ;;  %v1700_v4 = vadd.f32 1.0, %v3720_v37  ;;  %v3058_v38 = vmul.f32 -1.442695, %v6127_v1 }
 0x248   :  { %v3724_v44 = vpop.eup %3723  ;;  %3743 = vrcp.f32 %v1698_v26  ;;  %v1699_v12 = vadd.f32 1.0, %v3722_v27  ;;  %v6128_v27 = vld [vmem:[#allocation25_spill] sm:$0xff] }
 0x249   :  { %v3726_v29 = vpop.eup %3725  ;;  %3745 = vrcp.f32 %v1700_v4  ;;  %v1701_v58 = vadd.f32 1.0, %v3724_v44  ;;  %v3057_v4 = vmul.f32 -1.442695, %v6128_v27 }
 0x24a   :  { %v3728_v41 = vpop.eup %3727  ;;  %3747 = vrcp.f32 %v1699_v12  ;;  %v1714_v39 = vadd.f32 1.0, %v3726_v29  ;;  %v3059_v29 = vmul.f32 -1.442695, %v5354_v18 }
 0x24b   :  { %v3730_v62 = vpop.eup %3729  ;;  %3749 = vrcp.f32 %v1701_v58  ;;  %v1716_v43 = vadd.f32 1.0, %v3728_v41  ;;  %v3072_v58 = vmul.f32 -1.442695, %v5359_v23 }
 0x24c   :  { %v3732_v57 = vpop.eup %3731  ;;  %3751 = vrcp.f32 %v1714_v39  ;;  %v1715_v32 = vadd.f32 1.0, %v3730_v62 }
 0x24d   :  { %v3734_v13 = vpop.eup %3733  ;;  %3753 = vrcp.f32 %v1716_v43  ;;  %v1717_v24 = vadd.f32 1.0, %v3732_v57  ;;  %v3074_v43 = vmul.f32 -1.442695, %v5368_v16  ;;  %v5708_v16 = vpop.f32.mrb[85].mxu1 }
 0x24e   :  { %v3736_v37 = vpop.eup %3735  ;;  %v2497_v26 = vmul.f32 %v3734_v13, %v5591_v63  ;;  %3755 = vrcp.f32 %v1715_v32 }
 0x24f   :  { %v3738_v44 = vpop.eup %3737  ;;  %v2510_v12 = vmul.f32 %v3736_v37, %v5598_v2  ;;  %3757 = vrcp.f32 %v1717_v24  ;;  %v3073_v2 = vmul.f32 -1.442695, %v5363_v20  ;;  %v3075_v20 = vmul.f32 -1.442695, %v5375_v9  ;;  %v5726_v9 = vpop.f32.mrb[86].mxu1 }
 0x250   :  { %v3740_v41 = vpop.eup %3739  ;;  %v2585_v39 = vmul.f32 %v5348_v54, %v2497_v26  ;;  %v2512_v62 = vmul.f32 %v3738_v44, %v5601_v17  ;;  %3759 = vpow2.f32 %v3056_v21  ;;  %v5706_v17 = vpop.f32.mrb[85].mxu0 }
 0x251   :  { %v3742_v63 = vpop.eup %3741  ;;  %v2598_v57 = vmul.f32 %v5370_v22, %v2510_v12  ;;  %v2511_v32 = vmul.f32 %v3740_v41, %v5616_v61  ;;  %3761 = vpow2.f32 %v3058_v38  ;;  %v5724_v44 = vpop.f32.mrb[86].mxu0 }
 0x252   :  { %v5701_v46 = vpop.eup %3743  ;;  %v2674_v18 = vadd.f32 %v5666_v11, %v2585_v39  ;;  %v2600_v23 = vmul.f32 %v5370_v22, %v2512_v62  ;;  %v2513_v13 = vmul.f32 %v3742_v63, %v5619_v40  ;;  %3763 = vpow2.f32 %v3057_v4 }
 0x253   :  { %v5710_v21 = vpop.eup %3745  ;;  %v2648_v61 = vadd.f32 %v5673_v51, %v2598_v57  ;;  %v2599_v24 = vmul.f32 %v5370_v22, %v2511_v32  ;;  %3765 = vpow2.f32 %v3059_v29  ;;  %v5730_v29 = vpop.f32.mrb[87].mxu0 }
 0x254   :  { %v5715_v1 = vpop.eup %3747  ;;  %v2666_v11 = vadd.f32 %v5680_v55, %v2600_v23  ;;  %v2601_v40 = vmul.f32 %v5370_v22, %v2513_v13  ;;  %3767 = vpow2.f32 %v3072_v58  ;;  %6129 = vst [vmem:[#allocation19_spill] sm:$0xff] %v5730_v29  ;;  %v5732_v58 = vpop.f32.mrb[87].mxu1 }
 0x255   :  { %v5719_v38 = vpop.eup %3749  ;;  %v2649_v37 = vrot.slane %v2648_v61, 4  ;;  %v2657_v26 = vadd.f32 %v5682_v36, %v2599_v24  ;;  %3769 = vpow2.f32 %v3074_v43  ;;  %6130 = vst [vmem:[#allocation20_spill] sm:$0xff] %v5732_v58 }
 0x256   :  { %v5722_v27 = vpop.eup %3751  ;;  %v2667_v51 = vrot.slane %v2666_v11, 4  ;;  %v2675_v4 = vadd.f32 %v2674_v18, %v2601_v40  ;;  %3771 = vpow2.f32 %v3073_v2  ;;  %v5741_v2 = vpop.f32.mrb[88].mxu0 }
 0x257   :  { %v5728_v12 = vpop.eup %3753  ;;  %v2658_v55 = vrot.slane %v2657_v26, 4  ;;  %3773 = vpow2.f32 %v3075_v20  ;;  %v2650_v41 = vadd.f32 %v2649_v37, %v2648_v61  ;;  %v5743_v18 = vpop.f32.mrb[88].mxu1 }
 0x258   :  { %v5734_v36 = vpop.eup %3755  ;;  %3775 = vtanh.f32 %v5380_v7  ;;  %v2668_v39 = vadd.f32 %v2667_v51, %v2666_v11  ;;  %v2676_v43 = vrot.slane %v2675_v4, 4  ;;  %v5746_v7 = vpop.f32.mrb[89].mxu0 }
 0x259   :  { %v5737_v62 = vpop.eup %3757  ;;  %3777 = vtanh.f32 %v5394_v59  ;;  %v2651_v63 = vrot.slane %v2650_v41, 2  ;;  %v2659_v57 = vadd.f32 %v2658_v55, %v2657_v26  ;;  %6131 = vst [vmem:[#allocation21_spill] sm:$0xff] %v5746_v7  ;;  %v5749_v59 = vpop.f32.mrb[89].mxu1 }
 0x25a   :  { %v3760_v32 = vpop.eup %3759  ;;  %3779 = vtanh.f32 %v5386_v5  ;;  %v2669_v23 = vrot.slane %v2668_v39, 2  ;;  %6132 = vst [vmem:[#allocation22_spill] sm:$0xff] %v5749_v59  ;;  %v2677_v26 = vadd.f32 %v2676_v43, %v2675_v4 }
 0x25b   :  { %v3762_v13 = vpop.eup %3761  ;;  %v1730_v61 = vadd.f32 1.0, %v3760_v32  ;;  %3781 = vtanh.f32 %v5401_v50  ;;  %v2652_v11 = vadd.f32 %v2651_v63, %v2650_v41  ;;  %v2660_v37 = vrot.slane %v2659_v57, 2  ;;  %v5751_v32 = vpop.f32.mrb[90].mxu0 }
 0x25c   :  { %v3764_v24 = vpop.eup %3763  ;;  %v1732_v20 = vadd.f32 1.0, %v3762_v13  ;;  %3783 = vtanh.f32 %v5407_v35  ;;  %6133 = vst [vmem:[#allocation23_spill] sm:$0xff] %v5751_v32  ;;  %v5753_v50 = vpop.f32.mrb[90].mxu1  ;;  %v2670_v7 = vadd.f32 %v2669_v23, %v2668_v39  ;;  %v2678_v59 = vrot.slane %v2677_v26, 2 }
 0x25d   :  { %v3766_v40 = vpop.eup %3765  ;;  %3785 = vrcp.f32 %v1730_v61  ;;  %v1731_v5 = vadd.f32 1.0, %v3764_v24  ;;  %6134 = vst [vmem:[#allocation24_spill] sm:$0xff] %v5753_v50  ;;  %v2653_v58 = vrot.slane %v2652_v11, 1  ;;  %v5755_v29 = vpop.f32.mrb[91].mxu0  ;;  %v2661_v43 = vadd.f32 %v2660_v37, %v2659_v57 }
 0x25e   :  { %v3768_v51 = vpop.eup %3767  ;;  %3787 = vrcp.f32 %v1732_v20  ;;  %v1733_v55 = vadd.f32 1.0, %v3766_v40  ;;  %6135 = vst [vmem:[#allocation26_spill] sm:$0xff] %v5755_v29  ;;  %v2671_v20 = vrot.slane %v2670_v7, 1 }
 0x25f   :  { %v3770_v13 = vpop.eup %3769  ;;  %3789 = vrcp.f32 %v1731_v5  ;;  %v1746_v35 = vadd.f32 1.0, %v3768_v51  ;;  %v2654_v4 = vadd.f32 %v2653_v58, %v2652_v11  ;;  %v2662_v23 = vrot.slane %v2661_v43, 1 }
 0x260   :  { %v3772_v41 = vpop.eup %3771  ;;  %3791 = vrcp.f32 %v1733_v55  ;;  %v1748_v63 = vadd.f32 1.0, %v3770_v13  ;;  %v2672_v55 = vadd.f32 %v2671_v20, %v2670_v7  ;;  %v2679_v13 = vadd.f32 %v2678_v59, %v2677_v26  ;;  %v5775_v20 = vpop.f32.mrb[92].mxu0 }
 0x261   :  { %v3774_v61 = vpop.eup %3773  ;;  %v1747_v24 = vadd.f32 1.0, %v3772_v41  ;;  %3793 = vrcp.f32 %v1746_v35  ;;  %v2663_v57 = vadd.f32 %v2662_v23, %v2661_v43  ;;  %v2760_v11 = vadd.f32 %v5520_v14, %v2654_v4  ;;  %v6136_v43 = vld [vmem:[#allocation27_spill] sm:$0xff]  ;;  %v6137_v23 = vld [vmem:[#allocation29_spill] sm:$0xff] }
 0x262   :  { %v3776_v40 = vpop.eup %3775  ;;  %v1749_v32 = vadd.f32 1.0, %v3774_v61  ;;  %3795 = vrcp.f32 %v1748_v63  ;;  %v2680_v41 = vrot.slane %v2679_v13, 1 }
 0x263   :  { %v3778_v50 = vpop.eup %3777  ;;  %v2338_v39 = vmul.f32 %v3776_v40, %v5701_v46  ;;  %3797 = vrcp.f32 %v1747_v24 }
 0x264   :  { %v3780_v5 = vpop.eup %3779  ;;  %v2340_v51 = vmul.f32 %v3778_v50, %v5710_v21  ;;  %3799 = vrcp.f32 %v1749_v32  ;;  %v2761_v21 = vadd.f32 %v5520_v14, %v2663_v57  ;;  %v2681_v59 = vadd.f32 %v2680_v41, %v2679_v13  ;;  %v5767_v32 = vpop.f32.mrb[91].mxu1  ;;  %v6141_v13 = vld [vmem:[#allocation30_spill] sm:$0xff] }
 0x265   :  { %v3782_v29 = vpop.eup %3781  ;;  %v2339_v58 = vmul.f32 %v3780_v5, %v5715_v1  ;;  %3801 = vtanh.f32 %v2338_v39  ;;  %v2762_v1 = vadd.f32 %v5520_v14, %v2672_v55  ;;  %v5777_v40 = vpop.f32.mrb[92].mxu1 }
 0x266   :  { %v3784_v37 = vpop.eup %3783  ;;  %v2341_v35 = vmul.f32 %v3782_v29, %v5719_v38  ;;  %3803 = vtanh.f32 %v2340_v51  ;;  %v2790_v50 = vcombine.low %v2760_v11, %v2761_v21  ;;  %v2763_v38 = vadd.f32 %v5520_v14, %v2681_v59  ;;  %v5782_v5 = vpop.f32.mrb[93].mxu1  ;;  %v6140_v51 = vld [vmem:[#allocation28_spill] sm:$0xff]  ;;  %v6142_v11 = vld [vmem:[#allocation31_spill] sm:$0xff] }
 0x267   :  { %v5762_v46 = vpop.eup %3785  ;;  %v2354_v63 = vmul.f32 %v3784_v37, %v5722_v27  ;;  %3805 = vtanh.f32 %v2339_v58  ;;  %6139 = vst [vmem:[#allocation27_spill] sm:$0xff] %v5782_v5  ;;  %v6143_v37 = vld [vmem:[#allocation35_spill] sm:$0xff]  ;;  %v5795_v21 = vpop.f32.mrb[94].mxu1 }
 0x268   :  { %v3788_v7 = vpop.eup %3787  ;;  %3807 = vtanh.f32 %v2341_v35  ;;  %v2791_v29 = vcombine.low %v2762_v1, %v2763_v38  ;;  %v2812_v24 = vrot.slane %v2790_v50, %v5540_v19  ;;  %v3088_v35 = vmul.f32 -1.442695, %v6143_v37  ;;  %6145 = vst [vmem:[#allocation28_spill] sm:$0xff] %v5795_v21  ;;  %v6146_v1 = vld [vmem:[#allocation33_spill] sm:$0xff]  ;;  %v6152_v37 = vld [vmem:[#allocation34_spill] sm:$0xff] }
 0x269   :  { %v3790_v26 = vpop.eup %3789  ;;  %3809 = vtanh.f32 %v5414_v47  ;;  %v5780_v47 = vpop.f32.mrb[93].mxu0  ;;  %v6147_v50 = vld [vmem:[#allocation37_spill] sm:$0xff] }
 0x26a   :  { %v3792_v61 = vpop.eup %3791  ;;  %3811 = vtanh.f32 %v5412_v33  ;;  %6138 = vst [vmem:[#allocation25_spill] sm:$0xff] %v5780_v47  ;;  %v2819_v33 = vrot.slane %v2791_v29, %v5540_v19  ;;  %v5793_v41 = vpop.f32.mrb[94].mxu0  ;;  %v3090_v38 = vmul.f32 -1.442695, %v6147_v50 }
 0x26b   :  { %v3794_v27 = vpop.eup %3793  ;;  %3813 = vtanh.f32 %v5417_v28  ;;  %6144 = vst [vmem:[#allocation29_spill] sm:$0xff] %v5793_v41  ;;  %v5801_v29 = vpop.f32.mrb[95].mxu0 }
 0x26c   :  { %v3796_v4 = vpop.eup %3795  ;;  %3815 = vtanh.f32 %v6136_v43  ;;  %v2821_v58 = vcombine.low %v2812_v24, %v2819_v33  ;;  %6148 = vst [vmem:[#allocation30_spill] sm:$0xff] %v5801_v29  ;;  %v5803_v43 = vpop.f32.mrb[95].mxu1  ;;  %v6150_v24 = vcombine.low %v5549_v31, %v5552_v49 }
 0x26d   :  { %v3798_v39 = vpop.eup %3797  ;;  %3817 = vtanh.f32 %v6137_v23  ;;  %6149 = vst [vmem:[#allocation31_spill] sm:$0xff] %v5803_v43 }
 0x26e   :  { %v3800_v28 = vpop.eup %3799  ;;  %3819 = vtanh.f32 %v6140_v51  ;;  %v2828_v23 = vrot.slane %v6150_v24, %v5540_v19  ;;  %v2835_v33 = vrot.slane %v2821_v58, %v5540_v19 }
 0x26f   :  { %v5786_v55 = vpop.eup %3801  ;;  %3821 = vtanh.f32 %v6141_v13  ;;  %v6151_v13 = vld [vmem:[#allocation32_spill] sm:$0xff] }
 0x270   :  { %v5789_v57 = vpop.eup %3803  ;;  %3823 = vtanh.f32 %v6142_v11 }
 0x271   :  { %v5797_v59 = vpop.eup %3805  ;;  %3825 = vtanh.f32 %v6146_v1  ;;  %v2836_v1 = vcombine.low %v2828_v23, %v2835_v33 }
 0x272   :  { %v5810_v51 = vpop.eup %3807  ;;  %3827 = vtanh.f32 %v6151_v13 }
 0x273   :  { %v3810_v11 = vpop.eup %3809  ;;  %3829 = vtanh.f32 %v6152_v37  ;;  %2888 = vst [vmem:[#allocation3] sm:$0xff] %v2836_v1 }
 0x274   :  { %v3812_v50 = vpop.eup %3811  ;;  %v2356_v29 = vmul.f32 %v3810_v11, %v5728_v12  ;;  %3831 = vpow2.f32 %v3088_v35 }
 0x275   :  { %v3814_v43 = vpop.eup %3813  ;;  %v2355_v21 = vmul.f32 %v3812_v50, %v5734_v36  ;;  %3833 = vpow2.f32 %v3090_v38 }
 0x276   :  { %v3816_v31 = vpop.eup %3815  ;;  %3835 = vtanh.f32 %v2354_v63  ;;  %v2357_v49 = vmul.f32 %v3814_v43, %v5737_v62 }
 0x277   :  { %v3818_v58 = vpop.eup %3817  ;;  %3837 = vtanh.f32 %v2356_v29  ;;  %v2370_v24 = vmul.f32 %v3816_v31, %v5762_v46 }
 0x278   :  { %v3820_v13 = vpop.eup %3819  ;;  %3839 = vtanh.f32 %v2355_v21  ;;  %v2372_v23 = vmul.f32 %v3818_v58, %v3788_v7 }
 0x279   :  { %v3822_v33 = vpop.eup %3821  ;;  %3841 = vtanh.f32 %v2357_v49  ;;  %v2371_v12 = vmul.f32 %v3820_v13, %v3790_v26  ;;  %v6153_v26 = vld [vmem:[#allocation36_spill] sm:$0xff] }
 0x27a   :  { %v3824_v35 = vpop.eup %3823  ;;  %3843 = vtanh.f32 %v2370_v24  ;;  %v2373_v11 = vmul.f32 %v3822_v33, %v3792_v61  ;;  %v3089_v1 = vmul.f32 -1.442695, %v6153_v26 }
 0x27b   :  { %v3826_v36 = vpop.eup %3825  ;;  %3845 = vtanh.f32 %v2372_v23  ;;  %v2386_v38 = vmul.f32 %v3824_v35, %v3794_v27  ;;  %v6154_v27 = vld [vmem:[#allocation38_spill] sm:$0xff]  ;;  %v6157_v23 = vld [vmem:[#allocation41_spill] sm:$0xff] }
 0x27c   :  { %v3828_v37 = vpop.eup %3827  ;;  %3847 = vtanh.f32 %v2371_v12  ;;  %v2388_v63 = vmul.f32 %v3826_v36, %v3796_v4  ;;  %v3091_v31 = vmul.f32 -1.442695, %v6154_v27  ;;  %v6155_v4 = vld [vmem:[#allocation39_spill] sm:$0xff]  ;;  %v3105_v33 = vmul.f32 -1.442695, %v6157_v23  ;;  %v6158_v35 = vld [vmem:[#allocation42_spill] sm:$0xff] }
 0x27d   :  { %v3830_v62 = vpop.eup %3829  ;;  %3849 = vtanh.f32 %v2373_v11  ;;  %v2387_v29 = vmul.f32 %v3828_v37, %v3798_v39  ;;  %v3104_v39 = vmul.f32 -1.442695, %v6155_v4  ;;  %v3107_v11 = vmul.f32 -1.442695, %v6158_v35 }
 0x27e   :  { %v3832_v43 = vpop.eup %3831  ;;  %3851 = vtanh.f32 %v2386_v38  ;;  %v5818_v46 = vmul.f32 %v3830_v62, %v3800_v28  ;;  %v6156_v28 = vld [vmem:[#allocation40_spill] sm:$0xff]  ;;  %v6159_v38 = vld [vmem:[#allocation43_spill] sm:$0xff] }
 0x27f   :  { %v3834_v7 = vpop.eup %3833  ;;  %3853 = vtanh.f32 %v2388_v63  ;;  %v2146_v21 = vadd.f32 1.0, %v3832_v43  ;;  %v3106_v24 = vmul.f32 -1.442695, %v6156_v28  ;;  %v3120_v37 = vmul.f32 -1.442695, %v6159_v38  ;;  %v6160_v62 = vld [vmem:[#allocation44_spill] sm:$0xff] }
 0x280   :  { %v5821_v50 = vpop.eup %3835  ;;  %3855 = vtanh.f32 %v2387_v29  ;;  %v2148_v61 = vadd.f32 1.0, %v3834_v7  ;;  %v3122_v29 = vmul.f32 -1.442695, %v6160_v62  ;;  %v6161_v7 = vld [vmem:[#allocation45_spill] sm:$0xff] }
 0x281   :  { %v5824_v49 = vpop.eup %3837  ;;  %3857 = vrcp.f32 %v2146_v21  ;;  %v3121_v21 = vmul.f32 -1.442695, %v6161_v7 }
 0x282   :  { %v5827_v58 = vpop.eup %3839  ;;  %3859 = vrcp.f32 %v2148_v61 }
 0x283   :  { %v5830_v13 = vpop.eup %3841  ;;  %3861 = vpow2.f32 %v3089_v1  ;;  %v6162_v1 = vld [vmem:[#allocation46_spill] sm:$0xff] }
 0x284   :  { %v5833_v12 = vpop.eup %3843  ;;  %3863 = vpow2.f32 %v3091_v31  ;;  %v3123_v61 = vmul.f32 -1.442695, %v6162_v1  ;;  %v3136_v31 = vmul.f32 -1.442695, %v5507_v30 }
 0x285   :  { %v5836_v36 = vpop.eup %3845  ;;  %3865 = vpow2.f32 %v3104_v39  ;;  %v3138_v39 = vmul.f32 -1.442695, %v5509_v34 }
 0x286   :  { %v5839_v63 = vpop.eup %3847  ;;  %3867 = vpow2.f32 %v3106_v24  ;;  %v3137_v24 = vmul.f32 -1.442695, %v5513_v53 }
 0x287   :  { %v5842_v43 = vpop.eup %3849  ;;  %3869 = vpow2.f32 %v3105_v33 }
 0x288   :  { %v5845_v26 = vpop.eup %3851  ;;  %3871 = vpow2.f32 %v3107_v11 }
 0x289   :  { %v5848_v27 = vpop.eup %3853  ;;  %3873 = vpow2.f32 %v3120_v37 }
 0x28a   :  { %v5851_v4 = vpop.eup %3855  ;;  %3875 = vpow2.f32 %v3122_v29 }
 0x28b   :  { %v3858_v28 = vpop.eup %3857  ;;  %3877 = vpow2.f32 %v3121_v21 }
 0x28c   :  { %v3860_v23 = vpop.eup %3859  ;;  %v5856_v33 = vmul.f32 %v3858_v28, %v5786_v55  ;;  %3879 = vpow2.f32 %v3123_v61 }
 0x28d   :  { %v3862_v35 = vpop.eup %3861  ;;  %v2468_v11 = vmul.f32 %v3860_v23, %v5789_v57  ;;  %3881 = vpow2.f32 %v3136_v31 }
 0x28e   :  { %v3864_v38 = vpop.eup %3863  ;;  %v2147_v30 = vadd.f32 1.0, %v3862_v35  ;;  %3883 = vpow2.f32 %v3138_v39 }
 0x28f   :  { %v3866_v37 = vpop.eup %3865  ;;  %v2149_v62 = vadd.f32 1.0, %v3864_v38  ;;  %3885 = vpow2.f32 %v3137_v24 }
 0x290   :  { %v3868_v34 = vpop.eup %3867  ;;  %3887 = vrcp.f32 %v2147_v30  ;;  %v2162_v29 = vadd.f32 1.0, %v3866_v37 }
 0x291   :  { %v3870_v7 = vpop.eup %3869  ;;  %3889 = vrcp.f32 %v2149_v62  ;;  %v2164_v53 = vadd.f32 1.0, %v3868_v34 }
 0x292   :  { %v3872_v21 = vpop.eup %3871  ;;  %3891 = vrcp.f32 %v2162_v29  ;;  %v2163_v55 = vadd.f32 1.0, %v3870_v7  ;;  %v6163_v29 = vld [vmem:[#allocation47_spill] sm:$0xff] }
 0x293   :  { %v3874_v1 = vpop.eup %3873  ;;  %3893 = vrcp.f32 %v2164_v53  ;;  %v2165_v61 = vadd.f32 1.0, %v3872_v21  ;;  %v3139_v7 = vmul.f32 -1.442695, %v6163_v29  ;;  %v3028_v53 = vmul.f32 -1.442695, %v5567_v56  ;;  %v6168_v56 = vld [vmem:[#allocation7_spill] sm:$0xff] }
 0x294   :  { %v3876_v57 = vpop.eup %3875  ;;  %3895 = vrcp.f32 %v2163_v55  ;;  %v2178_v31 = vadd.f32 1.0, %v3874_v1  ;;  %v6164_v1 = vld [vmem:[#allocation8_spill] sm:$0xff]  ;;  %v3046_v41 = vmul.f32 -1.442695, %v6168_v56 }
 0x295   :  { %v3878_v28 = vpop.eup %3877  ;;  %3897 = vrcp.f32 %v2165_v61  ;;  %v2180_v39 = vadd.f32 1.0, %v3876_v57  ;;  %v3030_v61 = vmul.f32 -1.442695, %v6164_v1  ;;  %v6165_v57 = vld [vmem:[#allocation10_spill] sm:$0xff] }
 0x296   :  { %v3880_v23 = vpop.eup %3879  ;;  %3899 = vrcp.f32 %v2178_v31  ;;  %v2179_v24 = vadd.f32 1.0, %v3878_v28  ;;  %v3029_v31 = vmul.f32 -1.442695, %v6165_v57  ;;  %v6170_v57 = vld [vmem:[#allocation12_spill] sm:$0xff] }
 0x297   :  { %v3882_v35 = vpop.eup %3881  ;;  %3901 = vrcp.f32 %v2180_v39  ;;  %v2181_v38 = vadd.f32 1.0, %v3880_v23  ;;  %v6166_v23 = vld [vmem:[#allocation6_spill] sm:$0xff]  ;;  %v3047_v47 = vmul.f32 -1.442695, %v6170_v57 }
 0x298   :  { %v3884_v30 = vpop.eup %3883  ;;  %3903 = vrcp.f32 %v2179_v24  ;;  %v2194_v37 = vadd.f32 1.0, %v3882_v35  ;;  %v3031_v24 = vmul.f32 -1.442695, %v6166_v23  ;;  %v6167_v35 = vld [vmem:[#allocation9_spill] sm:$0xff]  ;;  %v2554_v23 = vmul.f32 %v5278_v10, %v5856_v33 }
 0x299   :  { %v3886_v62 = vpop.eup %3885  ;;  %3905 = vrcp.f32 %v2181_v38  ;;  %v2196_v34 = vadd.f32 1.0, %v3884_v30  ;;  %v3044_v38 = vmul.f32 -1.442695, %v6167_v35  ;;  %v2556_v35 = vmul.f32 %v5278_v10, %v2468_v11 }
 0x29a   :  { %v3888_v21 = vpop.eup %3887  ;;  %3907 = vrcp.f32 %v2194_v37  ;;  %v2195_v55 = vadd.f32 1.0, %v3886_v62  ;;  %v6169_v37 = vld [vmem:[#allocation11_spill] sm:$0xff] }
 0x29b   :  { %v3890_v28 = vpop.eup %3889  ;;  %v2467_v39 = vmul.f32 %v3888_v21, %v5797_v59  ;;  %3909 = vrcp.f32 %v2196_v34  ;;  %v3045_v62 = vmul.f32 -1.442695, %v6169_v37  ;;  %v6171_v59 = vld [vmem:[#allocation13_spill] sm:$0xff] }
 0x29c   :  { %v3892_v30 = vpop.eup %3891  ;;  %v2469_v29 = vmul.f32 %v3890_v28, %v5810_v51  ;;  %3911 = vrcp.f32 %v2195_v55  ;;  %v3060_v34 = vmul.f32 -1.442695, %v6171_v59 }
 0x29d   :  { %v3894_v5 = vpop.eup %3893  ;;  %v2482_v1 = vmul.f32 %v3892_v30, %v5821_v50  ;;  %3913 = vpow2.f32 %v3139_v7  ;;  %v2555_v28 = vmul.f32 %v5278_v10, %v2467_v39 }
 0x29e   :  { %v3896_v21 = vpop.eup %3895  ;;  %v2484_v51 = vmul.f32 %v3894_v5, %v5824_v49  ;;  %3915 = vpow2.f32 %v3028_v53  ;;  %v2557_v30 = vmul.f32 %v5278_v10, %v2469_v29 }
 0x29f   :  { %v3898_v55 = vpop.eup %3897  ;;  %v2570_v56 = vmul.f32 %v5284_v52, %v2482_v1  ;;  %v2483_v50 = vmul.f32 %v3896_v21, %v5827_v58  ;;  %3917 = vpow2.f32 %v3030_v61 }
 0x2a0   :  { %v3900_v7 = vpop.eup %3899  ;;  %v2572_v37 = vmul.f32 %v5284_v52, %v2484_v51  ;;  %v2485_v33 = vmul.f32 %v3898_v55, %v5830_v13  ;;  %3919 = vpow2.f32 %v3029_v31 }
 0x2a1   :  { %v3902_v11 = vpop.eup %3901  ;;  %v2682_v57 = vadd.f32 %v2570_v56, %v2554_v23  ;;  %v2571_v5 = vmul.f32 %v5284_v52, %v2483_v50  ;;  %v2498_v49 = vmul.f32 %v3900_v7, %v5833_v12  ;;  %3921 = vpow2.f32 %v3031_v24 }
 0x2a2   :  { %v3904_v53 = vpop.eup %3903  ;;  %v2700_v39 = vadd.f32 %v2572_v37, %v2556_v35  ;;  %v2573_v58 = vmul.f32 %v5284_v52, %v2485_v33  ;;  %v2500_v61 = vmul.f32 %v3902_v11, %v5836_v36  ;;  %3923 = vpow2.f32 %v3044_v38  ;;  %v6173_v33 = vld [vmem:[#allocation15_spill] sm:$0xff] }
 0x2a3   :  { %v3906_v29 = vpop.eup %3905  ;;  %v2691_v1 = vadd.f32 %v2571_v5, %v2555_v28  ;;  %v2586_v59 = vmul.f32 %v5348_v54, %v2498_v49  ;;  %v2499_v13 = vmul.f32 %v3904_v53, %v5839_v63  ;;  %3925 = vpow2.f32 %v3046_v41  ;;  %v6174_v5 = vld [vmem:[#allocation48_spill] sm:$0xff] }
 0x2a4   :  { %v3908_v31 = vpop.eup %3907  ;;  %v2709_v21 = vadd.f32 %v2573_v58, %v2557_v30  ;;  %v2588_v23 = vmul.f32 %v5348_v54, %v2500_v61  ;;  %v2501_v12 = vmul.f32 %v3906_v29, %v5842_v43  ;;  %3927 = vpow2.f32 %v3045_v62  ;;  %v6172_v62 = vld [vmem:[#allocation14_spill] sm:$0xff] }
 0x2a5   :  { %v3910_v24 = vpop.eup %3909  ;;  %v2683_v35 = vadd.f32 %v2682_v57, %v2586_v59  ;;  %v2587_v51 = vmul.f32 %v5348_v54, %v2499_v13  ;;  %v2514_v36 = vmul.f32 %v3908_v31, %v5845_v26  ;;  %3929 = vpow2.f32 %v3047_v47 }
 0x2a6   :  { %v3912_v38 = vpop.eup %3911  ;;  %v2701_v55 = vadd.f32 %v2700_v39, %v2588_v23  ;;  %v2589_v28 = vmul.f32 %v5348_v54, %v2501_v12  ;;  %v2516_v41 = vmul.f32 %v3910_v24, %v5848_v27  ;;  %3931 = vpow2.f32 %v3060_v34 }
 0x2a7   :  { %v3914_v63 = vpop.eup %3913  ;;  %v2692_v56 = vadd.f32 %v2691_v1, %v2587_v51  ;;  %v2602_v50 = vmul.f32 %v5370_v22, %v2514_v36  ;;  %v2515_v43 = vmul.f32 %v3912_v38, %v5851_v4  ;;  %v3062_v7 = vmul.f32 -1.442695, %v6172_v62 }
 0x2a8   :  { %v3916_v30 = vpop.eup %3915  ;;  %v5897_v37 = vadd.f32 %v2709_v21, %v2589_v28  ;;  %v2604_v47 = vmul.f32 %v5370_v22, %v2516_v41  ;;  %v2197_v26 = vadd.f32 1.0, %v3914_v63  ;;  %v3061_v11 = vmul.f32 -1.442695, %v6173_v33 }
 0x2a9   :  { %v3918_v57 = vpop.eup %3917  ;;  %3933 = vtanh.f32 %v5818_v46  ;;  %v2684_v27 = vadd.f32 %v2683_v35, %v2602_v50  ;;  %v2603_v34 = vmul.f32 %v5370_v22, %v2515_v43  ;;  %v3063_v49 = vmul.f32 -1.442695, %v6174_v5 }
 0x2aa   :  { %v3920_v53 = vpop.eup %3919  ;;  %v2702_v4 = vadd.f32 %v2701_v55, %v2604_v47  ;;  %3935 = vrcp.f32 %v2197_v26  ;;  %v1702_v39 = vadd.f32 1.0, %v3916_v30  ;;  %v1704_v1 = vadd.f32 1.0, %v3918_v57  ;;  %v6175_v30 = vld [vmem:[#allocation49_spill] sm:$0xff]  ;;  %v6176_v57 = vld [vmem:[#allocation16_spill] sm:$0xff] }
 0x2ab   :  { %v3922_v58 = vpop.eup %3921  ;;  %v2685_v61 = vrot.slane %v2684_v27, 4  ;;  %v2693_v29 = vadd.f32 %v2692_v56, %v2603_v34  ;;  %3937 = vpow2.f32 %v3062_v7  ;;  %v1703_v31 = vadd.f32 1.0, %v3920_v53  ;;  %v6177_v34 = vld [vmem:[#allocation17_spill] sm:$0xff] }
 0x2ac   :  { %v3924_v59 = vpop.eup %3923  ;;  %v2703_v13 = vrot.slane %v2702_v4, 4  ;;  %3939 = vpow2.f32 %v3061_v11  ;;  %v1705_v23 = vadd.f32 1.0, %v3922_v58  ;;  %v3076_v47 = vmul.f32 -1.442695, %v6175_v30 }
 0x2ad   :  { %v3926_v21 = vpop.eup %3925  ;;  %v2694_v46 = vrot.slane %v2693_v29, 4  ;;  %3941 = vpow2.f32 %v3063_v49  ;;  %v2686_v12 = vadd.f32 %v2685_v61, %v2684_v27  ;;  %v1718_v35 = vadd.f32 1.0, %v3924_v59 }
 0x2ae   :  { %v3928_v24 = vpop.eup %3927  ;;  %3943 = vrcp.f32 %v1702_v39  ;;  %v1720_v36 = vadd.f32 1.0, %v3926_v21  ;;  %v2704_v63 = vadd.f32 %v2703_v13, %v2702_v4  ;;  %v3078_v27 = vmul.f32 -1.442695, %v6176_v57 }
 0x2af   :  { %v3930_v51 = vpop.eup %3929  ;;  %3945 = vrcp.f32 %v1704_v1  ;;  %v2687_v38 = vrot.slane %v2686_v12, 2  ;;  %v2695_v55 = vadd.f32 %v2694_v46, %v2693_v29  ;;  %v1719_v41 = vadd.f32 1.0, %v3928_v24  ;;  %v6178_v29 = vld [vmem:[#allocation18_spill] sm:$0xff] }
 0x2b0   :  { %v3932_v28 = vpop.eup %3931  ;;  %3947 = vrcp.f32 %v1703_v31  ;;  %v1721_v56 = vadd.f32 1.0, %v3930_v51  ;;  %v3077_v5 = vmul.f32 -1.442695, %v6177_v34  ;;  %v2705_v49 = vrot.slane %v2704_v63, 2 }
 0x2b1   :  { %3949 = vrcp.f32 %v1705_v23  ;;  %v2688_v50 = vadd.f32 %v2687_v38, %v2686_v12  ;;  %v2696_v43 = vrot.slane %v2695_v55, 2  ;;  %v1734_v62 = vadd.f32 1.0, %v3932_v28 }
 0x2b2   :  { %3951 = vrcp.f32 %v1718_v35  ;;  %v3079_v1 = vmul.f32 -1.442695, %v6178_v29  ;;  %v2706_v24 = vadd.f32 %v2705_v49, %v2704_v63 }
 0x2b3   :  { %v3934_v7 = vpop.eup %3933  ;;  %3953 = vrcp.f32 %v1720_v36  ;;  %v2689_v26 = vrot.slane %v2688_v50, 1  ;;  %v2697_v33 = vadd.f32 %v2696_v43, %v2695_v55 }
 0x2b4   :  { %v3936_v11 = vpop.eup %3935  ;;  %3955 = vrcp.f32 %v1719_v41 }
 0x2b5   :  { %v3938_v53 = vpop.eup %3937  ;;  %v2517_v4 = vmul.f32 %v3936_v11, %v3934_v7  ;;  %3957 = vrcp.f32 %v1721_v56  ;;  %v2690_v39 = vadd.f32 %v2689_v26, %v2688_v50  ;;  %v2698_v58 = vrot.slane %v2697_v33, 1 }
 0x2b6   :  { %v3940_v61 = vpop.eup %3939  ;;  %3959 = vrcp.f32 %v1734_v62  ;;  %v2707_v56 = vrot.slane %v2706_v24, 1  ;;  %v1736_v7 = vadd.f32 1.0, %v3938_v53 }
 0x2b7   :  { %v3942_v59 = vpop.eup %3941  ;;  %v2605_v13 = vmul.f32 %v5370_v22, %v2517_v4  ;;  %3961 = vpow2.f32 %v3076_v47  ;;  %v2699_v31 = vadd.f32 %v2698_v58, %v2697_v33  ;;  %v5910_v21 = vadd.f32 %v5520_v14, %v2690_v39 }
 0x2b8   :  { %v3944_v46 = vpop.eup %3943  ;;  %3963 = vpow2.f32 %v3078_v27  ;;  %v1735_v30 = vadd.f32 1.0, %v3940_v61  ;;  %v1737_v26 = vadd.f32 1.0, %v3942_v59 }
 0x2b9   :  { %v3946_v23 = vpop.eup %3945  ;;  %v2711_v12 = vadd.f32 %v5897_v37, %v2605_v13  ;;  %3965 = vpow2.f32 %v3077_v5  ;;  %v2765_v35 = vadd.f32 %v5520_v14, %v2699_v31 }
 0x2ba   :  { %v3948_v51 = vpop.eup %3947  ;;  %3967 = vpow2.f32 %v3079_v1 }
 0x2bb   :  { %v3950_v36 = vpop.eup %3949  ;;  %v2712_v38 = vrot.slane %v2711_v12, 4  ;;  %3969 = vtanh.f32 %v5646_v6  ;;  %v2837_v55 = vcombine.low %v5910_v21, %v2765_v35 }
 0x2bc   :  { %v3952_v28 = vpop.eup %3951  ;;  %3971 = vtanh.f32 %v5648_v8  ;;  %v2708_v8 = vadd.f32 %v2707_v56, %v2706_v24 }
 0x2bd   :  { %v3954_v41 = vpop.eup %3953  ;;  %3973 = vtanh.f32 %v5656_v60  ;;  %v2713_v37 = vadd.f32 %v2712_v38, %v2711_v12  ;;  %v5927_v59 = vrot.slane %v2837_v55, %v5540_v19 }
 0x2be   :  { %v3956_v50 = vpop.eup %3955  ;;  %3975 = vtanh.f32 %v5658_v25 }
 0x2bf   :  { %v3958_v63 = vpop.eup %3957  ;;  %3977 = vtanh.f32 %v5669_v0  ;;  %v2714_v43 = vrot.slane %v2713_v37, 2 }
 0x2c0   :  { %v3960_v62 = vpop.eup %3959  ;;  %3979 = vtanh.f32 %v5671_v15 }
 0x2c1   :  { %v3962_v6 = vpop.eup %3961  ;;  %3981 = vtanh.f32 %v5676_v45  ;;  %v2715_v47 = vadd.f32 %v2714_v43, %v2713_v37  ;;  %v2766_v45 = vadd.f32 %v5520_v14, %v2708_v8  ;;  %v3092_v43 = vmul.f32 -1.442695, %v5741_v2  ;;  %v6183_v2 = vld [vmem:[#allocation23_spill] sm:$0xff] }
 0x2c2   :  { %v3964_v60 = vpop.eup %3963  ;;  %3983 = vtanh.f32 %v5678_v42  ;;  %v1750_v25 = vadd.f32 1.0, %v3962_v6 }
 0x2c3   :  { %v3966_v33 = vpop.eup %3965  ;;  %3985 = vtanh.f32 %v5684_v3  ;;  %v2716_v0 = vrot.slane %v2715_v47, 1  ;;  %v1752_v57 = vadd.f32 1.0, %v3964_v60 }
 0x2c4   :  { %v3968_v11 = vpop.eup %3967  ;;  %3987 = vrcp.f32 %v1736_v7  ;;  %v1751_v15 = vadd.f32 1.0, %v3966_v33 }
 0x2c5   :  { %v3970_v27 = vpop.eup %3969  ;;  %3989 = vrcp.f32 %v1735_v30  ;;  %v2717_v34 = vadd.f32 %v2716_v0, %v2715_v47  ;;  %v1753_v49 = vadd.f32 1.0, %v3968_v11  ;;  %v6180_v30 = vld [vmem:[#allocation21_spill] sm:$0xff]  ;;  %v6182_v47 = vld [vmem:[#allocation22_spill] sm:$0xff] }
 0x2c6   :  { %v3972_v5 = vpop.eup %3971  ;;  %3991 = vrcp.f32 %v1737_v26  ;;  %v2342_v53 = vmul.f32 %v3970_v27, %v3944_v46  ;;  %v3108_v26 = vmul.f32 -1.442695, %v6183_v2  ;;  %v6189_v2 = vld [vmem:[#allocation28_spill] sm:$0xff] }
 0x2c7   :  { %v3974_v4 = vpop.eup %3973  ;;  %3993 = vrcp.f32 %v1750_v25  ;;  %v2344_v42 = vmul.f32 %v3972_v5, %v3946_v23  ;;  %v2767_v39 = vadd.f32 %v5520_v14, %v2717_v34 }
 0x2c8   :  { %v3976_v3 = vpop.eup %3975  ;;  %3995 = vrcp.f32 %v1752_v57  ;;  %v2343_v58 = vmul.f32 %v3974_v4, %v3948_v51 }
 0x2c9   :  { %v3978_v61 = vpop.eup %3977  ;;  %3997 = vrcp.f32 %v1751_v15  ;;  %v2345_v29 = vmul.f32 %v3976_v3, %v3950_v36  ;;  %v2838_v1 = vcombine.low %v2766_v45, %v2767_v39 }
 0x2ca   :  { %v3980_v13 = vpop.eup %3979  ;;  %3999 = vrcp.f32 %v1753_v49  ;;  %v2358_v31 = vmul.f32 %v3978_v61, %v3952_v28 }
 0x2cb   :  { %v3982_v21 = vpop.eup %3981  ;;  %4001 = vtanh.f32 %v2342_v53  ;;  %v2360_v46 = vmul.f32 %v3980_v13, %v3954_v41  ;;  %v5930_v23 = vrot.slane %v2838_v1, %v5540_v19 }
 0x2cc   :  { %v3984_v12 = vpop.eup %3983  ;;  %4003 = vtanh.f32 %v2344_v42  ;;  %v2359_v24 = vmul.f32 %v3982_v21, %v3956_v50 }
 0x2cd   :  { %v3986_v35 = vpop.eup %3985  ;;  %4005 = vtanh.f32 %v2343_v58  ;;  %v2361_v51 = vmul.f32 %v3984_v12, %v3958_v63  ;;  %v2869_v36 = vcombine.low %v5927_v59, %v5930_v23 }
 0x2ce   :  { %v3988_v38 = vpop.eup %3987  ;;  %4007 = vtanh.f32 %v2345_v29  ;;  %v2374_v55 = vmul.f32 %v3986_v35, %v3960_v62  ;;  %v3094_v62 = vmul.f32 -1.442695, %v5743_v18  ;;  %v6184_v18 = vld [vmem:[#allocation24_spill] sm:$0xff] }
 0x2cf   :  { %v3990_v56 = vpop.eup %3989  ;;  %4009 = vtanh.f32 %v2358_v31  ;;  %v3110_v33 = vmul.f32 -1.442695, %v6184_v18  ;;  %v6190_v18 = vld [vmem:[#allocation30_spill] sm:$0xff] }
 0x2d0   :  { %v3992_v28 = vpop.eup %3991  ;;  %4011 = vtanh.f32 %v2360_v46 }
 0x2d1   :  { %v3994_v41 = vpop.eup %3993  ;;  %4013 = vtanh.f32 %v5686_v48  ;;  %v6179_v48 = vld [vmem:[#allocation19_spill] sm:$0xff] }
 0x2d2   :  { %v3996_v37 = vpop.eup %3995  ;;  %4015 = vtanh.f32 %v5706_v17  ;;  %v3093_v17 = vmul.f32 -1.442695, %v6180_v30 }
 0x2d3   :  { %v3998_v50 = vpop.eup %3997  ;;  %4017 = vtanh.f32 %v5708_v16  ;;  %v6181_v16 = vld [vmem:[#allocation20_spill] sm:$0xff] }
 0x2d4   :  { %v4000_v63 = vpop.eup %3999  ;;  %4019 = vtanh.f32 %v5724_v44  ;;  %v3095_v44 = vmul.f32 -1.442695, %v6182_v47  ;;  %v6188_v47 = vld [vmem:[#allocation29_spill] sm:$0xff] }
 0x2d5   :  { %v5939_v7 = vpop.eup %4001  ;;  %4021 = vtanh.f32 %v5726_v9 }
 0x2d6   :  { %v5943_v6 = vpop.eup %4003  ;;  %4023 = vtanh.f32 %v6179_v48 }
 0x2d7   :  { %v5947_v8 = vpop.eup %4005  ;;  %4025 = vtanh.f32 %v6181_v16 }
 0x2d8   :  { %v5951_v60 = vpop.eup %4007  ;;  %4027 = vpow2.f32 %v3092_v43 }
 0x2d9   :  { %v5954_v9 = vpop.eup %4009  ;;  %4029 = vpow2.f32 %v3094_v62  ;;  %v6186_v62 = vld [vmem:[#allocation25_spill] sm:$0xff] }
 0x2da   :  { %v5957_v25 = vpop.eup %4011  ;;  %4031 = vpow2.f32 %v3093_v17  ;;  %v3125_v48 = vmul.f32 -1.442695, %v6186_v62  ;;  %v6187_v17 = vld [vmem:[#allocation27_spill] sm:$0xff] }
 0x2db   :  { %v4014_v0 = vpop.eup %4013  ;;  %4033 = vpow2.f32 %v3095_v44 }
 0x2dc   :  { %v4016_v11 = vpop.eup %4015  ;;  %v2376_v57 = vmul.f32 %v4014_v0, %v3988_v38  ;;  %4035 = vpow2.f32 %v3108_v26 }
 0x2dd   :  { %v4018_v27 = vpop.eup %4017  ;;  %v2375_v15 = vmul.f32 %v4016_v11, %v3990_v56  ;;  %4037 = vpow2.f32 %v3110_v33  ;;  %v3141_v33 = vmul.f32 -1.442695, %v6190_v18 }
 0x2de   :  { %v4020_v34 = vpop.eup %4019  ;;  %4039 = vtanh.f32 %v2359_v24  ;;  %v2377_v45 = vmul.f32 %v4018_v27, %v3992_v28  ;;  %v3111_v28 = vmul.f32 -1.442695, %v5767_v32  ;;  %v3127_v32 = vmul.f32 -1.442695, %v6187_v17 }
 0x2df   :  { %v4022_v5 = vpop.eup %4021  ;;  %4041 = vtanh.f32 %v2361_v51  ;;  %v2390_v49 = vmul.f32 %v4020_v34, %v3994_v41  ;;  %v6185_v51 = vld [vmem:[#allocation26_spill] sm:$0xff] }
 0x2e0   :  { %v4024_v53 = vpop.eup %4023  ;;  %4043 = vtanh.f32 %v2374_v55  ;;  %v5959_v4 = vmul.f32 %v4022_v5, %v3996_v37  ;;  %v3109_v38 = vmul.f32 -1.442695, %v6185_v51  ;;  %v3124_v37 = vmul.f32 -1.442695, %v5775_v20 }
 0x2e1   :  { %v4026_v42 = vpop.eup %4025  ;;  %4045 = vtanh.f32 %v2376_v57  ;;  %v5961_v39 = vmul.f32 %v4024_v53, %v3998_v50  ;;  %v3140_v20 = vmul.f32 -1.442695, %v6188_v47  ;;  %v6191_v57 = vld [vmem:[#allocation31_spill] sm:$0xff] }
 0x2e2   :  { %v4028_v3 = vpop.eup %4027  ;;  %4047 = vtanh.f32 %v2375_v15  ;;  %v5963_v58 = vmul.f32 %v4026_v42, %v4000_v63  ;;  %v3126_v63 = vmul.f32 -1.442695, %v5777_v40  ;;  %v3142_v40 = vmul.f32 -1.442695, %v6189_v2 }
 0x2e3   :  { %v4030_v61 = vpop.eup %4029  ;;  %4049 = vtanh.f32 %v2377_v45  ;;  %v2150_v29 = vadd.f32 1.0, %v4028_v3  ;;  %v3143_v27 = vmul.f32 -1.442695, %v6191_v57 }
 0x2e4   :  { %v4032_v1 = vpop.eup %4031  ;;  %4051 = vtanh.f32 %v2390_v49  ;;  %v2152_v13 = vadd.f32 1.0, %v4030_v61 }
 0x2e5   :  { %v4034_v31 = vpop.eup %4033  ;;  %4053 = vrcp.f32 %v2150_v29  ;;  %v2151_v21 = vadd.f32 1.0, %v4032_v1 }
 0x2e6   :  { %v4036_v46 = vpop.eup %4035  ;;  %4055 = vrcp.f32 %v2152_v13  ;;  %v2153_v12 = vadd.f32 1.0, %v4034_v31 }
 0x2e7   :  { %v4038_v24 = vpop.eup %4037  ;;  %4057 = vrcp.f32 %v2151_v21  ;;  %v2166_v35 = vadd.f32 1.0, %v4036_v46 }
 0x2e8   :  { %v5966_v55 = vpop.eup %4039  ;;  %4059 = vrcp.f32 %v2153_v12  ;;  %v2168_v56 = vadd.f32 1.0, %v4038_v24 }
 0x2e9   :  { %v5969_v41 = vpop.eup %4041  ;;  %4061 = vrcp.f32 %v2166_v35 }
 0x2ea   :  { %v5972_v50 = vpop.eup %4043  ;;  %4063 = vrcp.f32 %v2168_v56 }
 0x2eb   :  { %v5975_v43 = vpop.eup %4045  ;;  %4065 = vpow2.f32 %v3109_v38 }
 0x2ec   :  { %v5978_v30 = vpop.eup %4047  ;;  %4067 = vpow2.f32 %v3111_v28 }
 0x2ed   :  { %v5981_v16 = vpop.eup %4049  ;;  %4069 = vpow2.f32 %v3124_v37 }
 0x2ee   :  { %v5984_v44 = vpop.eup %4051  ;;  %4071 = vpow2.f32 %v3126_v63 }
 0x2ef   :  { %v4054_v26 = vpop.eup %4053  ;;  %4073 = vpow2.f32 %v3125_v48 }
 0x2f0   :  { %v4056_v0 = vpop.eup %4055  ;;  %v2470_v11 = vmul.f32 %v4054_v26, %v5939_v7  ;;  %4075 = vpow2.f32 %v3127_v32 }
 0x2f1   :  { %v4058_v15 = vpop.eup %4057  ;;  %v2472_v34 = vmul.f32 %v4056_v0, %v5943_v6  ;;  %4077 = vpow2.f32 %v3140_v20 }
 0x2f2   :  { %v4060_v45 = vpop.eup %4059  ;;  %v2471_v5 = vmul.f32 %v4058_v15, %v5947_v8  ;;  %4079 = vpow2.f32 %v3142_v40  ;;  %v2558_v6 = vmul.f32 %v5278_v10, %v2470_v11 }
 0x2f3   :  { %v4062_v49 = vpop.eup %4061  ;;  %v2473_v53 = vmul.f32 %v4060_v45, %v5951_v60  ;;  %4081 = vpow2.f32 %v3141_v33  ;;  %v2560_v60 = vmul.f32 %v5278_v10, %v2472_v34 }
 0x2f4   :  { %v4064_v42 = vpop.eup %4063  ;;  %v2486_v3 = vmul.f32 %v4062_v49, %v5954_v9  ;;  %4083 = vpow2.f32 %v3143_v27  ;;  %v2559_v0 = vmul.f32 %v5278_v10, %v2471_v5 }
 0x2f5   :  { %v4066_v7 = vpop.eup %4065  ;;  %4085 = vtanh.f32 %v5959_v4  ;;  %v2488_v61 = vmul.f32 %v4064_v42, %v5957_v25  ;;  %v2561_v15 = vmul.f32 %v5278_v10, %v2473_v53 }
 0x2f6   :  { %v4068_v29 = vpop.eup %4067  ;;  %4087 = vtanh.f32 %v5961_v39  ;;  %v2574_v8 = vmul.f32 %v5284_v52, %v2486_v3  ;;  %v2167_v1 = vadd.f32 1.0, %v4066_v7 }
 0x2f7   :  { %v4070_v13 = vpop.eup %4069  ;;  %4089 = vtanh.f32 %v5963_v58  ;;  %v2576_v9 = vmul.f32 %v5284_v52, %v2488_v61  ;;  %v2169_v31 = vadd.f32 1.0, %v4068_v29 }
 0x2f8   :  { %v4072_v21 = vpop.eup %4071  ;;  %v2718_v4 = vadd.f32 %v2574_v8, %v2558_v6  ;;  %4091 = vrcp.f32 %v2167_v1  ;;  %v2182_v25 = vadd.f32 1.0, %v4070_v13 }
 0x2f9   :  { %v4074_v46 = vpop.eup %4073  ;;  %v2736_v12 = vadd.f32 %v2576_v9, %v2560_v60  ;;  %4093 = vrcp.f32 %v2169_v31  ;;  %v2184_v39 = vadd.f32 1.0, %v4072_v21 }
 0x2fa   :  { %v4076_v24 = vpop.eup %4075  ;;  %4095 = vrcp.f32 %v2182_v25  ;;  %v2183_v35 = vadd.f32 1.0, %v4074_v46 }
 0x2fb   :  { %v4078_v51 = vpop.eup %4077  ;;  %4097 = vrcp.f32 %v2184_v39  ;;  %v2185_v38 = vadd.f32 1.0, %v4076_v24 }
 0x2fc   :  { %v4080_v58 = vpop.eup %4079  ;;  %4099 = vrcp.f32 %v2183_v35  ;;  %v2198_v56 = vadd.f32 1.0, %v4078_v51 }
 0x2fd   :  { %v4082_v28 = vpop.eup %4081  ;;  %4101 = vrcp.f32 %v2185_v38  ;;  %v2200_v37 = vadd.f32 1.0, %v4080_v58 }
 0x2fe   :  { %v4084_v63 = vpop.eup %4083  ;;  %4103 = vrcp.f32 %v2198_v56  ;;  %v2199_v62 = vadd.f32 1.0, %v4082_v28 }
 0x2ff   :  { %v4086_v48 = vpop.eup %4085  ;;  %4105 = vrcp.f32 %v2200_v37  ;;  %v2201_v17 = vadd.f32 1.0, %v4084_v63 }
 0x300   :  { %v4088_v32 = vpop.eup %4087  ;;  %4107 = vrcp.f32 %v2199_v62 }
 0x301   :  { %v4090_v47 = vpop.eup %4089  ;;  %4109 = vrcp.f32 %v2201_v17 }
 0x302   :  { %v4092_v20 = vpop.eup %4091 }
 0x303   :  { %v4094_v2 = vpop.eup %4093  ;;  %v2487_v40 = vmul.f32 %v4092_v20, %v5966_v55 }
 0x304   :  { %v4096_v26 = vpop.eup %4095  ;;  %v2489_v18 = vmul.f32 %v4094_v2, %v5969_v41 }
 0x305   :  { %v4098_v33 = vpop.eup %4097  ;;  %v2575_v11 = vmul.f32 %v5284_v52, %v2487_v40  ;;  %v2502_v57 = vmul.f32 %v4096_v26, %v5972_v50 }
 0x306   :  { %v4100_v27 = vpop.eup %4099  ;;  %v2577_v34 = vmul.f32 %v5284_v52, %v2489_v18  ;;  %v2504_v45 = vmul.f32 %v4098_v33, %v5975_v43 }
 0x307   :  { %v4102_v49 = vpop.eup %4101  ;;  %v2727_v42 = vadd.f32 %v2575_v11, %v2559_v0  ;;  %v2590_v55 = vmul.f32 %v5348_v54, %v2502_v57  ;;  %v2503_v41 = vmul.f32 %v4100_v27, %v5978_v30 }
 0x308   :  { %v4104_v3 = vpop.eup %4103  ;;  %v2745_v7 = vadd.f32 %v2577_v34, %v2561_v15  ;;  %v2592_v5 = vmul.f32 %v5348_v54, %v2504_v45  ;;  %v2505_v61 = vmul.f32 %v4102_v49, %v5981_v16 }
 0x309   :  { %v4106_v50 = vpop.eup %4105  ;;  %v2719_v29 = vadd.f32 %v2718_v4, %v2590_v55  ;;  %v2591_v10 = vmul.f32 %v5348_v54, %v2503_v41  ;;  %v2518_v52 = vmul.f32 %v4104_v3, %v5984_v44  ;;  %v2877_v41 = vrot.slane %v2869_v36, %v5540_v19 }
 0x30a   :  { %v4108_v53 = vpop.eup %4107  ;;  %v2737_v43 = vadd.f32 %v2736_v12, %v2592_v5  ;;  %v2593_v6 = vmul.f32 %v5348_v54, %v2505_v61  ;;  %v2520_v8 = vmul.f32 %v4106_v50, %v4086_v48 }
 0x30b   :  { %v4110_v1 = vpop.eup %4109  ;;  %v2728_v13 = vadd.f32 %v2727_v42, %v2591_v10  ;;  %v2606_v30 = vmul.f32 %v5370_v22, %v2518_v52  ;;  %v2519_v60 = vmul.f32 %v4108_v53, %v4088_v32 }
 0x30c   :  { %v2746_v9 = vadd.f32 %v2745_v7, %v2593_v6  ;;  %v2608_v31 = vmul.f32 %v5370_v22, %v2520_v8  ;;  %v2521_v16 = vmul.f32 %v4110_v1, %v4090_v47 }
 0x30d   :  { %v2720_v21 = vadd.f32 %v2719_v29, %v2606_v30  ;;  %v2607_v4 = vmul.f32 %v5370_v22, %v2519_v60 }
 0x30e   :  { %v2738_v25 = vadd.f32 %v2737_v43, %v2608_v31  ;;  %v2609_v44 = vmul.f32 %v5370_v22, %v2521_v16 }
 0x30f   :  { %v2721_v46 = vrot.slane %v2720_v21, 4  ;;  %v2729_v12 = vadd.f32 %v2728_v13, %v2607_v4 }
 0x310   :  { %v2739_v39 = vrot.slane %v2738_v25, 4  ;;  %v2747_v54 = vadd.f32 %v2746_v9, %v2609_v44 }
 0x311   :  { %v2730_v24 = vrot.slane %v2729_v12, 4  ;;  %v2722_v35 = vadd.f32 %v2721_v46, %v2720_v21 }
 0x312   :  { %v2748_v51 = vrot.slane %v2747_v54, 4  ;;  %v2740_v38 = vadd.f32 %v2739_v39, %v2738_v25 }
 0x313   :  { %v2723_v58 = vrot.slane %v2722_v35, 2  ;;  %v2731_v56 = vadd.f32 %v2730_v24, %v2729_v12 }
 0x314   :  { %v2741_v28 = vrot.slane %v2740_v38, 2  ;;  %v2749_v37 = vadd.f32 %v2748_v51, %v2747_v54 }
 0x315   :  { %v2724_v63 = vadd.f32 %v2723_v58, %v2722_v35  ;;  %v2732_v62 = vrot.slane %v2731_v56, 2 }
 0x316   :  { %v2742_v48 = vadd.f32 %v2741_v28, %v2740_v38  ;;  %v2750_v17 = vrot.slane %v2749_v37, 2 }
 0x317   :  { %v2725_v32 = vrot.slane %v2724_v63, 1  ;;  %v2733_v47 = vadd.f32 %v2732_v62, %v2731_v56 }
 0x318   :  { %v2743_v20 = vrot.slane %v2742_v48, 1  ;;  %v2751_v22 = vadd.f32 %v2750_v17, %v2749_v37 }
 0x319   :  { %v2726_v2 = vadd.f32 %v2725_v32, %v2724_v63  ;;  %v2734_v40 = vrot.slane %v2733_v47, 1 }
 0x31a   :  { %v2744_v26 = vadd.f32 %v2743_v20, %v2742_v48  ;;  %v2752_v18 = vrot.slane %v2751_v22, 1 }
 0x31b   :  { %v2735_v33 = vadd.f32 %v2734_v40, %v2733_v47  ;;  %v2768_v0 = vadd.f32 %v5520_v14, %v2726_v2 }
 0x31c   :  { %v2753_v11 = vadd.f32 %v2752_v18, %v2751_v22  ;;  %v2770_v57 = vadd.f32 %v5520_v14, %v2744_v26 }
 0x31d   :  { %v2769_v27 = vadd.f32 %v5520_v14, %v2735_v33 }
 0x31e   :  { %v2771_v15 = vadd.f32 %v5520_v14, %v2753_v11 }
 0x31f   :  { %v2839_v34 = vcombine.low %v2768_v0, %v2769_v27 }
 0x320   :  { %v2840_v45 = vcombine.low %v2770_v57, %v2771_v15 }
 0x321   :  { %v2861_v49 = vrot.slane %v2839_v34, %v5540_v19 }
 0x322   :  { %v2868_v42 = vrot.slane %v2840_v45, %v5540_v19 }
 0x324   :  { %v2870_v55 = vcombine.low %v2861_v49, %v2868_v42 }
 0x326   :  { %v2884_v3 = vrot.slane %v2870_v55, %v5540_v19 }
 0x328   :  { %v2885_v7 = vcombine.low %v2877_v41, %v2884_v3 }
 0x32a   :  { %2889 = vst [vmem:[#allocation3 + $0x8] sm:$0xff] %v2885_v7 }
 0x32b   :  { %4122 = shalt.err (!%p4119_p4)
}
 0x32c   :  { %s4123_s22 = scalar_lea.hbm %s6050_s6, 256 }
 0x32d   :  { %p4124_p5 = scmp.ne.s32.totalorder %s6050_s6, %s4123_s22  ;;  %p4127_p6 = scmp.lt.u32.totalorder %s4123_s22, %s6050_s6 }
 0x32f   :  { %p4129_p7 = pnand %p4127_p6, %p4124_p5 }
 0x331   :  { %4132 = shalt.err (!%p4129_p7)
}
 0x332   :  { %2899 = dma.vmem_to_hbm [thread:$0]  %s2897_s20, 256, %s6050_s6, [#allocation4]  }
 0x333   :  { %4133 = dma.done.wait [#allocation4], 256  }
 0x334   :  { %4134 = vsyncadd [#allocation4], 4294967040 }
 0x335   :  { %2903 = vsyncpa [#allocation4], 1 }

</bundles_post_ra>
